<compile_context>
chip_gen: v6e
topology: v6e:2x2x1
jax: 0.10.0
libtpu: 0.0.40
codegen_flags: <defaults>
</compile_context>

<pallas_src>
import functools

import jax
import jax.numpy as jnp
from jax import lax
from jax.experimental import pallas as pl
from jax.experimental.pallas import tpu as pltpu

EPS = 1e-5
VMEM_LIMIT_BYTES = 32 * 1024 * 1024  # within every generation's budget (v7x: 64 MiB phys)


# --------------------------------------------------------------------------- #
# In-kernel helpers
# --------------------------------------------------------------------------- #
def _shift_w(a, s):
    """b[:, w, :] = a[:, w + s, :] with zeros shifted in; s in {-1, 0, +1}.

    Implemented as slice + concat with a zero strip (exact, portable
    semantics).  pltpu.roll(a, -s, axis=1) + a border mask would keep the
    shift on the XLU rotate slot instead of the load/store path.
    """
    if s == 0:
        return a
    zero = jnp.zeros_like(a[:, :1, :])
    if s > 0:
        return jnp.concatenate([a[:, s:, :], zero], axis=1)
    return jnp.concatenate([zero, a[:, :s, :]], axis=1)


def _conv3x3_rows(a, w_ref, H, W, Cin, Cout, compute_dtype):
    """3x3 'same' conv of an H-padded activation slab.

    a:     (H+2, W, Cin) slab; rows 0 and H+1 are the zero halo.
    w_ref: (3, 3*Cin, Cout) weight ref with the kw tap folded into K
           (index [kh, kw*Cin + ci, co]).
    Returns (H*W, Cout) float32 (pre-BN conv output).

    The three kw taps are packed along the lane/contraction axis so the MXU
    sees K = 3*Cin and only 3 matmuls (one per kh, a cheap row slice) are
    issued, instead of 9 K=Cin matmuls over strided-slice copies.
    """
    a = a.astype(compute_dtype)
    cat = jnp.concatenate([_shift_w(a, -1), a, _shift_w(a, 1)], axis=-1)  # (H+2, W, 3*Cin)
    acc = jnp.zeros((H * W, Cout), jnp.float32)
    for kh in range(3):                                   # static unroll
        patch = cat[kh:kh + H].reshape(H * W, 3 * Cin)    # row slice: cheap
        acc = acc + jnp.dot(patch, w_ref[kh],
                            preferred_element_type=jnp.float32)
    return acc


def _write_stats(stats_ref, y):
    """Per-image partial sums for the global BatchNorm statistics."""
    stats_ref[0:1, :] = jnp.sum(y, axis=0, keepdims=True)
    stats_ref[1:2, :] = jnp.sum(y * y, axis=0, keepdims=True)


# --------------------------------------------------------------------------- #
# Kernels (one batch image per grid step)
# --------------------------------------------------------------------------- #
def _conv1_kernel(x_ref, w_ref, ypad_ref, stats_ref, *, compute_dtype):
    Hp, W, Cin = x_ref.shape
    H = Hp - 2
    Cout = w_ref.shape[-1]

    y = _conv3x3_rows(x_ref[...], w_ref, H, W, Cin, Cout, compute_dtype)
    _write_stats(stats_ref, y)

    # Write the pre-BN conv1 output with its H halo already zeroed so the next
    # pass needs no pad scratch / full zero fill (only these 2 rows are zeroed).
    ypad_ref[0:1, :, :] = jnp.zeros((1, W, Cout), ypad_ref.dtype)
    ypad_ref[Hp - 1:Hp, :, :] = jnp.zeros((1, W, Cout), ypad_ref.dtype)
    ypad_ref[1:H + 1, :, :] = y.reshape(H, W, Cout).astype(ypad_ref.dtype)


def _conv2_kernel(ypad_ref, scale_ref, bias_ref, w_ref, y2_ref, stats_ref, *,
                  compute_dtype):
    Hp, W, C = ypad_ref.shape
    H = Hp - 2
    Cout = w_ref.shape[-1]

    # bn1 fused into a single scale/bias FMA, then ReLU.  The H halo rows are
    # forced back to zero (relu(bias) would otherwise leak into conv2).
    a = ypad_ref[...]
    act = jnp.maximum(a * scale_ref[...].reshape(1, 1, C)
                      + bias_ref[...].reshape(1, 1, C), 0.0)
    row = lax.broadcasted_iota(jnp.int32, (Hp, W, C), 0)
    act = jnp.where((row >= 1) & (row <= H), act, 0.0)

    y = _conv3x3_rows(act, w_ref, H, W, C, Cout, compute_dtype)
    _write_stats(stats_ref, y)
    y2_ref[...] = y.reshape(H, W, Cout).astype(y2_ref.dtype)


def _finalize_kernel(y2_ref, x_ref, scale_ref, bias_ref, o_ref):
    C = y2_ref.shape[-1]
    out = (y2_ref[...] * scale_ref[...].reshape(1, 1, C)
           + bias_ref[...].reshape(1, 1, C) + x_ref[...])
    o_ref[...] = jnp.maximum(out, 0.0).astype(o_ref.dtype)


# --------------------------------------------------------------------------- #
# Wrapper
# --------------------------------------------------------------------------- #
def _stats_to_scale_bias(stats, gamma, beta, count):
    """Fold (sum, sumsq) partials into bn scale/bias: bn(y) = y*scale + bias."""
    s = jnp.sum(stats[:, 0, :], axis=0)
    ss = jnp.sum(stats[:, 1, :], axis=0)
    mean = s / count
    var = jnp.maximum(ss / count - mean * mean, 0.0)   # biased variance (train mode)
    scale = gamma * lax.rsqrt(var + EPS)
    bias = beta - mean * scale
    return (scale.reshape(1, -1).astype(jnp.float32),
            bias.reshape(1, -1).astype(jnp.float32))


@functools.partial(jax.jit, static_argnames=("compute_dtype",))
def basic_block_pallas(x_nchw, w1_oihw, g1, b1, w2_oihw, g2, b2, *,
                       compute_dtype=jnp.float32):
    """x_nchw: (N, C, H, W); conv weights in PyTorch OIHW layout (C, C, 3, 3)."""
    N, C, H, W = x_nchw.shape
    Cout = w1_oihw.shape[0]
    assert Cout == C, "BasicBlock with downsample=None requires inplanes == planes"
    Hp = H + 2

    x = jnp.transpose(x_nchw, (0, 2, 3, 1)).astype(jnp.float32)                  # NHWC
    x_hpad = jnp.pad(x, ((0, 0), (1, 1), (0, 0), (0, 0))).astype(compute_dtype)  # H halo only

    def pack_w(w_oihw):
        # OIHW -> HWIO -> fold kw into K: wcat[kh, kw*Cin + ci, co]
        w = jnp.transpose(w_oihw, (2, 3, 1, 0)).astype(compute_dtype)            # (3,3,Ci,Co)
        return w.reshape(3, 3 * C, Cout)

    wcat1, wcat2 = pack_w(w1_oihw), pack_w(w2_oihw)

    cparams = pltpu.CompilerParams(
        dimension_semantics=("parallel",),        # batch grid -> 2 TCs on v7x
        vmem_limit_bytes=VMEM_LIMIT_BYTES)

    spec_hpad = pl.BlockSpec((None, Hp, W, C), lambda n: (n, 0, 0, 0))
    spec_full = pl.BlockSpec((None, H, W, C), lambda n: (n, 0, 0, 0))
    spec_stats = pl.BlockSpec((None, 2, C), lambda n: (n, 0, 0))
    spec_w = pl.BlockSpec((3, 3 * C, C), lambda n: (0, 0, 0))
    spec_vec = pl.BlockSpec((1, C), lambda n: (0, 0))

    # --- pass 1: conv1 (pre-BN) + per-image BN1 partial statistics ----------
    y1pad, stats1 = pl.pallas_call(
        functools.partial(_conv1_kernel, compute_dtype=compute_dtype),
        grid=(N,),
        in_specs=[spec_hpad, spec_w],
        out_specs=(spec_hpad, spec_stats),
        out_shape=(jax.ShapeDtypeStruct((N, Hp, W, C), jnp.float32),
                   jax.ShapeDtypeStruct((N, 2, C), jnp.float32)),
        compiler_params=cparams,
    )(x_hpad, wcat1)

    scale1, bias1 = _stats_to_scale_bias(
        stats1, g1.astype(jnp.float32), b1.astype(jnp.float32), N * H * W)

    # --- pass 2: fused bn1+relu, conv2, per-image BN2 partial statistics ----
    y2, stats2 = pl.pallas_call(
        functools.partial(_conv2_kernel, compute_dtype=compute_dtype),
        grid=(N,),
        in_specs=[spec_hpad, spec_vec, spec_vec, spec_w],
        out_specs=(spec_full, spec_stats),
        out_shape=(jax.ShapeDtypeStruct((N, H, W, C), jnp.float32),
                   jax.ShapeDtypeStruct((N, 2, C), jnp.float32)),
        compiler_params=cparams,
    )(y1pad, scale1, bias1, wcat2)

    scale2, bias2 = _stats_to_scale_bias(
        stats2, g2.astype(jnp.float32), b2.astype(jnp.float32), N * H * W)

    # --- pass 3: fused bn2 + residual (unpadded x as its own input) + relu --
    out_nhwc = pl.pallas_call(
        _finalize_kernel,
        grid=(N,),
        in_specs=[spec_full, spec_full, spec_vec, spec_vec],
        out_specs=spec_full,
        out_shape=jax.ShapeDtypeStruct((N, H, W, C), jnp.float32),
        compiler_params=cparams,
    )(y2, x, scale2, bias2)

    return jnp.transpose(out_nhwc, (0, 3, 1, 2))                                  # back to NCHW


# ---------------- pure-JAX reference (for correctness check) ----------------
def basic_block_ref(x_nchw, w1_oihw, g1, b1, w2_oihw, g2, b2,
                    compute_dtype=jnp.float32):
    x = jnp.transpose(x_nchw, (0, 2, 3, 1)).astype(jnp.float32)
    w1 = jnp.transpose(w1_oihw, (2, 3, 1, 0)).astype(jnp.float32)
    w2 = jnp.transpose(w2_oihw, (2, 3, 1, 0)).astype(jnp.float32)
    dn = lax.conv_dimension_numbers(x.shape, w1.shape, ("NHWC", "HWIO", "NHWC"))

    def conv(a, w):
        return lax.conv_general_dilated(
            a.astype(compute_dtype), w.astype(compute_dtype), (1, 1),
            ((1, 1), (1, 1)), dimension_numbers=dn,
            preferred_element_type=jnp.float32)

    def bn(a, g, b):
        mean = jnp.mean(a, axis=(0, 1, 2), keepdims=True)
        var = jnp.mean((a - mean) ** 2, axis=(0, 1, 2), keepdims=True)
        return (a - mean) * lax.rsqrt(var + EPS) * g.reshape(1, 1, 1, -1) \
            + b.reshape(1, 1, 1, -1)

    out = jnp.maximum(bn(conv(x, w1), g1, b1), 0.0)
    out = bn(conv(out, w2), g2, b2) + x
    return jnp.transpose(jnp.maximum(out, 0.0), (0, 3, 1, 2))


if __name__ == "__main__":
    N, C, H, W = 2, 8, 16, 16           # inplanes == planes == 8, stride=1
    key = jax.random.PRNGKey(0)
    kx, kw1, kw2, kg1, kb1, kg2, kb2 = jax.random.split(key, 7)

    x = jax.random.normal(kx, (N, C, H, W), jnp.float32)
    w1 = jax.random.normal(kw1, (C, C, 3, 3), jnp.float32) * 0.1
    w2 = jax.random.normal(kw2, (C, C, 3, 3), jnp.float32) * 0.1
    g1 = 1.0 + 0.1 * jax.random.normal(kg1, (C,), jnp.float32)
    b1 = 0.1 * jax.random.normal(kb1, (C,), jnp.float32)
    g2 = 1.0 + 0.1 * jax.random.normal(kg2, (C,), jnp.float32)
    b2 = 0.1 * jax.random.normal(kb2, (C,), jnp.float32)

    # f32 MXU path: tight check against the XLA reference.
    out = jax.block_until_ready(basic_block_pallas(x, w1, g1, b1, w2, g2, b2))
    ref = basic_block_ref(x, w1, g1, b1, w2, g2, b2)
    assert out.shape == (N, C, H, W)
    assert jnp.allclose(out, ref, atol=2e-4, rtol=2e-4), "f32 mismatch vs JAX reference"

    # bf16 MXU operand path (native on v6e/v7x), f32 accumulation / BN math:
    # checked against a reference that also feeds bf16 conv operands.
    out_bf16 = jax.block_until_ready(
        basic_block_pallas(x, w1, g1, b1, w2, g2, b2, compute_dtype=jnp.bfloat16))
    ref_bf16 = basic_block_ref(x, w1, g1, b1, w2, g2, b2, compute_dtype=jnp.bfloat16)
    assert jnp.allclose(out_bf16, ref_bf16, atol=2e-2, rtol=2e-2), \
        "bf16 mismatch vs JAX reference"

    print("KERNEL_OK")
</pallas_src>

<mosaic_0001>
module attributes {stable_mosaic.version = 11 : i64} {
  func.func @_conv1_kernel(%arg0: i32, %arg1: memref<1x18x16x8xf32, #tpu.memory_space<vmem>>, %arg2: memref<3x24x8xf32, #tpu.memory_space<vmem>>, %arg3: memref<1x18x16x8xf32, #tpu.memory_space<vmem>>, %arg4: memref<1x2x8xf32, #tpu.memory_space<vmem>>) attributes {dimension_semantics = [#tpu.dimension_semantics<parallel>], iteration_bounds = array<i64: 2>, scalar_prefetch = 0 : i64, scratch_operands = 0 : i64, tpu.core_type = #tpu.core_type<tc>, window_params = [{transform_indices = @transform_0, window_bounds = array<i64: 1, 18, 16, 8>}, {pipeline_mode = #tpu.pipeline_mode<synchronous>, transform_indices = @transform_1, window_bounds = array<i64: 3, 24, 8>}, {transform_indices = @transform_2, window_bounds = array<i64: 1, 18, 16, 8>}, {transform_indices = @transform_3, window_bounds = array<i64: 1, 2, 8>}]} {
    %c0 = arith.constant 0 : index
    %c0_0 = arith.constant 0 : index
    %c0_1 = arith.constant 0 : index
    %c0_2 = arith.constant 0 : index
    %0 = vector.load %arg1[%c0, %c0_0, %c0_1, %c0_2] : memref<1x18x16x8xf32, #tpu.memory_space<vmem>>, vector<1x18x16x8xf32>
    %1 = vector.shape_cast %0 : vector<1x18x16x8xf32> to vector<18x16x8xf32>
    %cst = arith.constant 0.000000e+00 : f32
    %2 = vector.broadcast %cst : f32 to vector<18x1x8xf32>
    %3 = vector.extract_strided_slice %1 {offsets = [0, 0, 0], sizes = [18, 15, 8], strides = [1, 1, 1]} : vector<18x16x8xf32> to vector<18x15x8xf32>
    %4 = tpu.concatenate %2, %3 in 1 : vector<18x1x8xf32>, vector<18x15x8xf32> -> vector<18x16x8xf32>
    %cst_3 = arith.constant 0.000000e+00 : f32
    %5 = vector.broadcast %cst_3 : f32 to vector<18x1x8xf32>
    %6 = vector.extract_strided_slice %1 {offsets = [0, 1, 0], sizes = [18, 15, 8], strides = [1, 1, 1]} : vector<18x16x8xf32> to vector<18x15x8xf32>
    %7 = tpu.concatenate %6, %5 in 1 : vector<18x15x8xf32>, vector<18x1x8xf32> -> vector<18x16x8xf32>
    %8 = tpu.concatenate %4, %1, %7 in 2 : vector<18x16x8xf32>, vector<18x16x8xf32>, vector<18x16x8xf32> -> vector<18x16x24xf32>
    %cst_4 = arith.constant 0.000000e+00 : f32
    %9 = vector.broadcast %cst_4 : f32 to vector<256x8xf32>
    %10 = vector.extract_strided_slice %8 {offsets = [0, 0, 0], sizes = [16, 16, 24], strides = [1, 1, 1]} : vector<18x16x24xf32> to vector<16x16x24xf32>
    %11 = vector.shape_cast %10 : vector<16x16x24xf32> to vector<256x24xf32>
    %c0_5 = arith.constant 0 : index
    %c0_6 = arith.constant 0 : index
    %c0_7 = arith.constant 0 : index
    %12 = vector.load %arg2[%c0_5, %c0_6, %c0_7] : memref<3x24x8xf32, #tpu.memory_space<vmem>>, vector<1x24x8xf32>
    %13 = vector.shape_cast %12 : vector<1x24x8xf32> to vector<24x8xf32>
    %cst_8 = arith.constant dense<0.000000e+00> : vector<256x8xf32>
    %14 = tpu.matmul %11, %13, %cst_8 {dimension_numbers = #tpu.dot_dimension_numbers<[1], [0], [0], [1], [0, 0, 1, 1], [], []>} : vector<256x24xf32>, vector<24x8xf32>, vector<256x8xf32> -> vector<256x8xf32>
    %15 = arith.addf %9, %14 : vector<256x8xf32>
    %16 = vector.extract_strided_slice %8 {offsets = [1, 0, 0], sizes = [16, 16, 24], strides = [1, 1, 1]} : vector<18x16x24xf32> to vector<16x16x24xf32>
    %17 = vector.shape_cast %16 : vector<16x16x24xf32> to vector<256x24xf32>
    %c1 = arith.constant 1 : index
    %c0_9 = arith.constant 0 : index
    %c0_10 = arith.constant 0 : index
    %18 = vector.load %arg2[%c1, %c0_9, %c0_10] : memref<3x24x8xf32, #tpu.memory_space<vmem>>, vector<1x24x8xf32>
    %19 = vector.shape_cast %18 : vector<1x24x8xf32> to vector<24x8xf32>
    %cst_11 = arith.constant dense<0.000000e+00> : vector<256x8xf32>
    %20 = tpu.matmul %17, %19, %cst_11 {dimension_numbers = #tpu.dot_dimension_numbers<[1], [0], [0], [1], [0, 0, 1, 1], [], []>} : vector<256x24xf32>, vector<24x8xf32>, vector<256x8xf32> -> vector<256x8xf32>
    %21 = arith.addf %15, %20 : vector<256x8xf32>
    %22 = vector.extract_strided_slice %8 {offsets = [2, 0, 0], sizes = [16, 16, 24], strides = [1, 1, 1]} : vector<18x16x24xf32> to vector<16x16x24xf32>
    %23 = vector.shape_cast %22 : vector<16x16x24xf32> to vector<256x24xf32>
    %c2 = arith.constant 2 : index
    %c0_12 = arith.constant 0 : index
    %c0_13 = arith.constant 0 : index
    %24 = vector.load %arg2[%c2, %c0_12, %c0_13] : memref<3x24x8xf32, #tpu.memory_space<vmem>>, vector<1x24x8xf32>
    %25 = vector.shape_cast %24 : vector<1x24x8xf32> to vector<24x8xf32>
    %cst_14 = arith.constant dense<0.000000e+00> : vector<256x8xf32>
    %26 = tpu.matmul %23, %25, %cst_14 {dimension_numbers = #tpu.dot_dimension_numbers<[1], [0], [0], [1], [0, 0, 1, 1], [], []>} : vector<256x24xf32>, vector<24x8xf32>, vector<256x8xf32> -> vector<256x8xf32>
    %27 = arith.addf %21, %26 : vector<256x8xf32>
    %cst_15 = arith.constant dense<0.000000e+00> : vector<8xf32>
    %28 = vector.multi_reduction <add>, %27, %cst_15 [0] : vector<256x8xf32> to vector<8xf32>
    %29 = vector.shape_cast %28 : vector<8xf32> to vector<1x8xf32>
    %c0_16 = arith.constant 0 : index
    %c0_17 = arith.constant 0 : index
    %c0_18 = arith.constant 0 : index
    %30 = vector.load %arg4[%c0_16, %c0_17, %c0_18] : memref<1x2x8xf32, #tpu.memory_space<vmem>>, vector<1x1x8xf32>
    %31 = vector.shape_cast %30 : vector<1x1x8xf32> to vector<1x8xf32>
    %32 = vector.shape_cast %29 : vector<1x8xf32> to vector<1x1x8xf32>
    tpu.vector_store %arg4[%c0_16, %c0_17, %c0_18], %32 {strides = array<i32>} : memref<1x2x8xf32, #tpu.memory_space<vmem>>, vector<1x1x8xf32>,
    %33 = arith.mulf %27, %27 : vector<256x8xf32>
    %cst_19 = arith.constant dense<0.000000e+00> : vector<8xf32>
    %34 = vector.multi_reduction <add>, %33, %cst_19 [0] : vector<256x8xf32> to vector<8xf32>
    %35 = vector.shape_cast %34 : vector<8xf32> to vector<1x8xf32>
    %c0_20 = arith.constant 0 : index
    %c1_21 = arith.constant 1 : index
    %c0_22 = arith.constant 0 : index
    %36 = vector.load %arg4[%c0_20, %c1_21, %c0_22] : memref<1x2x8xf32, #tpu.memory_space<vmem>>, vector<1x1x8xf32>
    %37 = vector.shape_cast %36 : vector<1x1x8xf32> to vector<1x8xf32>
    %38 = vector.shape_cast %35 : vector<1x8xf32> to vector<1x1x8xf32>
    tpu.vector_store %arg4[%c0_20, %c1_21, %c0_22], %38 {strides = array<i32>} : memref<1x2x8xf32, #tpu.memory_space<vmem>>, vector<1x1x8xf32>,
    %cst_23 = arith.constant 0.000000e+00 : f32
    %39 = vector.broadcast %cst_23 : f32 to vector<1x16x8xf32>
    %c0_24 = arith.constant 0 : index
    %c0_25 = arith.constant 0 : index
    %c0_26 = arith.constant 0 : index
    %c0_27 = arith.constant 0 : index
    %40 = vector.load %arg3[%c0_24, %c0_25, %c0_26, %c0_27] : memref<1x18x16x8xf32, #tpu.memory_space<vmem>>, vector<1x1x16x8xf32>
    %41 = vector.shape_cast %40 : vector<1x1x16x8xf32> to vector<1x16x8xf32>
    %42 = vector.shape_cast %39 : vector<1x16x8xf32> to vector<1x1x16x8xf32>
    tpu.vector_store %arg3[%c0_24, %c0_25, %c0_26, %c0_27], %42 {strides = array<i32>} : memref<1x18x16x8xf32, #tpu.memory_space<vmem>>, vector<1x1x16x8xf32>,
    %cst_28 = arith.constant 0.000000e+00 : f32
    %43 = vector.broadcast %cst_28 : f32 to vector<1x16x8xf32>
    %c0_29 = arith.constant 0 : index
    %c17 = arith.constant 17 : index
    %c0_30 = arith.constant 0 : index
    %c0_31 = arith.constant 0 : index
    %44 = vector.load %arg3[%c0_29, %c17, %c0_30, %c0_31] : memref<1x18x16x8xf32, #tpu.memory_space<vmem>>, vector<1x1x16x8xf32>
    %45 = vector.shape_cast %44 : vector<1x1x16x8xf32> to vector<1x16x8xf32>
    %46 = vector.shape_cast %43 : vector<1x16x8xf32> to vector<1x1x16x8xf32>
    tpu.vector_store %arg3[%c0_29, %c17, %c0_30, %c0_31], %46 {strides = array<i32>} : memref<1x18x16x8xf32, #tpu.memory_space<vmem>>, vector<1x1x16x8xf32>,
    %47 = vector.shape_cast %27 : vector<256x8xf32> to vector<16x16x8xf32>
    %c0_32 = arith.constant 0 : index
    %c1_33 = arith.constant 1 : index
    %c0_34 = arith.constant 0 : index
    %c0_35 = arith.constant 0 : index
    %48 = vector.load %arg3[%c0_32, %c1_33, %c0_34, %c0_35] : memref<1x18x16x8xf32, #tpu.memory_space<vmem>>, vector<1x16x16x8xf32>
    %49 = vector.shape_cast %48 : vector<1x16x16x8xf32> to vector<16x16x8xf32>
    %50 = vector.shape_cast %47 : vector<16x16x8xf32> to vector<1x16x16x8xf32>
    tpu.vector_store %arg3[%c0_32, %c1_33, %c0_34, %c0_35], %50 {strides = array<i32>} : memref<1x18x16x8xf32, #tpu.memory_space<vmem>>, vector<1x16x16x8xf32>,
    return
  }
  func.func @transform_0(%arg0: i32) -> (i32, i32, i32, i32) {
    %c0_i32 = arith.constant 0 : i32
    %c0_i32_0 = arith.constant 0 : i32
    %c0_i32_1 = arith.constant 0 : i32
    %c0_i32_2 = arith.constant 0 : i32
    return %arg0, %c0_i32, %c0_i32_0, %c0_i32_1 : i32, i32, i32, i32
  }
  func.func @transform_1(%arg0: i32) -> (i32, i32, i32) {
    %c0_i32 = arith.constant 0 : i32
    %c0_i32_0 = arith.constant 0 : i32
    %c0_i32_1 = arith.constant 0 : i32
    %c0_i32_2 = arith.constant 0 : i32
    return %c0_i32, %c0_i32_0, %c0_i32_1 : i32, i32, i32
  }
  func.func @transform_2(%arg0: i32) -> (i32, i32, i32, i32) {
    %c0_i32 = arith.constant 0 : i32
    %c0_i32_0 = arith.constant 0 : i32
    %c0_i32_1 = arith.constant 0 : i32
    %c0_i32_2 = arith.constant 0 : i32
    return %arg0, %c0_i32, %c0_i32_0, %c0_i32_1 : i32, i32, i32, i32
  }
  func.func @transform_3(%arg0: i32) -> (i32, i32, i32) {
    %c0_i32 = arith.constant 0 : i32
    %c0_i32_0 = arith.constant 0 : i32
    %c0_i32_1 = arith.constant 0 : i32
    return %arg0, %c0_i32, %c0_i32_0 : i32, i32, i32
  }
}

module attributes {stable_mosaic.version = 11 : i64} {
  func.func @_finalize_kernel(%arg0: i32, %arg1: memref<1x16x16x8xf32, #tpu.memory_space<vmem>>, %arg2: memref<1x16x16x8xf32, #tpu.memory_space<vmem>>, %arg3: memref<1x8xf32, #tpu.memory_space<vmem>>, %arg4: memref<1x8xf32, #tpu.memory_space<vmem>>, %arg5: memref<1x16x16x8xf32, #tpu.memory_space<vmem>>) attributes {dimension_semantics = [#tpu.dimension_semantics<parallel>], iteration_bounds = array<i64: 2>, scalar_prefetch = 0 : i64, scratch_operands = 0 : i64, tpu.core_type = #tpu.core_type<tc>, window_params = [{transform_indices = @transform_0, window_bounds = array<i64: 1, 16, 16, 8>}, {transform_indices = @transform_1, window_bounds = array<i64: 1, 16, 16, 8>}, {pipeline_mode = #tpu.pipeline_mode<synchronous>, transform_indices = @transform_2, window_bounds = array<i64: 1, 8>}, {pipeline_mode = #tpu.pipeline_mode<synchronous>, transform_indices = @transform_3, window_bounds = array<i64: 1, 8>}, {transform_indices = @transform_4, window_bounds = array<i64: 1, 16, 16, 8>}]} {
    %c0 = arith.constant 0 : index
    %c0_0 = arith.constant 0 : index
    %c0_1 = arith.constant 0 : index
    %c0_2 = arith.constant 0 : index
    %0 = vector.load %arg1[%c0, %c0_0, %c0_1, %c0_2] : memref<1x16x16x8xf32, #tpu.memory_space<vmem>>, vector<1x16x16x8xf32>
    %1 = vector.shape_cast %0 : vector<1x16x16x8xf32> to vector<16x16x8xf32>
    %c0_3 = arith.constant 0 : index
    %c0_4 = arith.constant 0 : index
    %2 = vector.load %arg3[%c0_3, %c0_4] : memref<1x8xf32, #tpu.memory_space<vmem>>, vector<1x8xf32>
    %3 = vector.shape_cast %2 : vector<1x8xf32> to vector<1x1x8xf32>
    %4 = vector.broadcast %3 : vector<1x1x8xf32> to vector<16x16x8xf32>
    %5 = arith.mulf %1, %4 : vector<16x16x8xf32>
    %c0_5 = arith.constant 0 : index
    %c0_6 = arith.constant 0 : index
    %6 = vector.load %arg4[%c0_5, %c0_6] : memref<1x8xf32, #tpu.memory_space<vmem>>, vector<1x8xf32>
    %7 = vector.shape_cast %6 : vector<1x8xf32> to vector<1x1x8xf32>
    %8 = vector.broadcast %7 : vector<1x1x8xf32> to vector<16x16x8xf32>
    %9 = arith.addf %5, %8 : vector<16x16x8xf32>
    %c0_7 = arith.constant 0 : index
    %c0_8 = arith.constant 0 : index
    %c0_9 = arith.constant 0 : index
    %c0_10 = arith.constant 0 : index
    %10 = vector.load %arg2[%c0_7, %c0_8, %c0_9, %c0_10] : memref<1x16x16x8xf32, #tpu.memory_space<vmem>>, vector<1x16x16x8xf32>
    %11 = vector.shape_cast %10 : vector<1x16x16x8xf32> to vector<16x16x8xf32>
    %12 = arith.addf %9, %11 : vector<16x16x8xf32>
    %cst = arith.constant 0.000000e+00 : f32
    %13 = vector.broadcast %cst : f32 to vector<16x16x8xf32>
    %14 = arith.maximumf %12, %13 : vector<16x16x8xf32>
    %c0_11 = arith.constant 0 : index
    %c0_12 = arith.constant 0 : index
    %c0_13 = arith.constant 0 : index
    %c0_14 = arith.constant 0 : index
    %15 = vector.load %arg5[%c0_11, %c0_12, %c0_13, %c0_14] : memref<1x16x16x8xf32, #tpu.memory_space<vmem>>, vector<1x16x16x8xf32>
    %16 = vector.shape_cast %15 : vector<1x16x16x8xf32> to vector<16x16x8xf32>
    %17 = vector.shape_cast %14 : vector<16x16x8xf32> to vector<1x16x16x8xf32>
    tpu.vector_store %arg5[%c0_11, %c0_12, %c0_13, %c0_14], %17 {strides = array<i32>} : memref<1x16x16x8xf32, #tpu.memory_space<vmem>>, vector<1x16x16x8xf32>,
    return
  }
  func.func @transform_0(%arg0: i32) -> (i32, i32, i32, i32) {
    %c0_i32 = arith.constant 0 : i32
    %c0_i32_0 = arith.constant 0 : i32
    %c0_i32_1 = arith.constant 0 : i32
    %c0_i32_2 = arith.constant 0 : i32
    return %arg0, %c0_i32, %c0_i32_0, %c0_i32_1 : i32, i32, i32, i32
  }
  func.func @transform_1(%arg0: i32) -> (i32, i32, i32, i32) {
    %c0_i32 = arith.constant 0 : i32
    %c0_i32_0 = arith.constant 0 : i32
    %c0_i32_1 = arith.constant 0 : i32
    %c0_i32_2 = arith.constant 0 : i32
    return %arg0, %c0_i32, %c0_i32_0, %c0_i32_1 : i32, i32, i32, i32
  }
  func.func @transform_2(%arg0: i32) -> (i32, i32) {
    %c0_i32 = arith.constant 0 : i32
    %c0_i32_0 = arith.constant 0 : i32
    %c0_i32_1 = arith.constant 0 : i32
    return %c0_i32, %c0_i32_0 : i32, i32
  }
  func.func @transform_3(%arg0: i32) -> (i32, i32) {
    %c0_i32 = arith.constant 0 : i32
    %c0_i32_0 = arith.constant 0 : i32
    %c0_i32_1 = arith.constant 0 : i32
    return %c0_i32, %c0_i32_0 : i32, i32
  }
  func.func @transform_4(%arg0: i32) -> (i32, i32, i32, i32) {
    %c0_i32 = arith.constant 0 : i32
    %c0_i32_0 = arith.constant 0 : i32
    %c0_i32_1 = arith.constant 0 : i32
    %c0_i32_2 = arith.constant 0 : i32
    return %arg0, %c0_i32, %c0_i32_0, %c0_i32_1 : i32, i32, i32, i32
  }
}

module attributes {stable_mosaic.version = 11 : i64} {
  func.func @_conv2_kernel(%arg0: i32, %arg1: memref<1x18x16x8xf32, #tpu.memory_space<vmem>>, %arg2: memref<1x8xf32, #tpu.memory_space<vmem>>, %arg3: memref<1x8xf32, #tpu.memory_space<vmem>>, %arg4: memref<3x24x8xf32, #tpu.memory_space<vmem>>, %arg5: memref<1x16x16x8xf32, #tpu.memory_space<vmem>>, %arg6: memref<1x2x8xf32, #tpu.memory_space<vmem>>) attributes {dimension_semantics = [#tpu.dimension_semantics<parallel>], iteration_bounds = array<i64: 2>, scalar_prefetch = 0 : i64, scratch_operands = 0 : i64, tpu.core_type = #tpu.core_type<tc>, window_params = [{transform_indices = @transform_0, window_bounds = array<i64: 1, 18, 16, 8>}, {pipeline_mode = #tpu.pipeline_mode<synchronous>, transform_indices = @transform_1, window_bounds = array<i64: 1, 8>}, {pipeline_mode = #tpu.pipeline_mode<synchronous>, transform_indices = @transform_2, window_bounds = array<i64: 1, 8>}, {pipeline_mode = #tpu.pipeline_mode<synchronous>, transform_indices = @transform_3, window_bounds = array<i64: 3, 24, 8>}, {transform_indices = @transform_4, window_bounds = array<i64: 1, 16, 16, 8>}, {transform_indices = @transform_5, window_bounds = array<i64: 1, 2, 8>}]} {
    %c0 = arith.constant 0 : index
    %c0_0 = arith.constant 0 : index
    %c0_1 = arith.constant 0 : index
    %c0_2 = arith.constant 0 : index
    %0 = vector.load %arg1[%c0, %c0_0, %c0_1, %c0_2] : memref<1x18x16x8xf32, #tpu.memory_space<vmem>>, vector<1x18x16x8xf32>
    %1 = vector.shape_cast %0 : vector<1x18x16x8xf32> to vector<18x16x8xf32>
    %c0_3 = arith.constant 0 : index
    %c0_4 = arith.constant 0 : index
    %2 = vector.load %arg2[%c0_3, %c0_4] : memref<1x8xf32, #tpu.memory_space<vmem>>, vector<1x8xf32>
    %3 = vector.shape_cast %2 : vector<1x8xf32> to vector<1x1x8xf32>
    %4 = vector.broadcast %3 : vector<1x1x8xf32> to vector<18x16x8xf32>
    %5 = arith.mulf %1, %4 : vector<18x16x8xf32>
    %c0_5 = arith.constant 0 : index
    %c0_6 = arith.constant 0 : index
    %6 = vector.load %arg3[%c0_5, %c0_6] : memref<1x8xf32, #tpu.memory_space<vmem>>, vector<1x8xf32>
    %7 = vector.shape_cast %6 : vector<1x8xf32> to vector<1x1x8xf32>
    %8 = vector.broadcast %7 : vector<1x1x8xf32> to vector<18x16x8xf32>
    %9 = arith.addf %5, %8 : vector<18x16x8xf32>
    %cst = arith.constant 0.000000e+00 : f32
    %10 = vector.broadcast %cst : f32 to vector<18x16x8xf32>
    %11 = arith.maximumf %9, %10 : vector<18x16x8xf32>
    %12 = tpu.iota {dimensions = array<i32: 0>} : vector<18x16x8xi32>
    %c1_i32 = arith.constant 1 : i32
    %13 = vector.broadcast %c1_i32 : i32 to vector<18x16x8xi32>
    %14 = arith.cmpi sge, %12, %13 : vector<18x16x8xi32>
    %c16_i32 = arith.constant 16 : i32
    %15 = vector.broadcast %c16_i32 : i32 to vector<18x16x8xi32>
    %16 = arith.cmpi sle, %12, %15 : vector<18x16x8xi32>
    %17 = arith.andi %14, %16 : vector<18x16x8xi1>
    %cst_7 = arith.constant 0.000000e+00 : f32
    %18 = vector.broadcast %cst_7 : f32 to vector<18x16x8xf32>
    %19 = arith.select %17, %11, %18 : vector<18x16x8xi1>, vector<18x16x8xf32>
    %cst_8 = arith.constant 0.000000e+00 : f32
    %20 = vector.broadcast %cst_8 : f32 to vector<18x1x8xf32>
    %21 = vector.extract_strided_slice %19 {offsets = [0, 0, 0], sizes = [18, 15, 8], strides = [1, 1, 1]} : vector<18x16x8xf32> to vector<18x15x8xf32>
    %22 = tpu.concatenate %20, %21 in 1 : vector<18x1x8xf32>, vector<18x15x8xf32> -> vector<18x16x8xf32>
    %cst_9 = arith.constant 0.000000e+00 : f32
    %23 = vector.broadcast %cst_9 : f32 to vector<18x1x8xf32>
    %24 = vector.extract_strided_slice %19 {offsets = [0, 1, 0], sizes = [18, 15, 8], strides = [1, 1, 1]} : vector<18x16x8xf32> to vector<18x15x8xf32>
    %25 = tpu.concatenate %24, %23 in 1 : vector<18x15x8xf32>, vector<18x1x8xf32> -> vector<18x16x8xf32>
    %26 = tpu.concatenate %22, %19, %25 in 2 : vector<18x16x8xf32>, vector<18x16x8xf32>, vector<18x16x8xf32> -> vector<18x16x24xf32>
    %cst_10 = arith.constant 0.000000e+00 : f32
    %27 = vector.broadcast %cst_10 : f32 to vector<256x8xf32>
    %28 = vector.extract_strided_slice %26 {offsets = [0, 0, 0], sizes = [16, 16, 24], strides = [1, 1, 1]} : vector<18x16x24xf32> to vector<16x16x24xf32>
    %29 = vector.shape_cast %28 : vector<16x16x24xf32> to vector<256x24xf32>
    %c0_11 = arith.constant 0 : index
    %c0_12 = arith.constant 0 : index
    %c0_13 = arith.constant 0 : index
    %30 = vector.load %arg4[%c0_11, %c0_12, %c0_13] : memref<3x24x8xf32, #tpu.memory_space<vmem>>, vector<1x24x8xf32>
    %31 = vector.shape_cast %30 : vector<1x24x8xf32> to vector<24x8xf32>
    %cst_14 = arith.constant dense<0.000000e+00> : vector<256x8xf32>
    %32 = tpu.matmul %29, %31, %cst_14 {dimension_numbers = #tpu.dot_dimension_numbers<[1], [0], [0], [1], [0, 0, 1, 1], [], []>} : vector<256x24xf32>, vector<24x8xf32>, vector<256x8xf32> -> vector<256x8xf32>
    %33 = arith.addf %27, %32 : vector<256x8xf32>
    %34 = vector.extract_strided_slice %26 {offsets = [1, 0, 0], sizes = [16, 16, 24], strides = [1, 1, 1]} : vector<18x16x24xf32> to vector<16x16x24xf32>
    %35 = vector.shape_cast %34 : vector<16x16x24xf32> to vector<256x24xf32>
    %c1 = arith.constant 1 : index
    %c0_15 = arith.constant 0 : index
    %c0_16 = arith.constant 0 : index
    %36 = vector.load %arg4[%c1, %c0_15, %c0_16] : memref<3x24x8xf32, #tpu.memory_space<vmem>>, vector<1x24x8xf32>
    %37 = vector.shape_cast %36 : vector<1x24x8xf32> to vector<24x8xf32>
    %cst_17 = arith.constant dense<0.000000e+00> : vector<256x8xf32>
    %38 = tpu.matmul %35, %37, %cst_17 {dimension_numbers = #tpu.dot_dimension_numbers<[1], [0], [0], [1], [0, 0, 1, 1], [], []>} : vector<256x24xf32>, vector<24x8xf32>, vector<256x8xf32> -> vector<256x8xf32>
    %39 = arith.addf %33, %38 : vector<256x8xf32>
    %40 = vector.extract_strided_slice %26 {offsets = [2, 0, 0], sizes = [16, 16, 24], strides = [1, 1, 1]} : vector<18x16x24xf32> to vector<16x16x24xf32>
    %41 = vector.shape_cast %40 : vector<16x16x24xf32> to vector<256x24xf32>
    %c2 = arith.constant 2 : index
    %c0_18 = arith.constant 0 : index
    %c0_19 = arith.constant 0 : index
    %42 = vector.load %arg4[%c2, %c0_18, %c0_19] : memref<3x24x8xf32, #tpu.memory_space<vmem>>, vector<1x24x8xf32>
    %43 = vector.shape_cast %42 : vector<1x24x8xf32> to vector<24x8xf32>
    %cst_20 = arith.constant dense<0.000000e+00> : vector<256x8xf32>
    %44 = tpu.matmul %41, %43, %cst_20 {dimension_numbers = #tpu.dot_dimension_numbers<[1], [0], [0], [1], [0, 0, 1, 1], [], []>} : vector<256x24xf32>, vector<24x8xf32>, vector<256x8xf32> -> vector<256x8xf32>
    %45 = arith.addf %39, %44 : vector<256x8xf32>
    %cst_21 = arith.constant dense<0.000000e+00> : vector<8xf32>
    %46 = vector.multi_reduction <add>, %45, %cst_21 [0] : vector<256x8xf32> to vector<8xf32>
    %47 = vector.shape_cast %46 : vector<8xf32> to vector<1x8xf32>
    %c0_22 = arith.constant 0 : index
    %c0_23 = arith.constant 0 : index
    %c0_24 = arith.constant 0 : index
    %48 = vector.load %arg6[%c0_22, %c0_23, %c0_24] : memref<1x2x8xf32, #tpu.memory_space<vmem>>, vector<1x1x8xf32>
    %49 = vector.shape_cast %48 : vector<1x1x8xf32> to vector<1x8xf32>
    %50 = vector.shape_cast %47 : vector<1x8xf32> to vector<1x1x8xf32>
    tpu.vector_store %arg6[%c0_22, %c0_23, %c0_24], %50 {strides = array<i32>} : memref<1x2x8xf32, #tpu.memory_space<vmem>>, vector<1x1x8xf32>,
    %51 = arith.mulf %45, %45 : vector<256x8xf32>
    %cst_25 = arith.constant dense<0.000000e+00> : vector<8xf32>
    %52 = vector.multi_reduction <add>, %51, %cst_25 [0] : vector<256x8xf32> to vector<8xf32>
    %53 = vector.shape_cast %52 : vector<8xf32> to vector<1x8xf32>
    %c0_26 = arith.constant 0 : index
    %c1_27 = arith.constant 1 : index
    %c0_28 = arith.constant 0 : index
    %54 = vector.load %arg6[%c0_26, %c1_27, %c0_28] : memref<1x2x8xf32, #tpu.memory_space<vmem>>, vector<1x1x8xf32>
    %55 = vector.shape_cast %54 : vector<1x1x8xf32> to vector<1x8xf32>
    %56 = vector.shape_cast %53 : vector<1x8xf32> to vector<1x1x8xf32>
    tpu.vector_store %arg6[%c0_26, %c1_27, %c0_28], %56 {strides = array<i32>} : memref<1x2x8xf32, #tpu.memory_space<vmem>>, vector<1x1x8xf32>,
    %57 = vector.shape_cast %45 : vector<256x8xf32> to vector<16x16x8xf32>
    %c0_29 = arith.constant 0 : index
    %c0_30 = arith.constant 0 : index
    %c0_31 = arith.constant 0 : index
    %c0_32 = arith.constant 0 : index
    %58 = vector.load %arg5[%c0_29, %c0_30, %c0_31, %c0_32] : memref<1x16x16x8xf32, #tpu.memory_space<vmem>>, vector<1x16x16x8xf32>
    %59 = vector.shape_cast %58 : vector<1x16x16x8xf32> to vector<16x16x8xf32>
    %60 = vector.shape_cast %57 : vector<16x16x8xf32> to vector<1x16x16x8xf32>
    tpu.vector_store %arg5[%c0_29, %c0_30, %c0_31, %c0_32], %60 {strides = array<i32>} : memref<1x16x16x8xf32, #tpu.memory_space<vmem>>, vector<1x16x16x8xf32>,
    return
  }
  func.func @transform_0(%arg0: i32) -> (i32, i32, i32, i32) {
    %c0_i32 = arith.constant 0 : i32
    %c0_i32_0 = arith.constant 0 : i32
    %c0_i32_1 = arith.constant 0 : i32
    %c0_i32_2 = arith.constant 0 : i32
    return %arg0, %c0_i32, %c0_i32_0, %c0_i32_1 : i32, i32, i32, i32
  }
  func.func @transform_1(%arg0: i32) -> (i32, i32) {
    %c0_i32 = arith.constant 0 : i32
    %c0_i32_0 = arith.constant 0 : i32
    %c0_i32_1 = arith.constant 0 : i32
    return %c0_i32, %c0_i32_0 : i32, i32
  }
  func.func @transform_2(%arg0: i32) -> (i32, i32) {
    %c0_i32 = arith.constant 0 : i32
    %c0_i32_0 = arith.constant 0 : i32
    %c0_i32_1 = arith.constant 0 : i32
    return %c0_i32, %c0_i32_0 : i32, i32
  }
  func.func @transform_3(%arg0: i32) -> (i32, i32, i32) {
    %c0_i32 = arith.constant 0 : i32
    %c0_i32_0 = arith.constant 0 : i32
    %c0_i32_1 = arith.constant 0 : i32
    %c0_i32_2 = arith.constant 0 : i32
    return %c0_i32, %c0_i32_0, %c0_i32_1 : i32, i32, i32
  }
  func.func @transform_4(%arg0: i32) -> (i32, i32, i32, i32) {
    %c0_i32 = arith.constant 0 : i32
    %c0_i32_0 = arith.constant 0 : i32
    %c0_i32_1 = arith.constant 0 : i32
    %c0_i32_2 = arith.constant 0 : i32
    return %arg0, %c0_i32, %c0_i32_0, %c0_i32_1 : i32, i32, i32, i32
  }
  func.func @transform_5(%arg0: i32) -> (i32, i32, i32) {
    %c0_i32 = arith.constant 0 : i32
    %c0_i32_0 = arith.constant 0 : i32
    %c0_i32_1 = arith.constant 0 : i32
    return %arg0, %c0_i32, %c0_i32_0 : i32, i32, i32
  }
}

</mosaic_0001>

<bundles_post_ra>
// kernel: basic_block_pallas.5
= control target key start
LH: loop header
LB: loop body
LE: loop exit
PB: predicated region body
PF: predicated region fallthrough
CT: control target
= control target key end

     0   :  { %s583_s15 = smov 0   ;;  %s816_s0 = inlined_call_operand.vmem [shape: f32[2,16,16,8], index: 0, kind: input, shape index: {}]   ;;  %s817_s1 = inlined_call_operand.vmem [shape: f32[2,16,16,8], index: 1, kind: input, shape index: {}]   ;;  %s818_s2 = inlined_call_operand.vmem [shape: f32[1,8], index: 2, kind: input, shape index: {}]   ;;  %s819_s3 = inlined_call_operand.vmem [shape: f32[1,8], index: 3, kind: input, shape index: {}]   ;;  %s820_s4 = inlined_call_operand.vmem [shape: f32[2,16,16,8], index: 4, kind: output, shape index: {}]  }
   0x1 LB: > { %s524_s16 = sadd.s32 4294967295, %s556_s15   ;;  %p528_p0 = scmp.ge.s32.totalorder %s556_s15, 1  ;;  %s556_s15 = sphi %s583_s15, %s14_s15  }
   0x2   : > { %p172_p1 = scmp.lt.s32.totalorder %s556_s15, 3 }
   0x4   : > { %p173_p2 = pnand %p528_p0, %p172_p1 }
   0x5   : > { %p203_p3 = scmp.lt.s32.totalorder (!%p173_p2), %s524_s16, 1 }
   0x6   : > { %176 = sbr.rel (%p173_p2) target bundleno = 53 (0x35), region = 36 }
   0xb   : > { %s822_s16 = smov (!%p203_p3, %s524_s16), 1  ;;  %v596_v0 = vld [vmem:[%s818_s2] ss:$0 sm:$0xff]  ;;  %vm424_vm0 = vcmask 64512  }
   0xc   : > { %s591_s17 = sshll.u32 %s822_s16, 8  ;;  %v614_v2 = vld [vmem:[%s819_s3] ss:$0 sm:$0xff] }
   0xd   : > { %s602_s22 = scalar_lea.vmem %s816_s0, %s591_s17  ;;  %s608_s25 = scalar_lea.vmem %s817_s1, %s591_s17 }
   0xe   : > { %v218_v1 = vld [vmem:[%s602_s22] sm:$0xff]  ;;  %v219_v3 = vld [vmem:[%s602_s22 + $0x8] sm:$0xff]  ;;  %v220_v7 = vld [vmem:[%s602_s22 + $0x10] sm:$0xff]  ;;  %s644_s30 = scalar_lea.vmem %s820_s4, %s591_s17 }
   0xf   : > { %v257_v4 = vmul.f32 %v596_v0, %v218_v1  ;;  %v328_v5 = vld [vmem:[%s608_s25] sm:$0xff]  ;;  %v258_v6 = vmul.f32 %v596_v0, %v219_v3  ;;  %v329_v8 = vld [vmem:[%s608_s25 + $0x8] sm:$0xff]  ;;  %v259_v9 = vmul.f32 %v596_v0, %v220_v7  ;;  %v221_v10 = vld [vmem:[%s602_s22 + $0x18] sm:$0xff] }
  0x10   : > { %v222_v11 = vld [vmem:[%s602_s22 + $0x20] sm:$0xff]  ;;  %v330_v14 = vld [vmem:[%s608_s25 + $0x10] sm:$0xff]  ;;  %v260_v15 = vmul.f32 %v596_v0, %v221_v10  ;;  %v331_v16 = vld [vmem:[%s608_s25 + $0x18] sm:$0xff] }
  0x11   : > { %v296_v12 = vadd.f32 %v614_v2, %v257_v4  ;;  %v297_v13 = vadd.f32 %v614_v2, %v258_v6  ;;  %v261_v17 = vmul.f32 %v596_v0, %v222_v11  ;;  %v223_v18 = vld [vmem:[%s602_s22 + $0x28] sm:$0xff]  ;;  %v298_v19 = vadd.f32 %v614_v2, %v259_v9  ;;  %v332_v20 = vld [vmem:[%s608_s25 + $0x20] sm:$0xff]  ;;  %v224_v22 = vld [vmem:[%s602_s22 + $0x30] sm:$0xff] }
  0x12   : > { %v262_v21 = vmul.f32 %v596_v0, %v223_v18  ;;  %v225_v23 = vld [vmem:[%s602_s22 + $0x38] sm:$0xff]  ;;  %v299_v26 = vadd.f32 %v614_v2, %v260_v15  ;;  %v333_v28 = vld [vmem:[%s608_s25 + $0x28] sm:$0xff]  ;;  %v263_v31 = vmul.f32 %v596_v0, %v224_v22  ;;  %v226_v33 = vld [vmem:[%s602_s22 + $0x40] sm:$0xff] }
  0x13   : > { %v360_v24 = vadd.f32 %v328_v5, %v296_v12  ;;  %v361_v25 = vadd.f32 %v329_v8, %v297_v13  ;;  %v300_v27 = vadd.f32 %v614_v2, %v261_v17  ;;  %v362_v29 = vadd.f32 %v330_v14, %v298_v19  ;;  %v227_v34 = vld [vmem:[%s602_s22 + $0x48] sm:$0xff]  ;;  %v334_v39 = vld [vmem:[%s608_s25 + $0x30] sm:$0xff]  ;;  %v335_v40 = vld [vmem:[%s608_s25 + $0x38] sm:$0xff] }
  0x14   : > { %v301_v30 = vadd.f32 %v614_v2, %v262_v21  ;;  %v264_v32 = vmul.f32 %v596_v0, %v225_v23  ;;  %v363_v37 = vadd.f32 %v331_v16, %v299_v26  ;;  %v228_v41 = vld [vmem:[%s602_s22 + $0x50] sm:$0xff]  ;;  %v302_v44 = vadd.f32 %v614_v2, %v263_v31  ;;  %v229_v46 = vld [vmem:[%s602_s22 + $0x58] sm:$0xff]  ;;  %v230_v47 = vld [vmem:[%s602_s22 + $0x60] sm:$0xff] }
  0x15   : > { %v392_v35 = vmax.f32 %v360_v24, 0.0  ;;  %v393_v36 = vmax.f32 %v361_v25, 0.0  ;;  %v364_v38 = vadd.f32 %v332_v20, %v300_v27  ;;  %v394_v42 = vmax.f32 %v362_v29, 0.0  ;;  %v231_v52 = vld [vmem:[%s602_s22 + $0x68] sm:$0xff]  ;;  %v336_v56 = vld [vmem:[%s608_s25 + $0x40] sm:$0xff]  ;;  %v338_v61 = vld [vmem:[%s608_s25 + $0x50] sm:$0xff] }
  0x16   : > { %v365_v43 = vadd.f32 %v333_v28, %v301_v30  ;;  %v303_v45 = vadd.f32 %v614_v2, %v264_v32  ;;  %v395_v48 = vmax.f32 %v363_v37, 0.0  ;;  %v265_v50 = vmul.f32 %v596_v0, %v226_v33  ;;  %v337_v57 = vld [vmem:[%s608_s25 + $0x48] sm:$0xff]  ;;  %v232_v1 = vld [vmem:[%s602_s22 + $0x70] sm:$0xff]  ;;  %v233_v3 = vld [vmem:[%s602_s22 + $0x78] sm:$0xff] }
  0x17   : > { %425 = vst.msk [vmem:[%s644_s30] sm:$0xff] %vm424_vm0, %v392_v35  ;;  %426 = vst.msk [vmem:[%s644_s30 + $0x8] sm:$0xff] %vm424_vm0, %v393_v36  ;;  %v396_v49 = vmax.f32 %v364_v38, 0.0  ;;  %v266_v51 = vmul.f32 %v596_v0, %v227_v34  ;;  %v366_v54 = vadd.f32 %v334_v39, %v302_v44  ;;  %v267_v58 = vmul.f32 %v596_v0, %v228_v41  ;;  %v339_v7 = vld [vmem:[%s608_s25 + $0x58] sm:$0xff]  ;;  %v340_v8 = vld [vmem:[%s608_s25 + $0x60] sm:$0xff] }
  0x18   : > { %427 = vst.msk [vmem:[%s644_s30 + $0x10] sm:$0xff] %vm424_vm0, %v394_v42  ;;  %v397_v53 = vmax.f32 %v365_v43, 0.0  ;;  %v367_v55 = vadd.f32 %v335_v40, %v303_v45  ;;  %428 = vst.msk [vmem:[%s644_s30 + $0x18] sm:$0xff] %vm424_vm0, %v395_v48  ;;  %v304_v59 = vadd.f32 %v614_v2, %v265_v50  ;;  %v268_v62 = vmul.f32 %v596_v0, %v229_v46  ;;  %v341_v14 = vld [vmem:[%s608_s25 + $0x68] sm:$0xff]  ;;  %v234_v19 = vld [vmem:[%s602_s22 + $0x80] sm:$0xff] }
  0x19   : > { %429 = vst.msk [vmem:[%s644_s30 + $0x20] sm:$0xff] %vm424_vm0, %v396_v49  ;;  %v305_v60 = vadd.f32 %v614_v2, %v266_v51  ;;  %v269_v63 = vmul.f32 %v596_v0, %v230_v47  ;;  %v398_v4 = vmax.f32 %v366_v54, 0.0  ;;  %v306_v6 = vadd.f32 %v614_v2, %v267_v58  ;;  %v235_v20 = vld [vmem:[%s602_s22 + $0x88] sm:$0xff]  ;;  %v342_v25 = vld [vmem:[%s608_s25 + $0x70] sm:$0xff]  ;;  %v343_v26 = vld [vmem:[%s608_s25 + $0x78] sm:$0xff] }
  0x1a   : > { %430 = vst.msk [vmem:[%s644_s30 + $0x28] sm:$0xff] %vm424_vm0, %v397_v53  ;;  %v399_v5 = vmax.f32 %v367_v55, 0.0  ;;  %v270_v9 = vmul.f32 %v596_v0, %v231_v52  ;;  %v368_v10 = vadd.f32 %v336_v56, %v304_v59  ;;  %v307_v12 = vadd.f32 %v614_v2, %v268_v62  ;;  %v236_v27 = vld [vmem:[%s602_s22 + $0x90] sm:$0xff]  ;;  %v237_v32 = vld [vmem:[%s602_s22 + $0x98] sm:$0xff]  ;;  %v238_v33 = vld [vmem:[%s602_s22 + $0xa0] sm:$0xff] }
  0x1b   : > { %v369_v11 = vadd.f32 %v337_v57, %v305_v60  ;;  %v308_v13 = vadd.f32 %v614_v2, %v269_v63  ;;  %431 = vst.msk [vmem:[%s644_s30 + $0x30] sm:$0xff] %vm424_vm0, %v398_v4  ;;  %v370_v15 = vadd.f32 %v338_v61, %v306_v6  ;;  %v271_v17 = vmul.f32 %v596_v0, %v232_v1  ;;  %v239_v38 = vld [vmem:[%s602_s22 + $0xa8] sm:$0xff]  ;;  %v344_v42 = vld [vmem:[%s608_s25 + $0x80] sm:$0xff]  ;;  %v346_v47 = vld [vmem:[%s608_s25 + $0x90] sm:$0xff] }
  0x1c   : > { %432 = vst.msk [vmem:[%s644_s30 + $0x38] sm:$0xff] %vm424_vm0, %v399_v5  ;;  %v309_v16 = vadd.f32 %v614_v2, %v270_v9  ;;  %v272_v18 = vmul.f32 %v596_v0, %v233_v3  ;;  %v400_v21 = vmax.f32 %v368_v10, 0.0  ;;  %v371_v23 = vadd.f32 %v339_v7, %v307_v12  ;;  %v345_v43 = vld [vmem:[%s608_s25 + $0x88] sm:$0xff]  ;;  %v240_v50 = vld [vmem:[%s602_s22 + $0xb0] sm:$0xff]  ;;  %v241_v51 = vld [vmem:[%s602_s22 + $0xb8] sm:$0xff] }
  0x1d   : > { %v401_v22 = vmax.f32 %v369_v11, 0.0  ;;  %v372_v24 = vadd.f32 %v340_v8, %v308_v13  ;;  %v402_v28 = vmax.f32 %v370_v15, 0.0  ;;  %v310_v30 = vadd.f32 %v614_v2, %v271_v17  ;;  %v347_v55 = vld [vmem:[%s608_s25 + $0x98] sm:$0xff]  ;;  %v348_v56 = vld [vmem:[%s608_s25 + $0xa0] sm:$0xff]  ;;  %v349_v62 = vld [vmem:[%s608_s25 + $0xa8] sm:$0xff] }
  0x1e   : > { %v373_v29 = vadd.f32 %v341_v14, %v309_v16  ;;  %v311_v31 = vadd.f32 %v614_v2, %v272_v18  ;;  %433 = vst.msk [vmem:[%s644_s30 + $0x40] sm:$0xff] %vm424_vm0, %v400_v21  ;;  %v403_v34 = vmax.f32 %v371_v23, 0.0  ;;  %v273_v36 = vmul.f32 %v596_v0, %v234_v19  ;;  %v242_v5 = vld [vmem:[%s602_s22 + $0xc0] sm:$0xff]  ;;  %v243_v6 = vld [vmem:[%s602_s22 + $0xc8] sm:$0xff]  ;;  %v350_v11 = vld [vmem:[%s608_s25 + $0xb0] sm:$0xff] }
  0x1f   : > { %434 = vst.msk [vmem:[%s644_s30 + $0x48] sm:$0xff] %vm424_vm0, %v401_v22  ;;  %v404_v35 = vmax.f32 %v372_v24, 0.0  ;;  %v274_v37 = vmul.f32 %v596_v0, %v235_v20  ;;  %435 = vst.msk [vmem:[%s644_s30 + $0x50] sm:$0xff] %vm424_vm0, %v402_v28  ;;  %v374_v40 = vadd.f32 %v342_v25, %v310_v30  ;;  %v275_v44 = vmul.f32 %v596_v0, %v236_v27  ;;  %v351_v12 = vld [vmem:[%s608_s25 + $0xb8] sm:$0xff]  ;;  %v244_v13 = vld [vmem:[%s602_s22 + $0xd0] sm:$0xff] }
  0x20   : > { %v405_v39 = vmax.f32 %v373_v29, 0.0  ;;  %v375_v41 = vadd.f32 %v343_v26, %v311_v31  ;;  %436 = vst.msk [vmem:[%s644_s30 + $0x58] sm:$0xff] %vm424_vm0, %v403_v34  ;;  %v312_v45 = vadd.f32 %v614_v2, %v273_v36  ;;  %v276_v48 = vmul.f32 %v596_v0, %v237_v32  ;;  %v245_v18 = vld [vmem:[%s602_s22 + $0xd8] sm:$0xff]  ;;  %v246_v19 = vld [vmem:[%s602_s22 + $0xe0] sm:$0xff]  ;;  %v247_v24 = vld [vmem:[%s602_s22 + $0xe8] sm:$0xff] }
  0x21   : > { %437 = vst.msk [vmem:[%s644_s30 + $0x60] sm:$0xff] %vm424_vm0, %v404_v35  ;;  %v313_v46 = vadd.f32 %v614_v2, %v274_v37  ;;  %v277_v49 = vmul.f32 %v596_v0, %v238_v33  ;;  %v406_v52 = vmax.f32 %v374_v40, 0.0  ;;  %v314_v54 = vadd.f32 %v614_v2, %v275_v44  ;;  %v352_v28 = vld [vmem:[%s608_s25 + $0xc0] sm:$0xff]  ;;  %v353_v29 = vld [vmem:[%s608_s25 + $0xc8] sm:$0xff]  ;;  %v354_v33 = vld [vmem:[%s608_s25 + $0xd0] sm:$0xff] }
  0x22   : > { %438 = vst.msk [vmem:[%s644_s30 + $0x68] sm:$0xff] %vm424_vm0, %v405_v39  ;;  %v407_v53 = vmax.f32 %v375_v41, 0.0  ;;  %v278_v57 = vmul.f32 %v596_v0, %v239_v38  ;;  %v376_v58 = vadd.f32 %v344_v42, %v312_v45  ;;  %v315_v60 = vadd.f32 %v614_v2, %v276_v48  ;;  %v248_v36 = vld [vmem:[%s602_s22 + $0xf0] sm:$0xff]  ;;  %v249_v37 = vld [vmem:[%s602_s22 + $0xf8] sm:$0xff]  ;;  %v356_v42 = vld [vmem:[%s608_s25 + $0xe0] sm:$0xff] }
  0x23   : > { %v377_v59 = vadd.f32 %v345_v43, %v313_v46  ;;  %v316_v61 = vadd.f32 %v614_v2, %v277_v49  ;;  %439 = vst.msk [vmem:[%s644_s30 + $0x70] sm:$0xff] %vm424_vm0, %v406_v52  ;;  %v378_v63 = vadd.f32 %v346_v47, %v314_v54  ;;  %v279_v3 = vmul.f32 %v596_v0, %v240_v50  ;;  %v355_v41 = vld [vmem:[%s608_s25 + $0xd8] sm:$0xff]  ;;  %v357_v48 = vld [vmem:[%s608_s25 + $0xe8] sm:$0xff] }
  0x24   : > { %440 = vst.msk [vmem:[%s644_s30 + $0x78] sm:$0xff] %vm424_vm0, %v407_v53  ;;  %v317_v1 = vadd.f32 %v614_v2, %v278_v57  ;;  %v280_v4 = vmul.f32 %v596_v0, %v241_v51  ;;  %v408_v7 = vmax.f32 %v376_v58, 0.0  ;;  %v379_v9 = vadd.f32 %v347_v55, %v315_v60  ;;  %v358_v57 = vld [vmem:[%s608_s25 + $0xf0] sm:$0xff]  ;;  %v359_v58 = vld [vmem:[%s608_s25 + $0xf8] sm:$0xff] }
  0x25   : > { %v409_v8 = vmax.f32 %v377_v59, 0.0  ;;  %v380_v10 = vadd.f32 %v348_v56, %v316_v61  ;;  %v410_v14 = vmax.f32 %v378_v63, 0.0  ;;  %v318_v16 = vadd.f32 %v614_v2, %v279_v3 }
  0x26   : > { %v381_v15 = vadd.f32 %v349_v62, %v317_v1  ;;  %v319_v17 = vadd.f32 %v614_v2, %v280_v4  ;;  %441 = vst.msk [vmem:[%s644_s30 + $0x80] sm:$0xff] %vm424_vm0, %v408_v7  ;;  %v411_v20 = vmax.f32 %v379_v9, 0.0  ;;  %v281_v22 = vmul.f32 %v596_v0, %v242_v5 }
  0x27   : > { %442 = vst.msk [vmem:[%s644_s30 + $0x88] sm:$0xff] %vm424_vm0, %v409_v8  ;;  %v412_v21 = vmax.f32 %v380_v10, 0.0  ;;  %v282_v23 = vmul.f32 %v596_v0, %v243_v6  ;;  %443 = vst.msk [vmem:[%s644_s30 + $0x90] sm:$0xff] %vm424_vm0, %v410_v14  ;;  %v382_v26 = vadd.f32 %v350_v11, %v318_v16  ;;  %v283_v30 = vmul.f32 %v596_v0, %v244_v13 }
  0x28   : > { %v413_v25 = vmax.f32 %v381_v15, 0.0  ;;  %v383_v27 = vadd.f32 %v351_v12, %v319_v17  ;;  %444 = vst.msk [vmem:[%s644_s30 + $0x98] sm:$0xff] %vm424_vm0, %v411_v20  ;;  %v320_v31 = vadd.f32 %v614_v2, %v281_v22  ;;  %v284_v34 = vmul.f32 %v596_v0, %v245_v18 }
  0x29   : > { %445 = vst.msk [vmem:[%s644_s30 + $0xa0] sm:$0xff] %vm424_vm0, %v412_v21  ;;  %v321_v32 = vadd.f32 %v614_v2, %v282_v23  ;;  %v285_v35 = vmul.f32 %v596_v0, %v246_v19  ;;  %v414_v38 = vmax.f32 %v382_v26, 0.0  ;;  %v322_v40 = vadd.f32 %v614_v2, %v283_v30 }
  0x2a   : > { %446 = vst.msk [vmem:[%s644_s30 + $0xa8] sm:$0xff] %vm424_vm0, %v413_v25  ;;  %v415_v39 = vmax.f32 %v383_v27, 0.0  ;;  %v286_v43 = vmul.f32 %v596_v0, %v247_v24  ;;  %v384_v44 = vadd.f32 %v352_v28, %v320_v31  ;;  %v323_v46 = vadd.f32 %v614_v2, %v284_v34 }
  0x2b   : > { %v385_v45 = vadd.f32 %v353_v29, %v321_v32  ;;  %v324_v47 = vadd.f32 %v614_v2, %v285_v35  ;;  %447 = vst.msk [vmem:[%s644_s30 + $0xb0] sm:$0xff] %vm424_vm0, %v414_v38  ;;  %v386_v49 = vadd.f32 %v354_v33, %v322_v40  ;;  %v287_v51 = vmul.f32 %v596_v0, %v248_v36 }
  0x2c   : > { %448 = vst.msk [vmem:[%s644_s30 + $0xb8] sm:$0xff] %vm424_vm0, %v415_v39  ;;  %v325_v50 = vadd.f32 %v614_v2, %v286_v43  ;;  %v288_v52 = vmul.f32 %v596_v0, %v249_v37  ;;  %v416_v53 = vmax.f32 %v384_v44, 0.0  ;;  %v387_v55 = vadd.f32 %v355_v41, %v323_v46 }
  0x2d   : > { %v417_v54 = vmax.f32 %v385_v45, 0.0  ;;  %v388_v56 = vadd.f32 %v356_v42, %v324_v47  ;;  %v418_v59 = vmax.f32 %v386_v49, 0.0  ;;  %v326_v61 = vadd.f32 %v614_v2, %v287_v51 }
  0x2e   : > { %v389_v60 = vadd.f32 %v357_v48, %v325_v50  ;;  %v327_v62 = vadd.f32 %v614_v2, %v288_v52  ;;  %449 = vst.msk [vmem:[%s644_s30 + $0xc0] sm:$0xff] %vm424_vm0, %v416_v53  ;;  %v419_v0 = vmax.f32 %v387_v55, 0.0 }
  0x2f   : > { %450 = vst.msk [vmem:[%s644_s30 + $0xc8] sm:$0xff] %vm424_vm0, %v417_v54  ;;  %v420_v63 = vmax.f32 %v388_v56, 0.0  ;;  %451 = vst.msk [vmem:[%s644_s30 + $0xd0] sm:$0xff] %vm424_vm0, %v418_v59  ;;  %v390_v3 = vadd.f32 %v358_v57, %v326_v61 }
  0x30   : > { %v421_v1 = vmax.f32 %v389_v60, 0.0  ;;  %v391_v4 = vadd.f32 %v359_v58, %v327_v62  ;;  %452 = vst.msk [vmem:[%s644_s30 + $0xd8] sm:$0xff] %vm424_vm0, %v419_v0 }
  0x31   : > { %453 = vst.msk [vmem:[%s644_s30 + $0xe0] sm:$0xff] %vm424_vm0, %v420_v63  ;;  %v422_v5 = vmax.f32 %v390_v3, 0.0 }
  0x32   : > { %454 = vst.msk [vmem:[%s644_s30 + $0xe8] sm:$0xff] %vm424_vm0, %v421_v1  ;;  %v423_v6 = vmax.f32 %v391_v4, 0.0 }
  0x33   : > { %455 = vst.msk [vmem:[%s644_s30 + $0xf0] sm:$0xff] %vm424_vm0, %v422_v5 }
  0x34   : > { %456 = vst.msk [vmem:[%s644_s30 + $0xf8] sm:$0xff] %vm424_vm0, %v423_v6 }
  0x35 PF: > { %s14_s15 = sadd.s32 1, %s556_s15  }
  0x36   : > { %p11_p4 = scmp.ge.s32.totalorder %s14_s15, 4  }
  0x38   :  { %13 = sbr.rel (!%p11_p4) target bundleno = 1 (0x1), region = 69 }

// kernel: basic_block_pallas.3
= control target key start
LH: loop header
LB: loop body
LE: loop exit
PB: predicated region body
PF: predicated region fallthrough
CT: control target
= control target key end

     0   :  { %s2348_s12 = smov 0   ;;  %s3353_s0 = inlined_call_operand.vmem [shape: f32[2,18,16,8], index: 0, kind: input, shape index: {}]   ;;  %s3354_s1 = inlined_call_operand.vmem [shape: f32[3,24,8], index: 1, kind: input, shape index: {}]   ;;  %s3355_s2 = inlined_call_operand.vmem [shape: f32[2,18,16,8], index: 2, kind: output, shape index: {0}]   ;;  %s3356_s3 = inlined_call_operand.vmem [shape: f32[2,2,8], index: 3, kind: output, shape index: {1}]  }
   0x1 LB: > { %s1886_s13 = sadd.s32 4294967295, %s2323_s12   ;;  %p1890_p0 = scmp.ge.s32.totalorder %s2323_s12, 1  ;;  %s2323_s12 = sphi %s2348_s12, %s14_s12  }
   0x2   : > { %p140_p1 = scmp.lt.s32.totalorder %s2323_s12, 3 }
   0x4   : > { %p141_p2 = pnand %p1890_p0, %p140_p1 }
   0x5   : > { %p168_p3 = scmp.lt.s32.totalorder (!%p141_p2), %s1886_s13, 1  ;;  %s2325_s24 = smov (!%p141_p2), 8  }
   0x6   : > { %144 = sbr.rel (%p141_p2) target bundleno = 546 (0x222), region = 28  ;;  %s2326_s25 = smov (!%p141_p2), 16  }
   0xb   : > { %v1896_v0 = vld [vmem:[%s3354_s1 + $0x28] sm:$0xff]  ;;  %v1895_v1 = vld [vmem:[%s3354_s1 + $0x20] sm:$0xff]  ;;  %s3358_s13 = smov (!%p168_p3, %s1886_s13), 1  ;;  %v1894_v2 = vld [vmem:[%s3354_s1 + $0x18] sm:$0xff]  ;;  %vm363_vm0 = vcmask 1046528   ;;  %vm254_vm1 = vcmask 1040384  }
   0xc   : > { %2299 = vmatprep.subr.mxu1 %v1896_v0  ;;  %2137 = vmatprep.subr.mxu0 %v1896_v0  ;;  %s2305_s20 = smul.u32 288, %s3358_s13  ;;  %vm688_vm2 = vcmask 64512   ;;  %vm725_vm3 = vcmask 130048   ;;  %vm769_vm4 = vcmask 195584   ;;  %s1893_s16 = sshll.u32 %s3358_s13, 1  ;;  %vm1658_vm5 = vcmask 57344  }
   0xd   : > { %2302 = vmatpush3.msra.mxu1 %v1896_v0  ;;  %2138 = vmatpush3.msra.mxu0 %v1896_v0  ;;  %s181_s19 = scalar_lea.vmem %s3356_s3, %s1893_s16 }
   0xe   : > { %2300 = vmatprep.subr.mxu1 %v1895_v1  ;;  %2139 = vmatprep.subr.mxu0 %v1895_v1  ;;  %s2373_s23 = scalar_lea.vmem %s3353_s0, %s2305_s20  ;;  %s3134_s15 = scalar_lea.vmem %s3355_s2, %s2305_s20 }
   0xf   : > { %2303 = vmatpush3.msra.mxu1 %v1895_v1  ;;  %2140 = vmatpush3.msra.mxu0 %v1895_v1  ;;  %v2376_v3 = vld [vmem:[%s2373_s23 + $0x90] sm:$0xff]  ;;  %v201_v5 = vld [vmem:[%s2373_s23 + $0x98] sm:$0xff]  ;;  %v2396_v13 = vld [vmem:[%s2373_s23 + $0xa0] sm:$0xff] }
  0x10   : > { %2301 = vmatprep.subr.mxu1 %v1894_v2  ;;  %2141 = vmatprep.subr.mxu0 %v1894_v2  ;;  %v2379_v4 = vld [vmem:[%s2373_s23 + $0x10] sm:$0xff]  ;;  %v391_v6 = vrot.slane %v2376_v3, 1  ;;  %v185_v7 = vld [vmem:[%s2373_s23 + $0x18] sm:$0xff]  ;;  %v392_v8 = vrot.slane %v201_v5, 1  ;;  %v203_v16 = vld [vmem:[%s2373_s23 + $0xa8] sm:$0xff]  ;;  %v394_v18 = vrot.slane %v2396_v13, 1 }
  0x11   : > { %2304 = vmatpush3.msra.mxu1 %v1894_v2  ;;  %2142 = vmatpush3.msra.mxu0 %v1894_v2  ;;  %v367_v9 = vrot.slane %v2379_v4, 1  ;;  %v368_v10 = vrot.slane %v185_v7, 1  ;;  %v2400_v15 = vld [vmem:[%s2373_s23 + $0xd8] sm:$0xff]  ;;  %v2412_v20 = vld [vmem:[%s2373_s23 + $0x50] sm:$0xff]  ;;  %v2415_v21 = vld [vmem:[%s2373_s23 + $0xe8] sm:$0xff]  ;;  %v395_v22 = vrot.slane %v203_v16, 1 }
  0x12   : > { %490 = vrot.lane.b32.xlu0 %v2376_v3, %s2325_s24  ;;  %458 = vrot.lane.b32.xlu1 %v2379_v4, %s2325_s24  ;;  %v445_v11 = vsel %vm363_vm0, %v392_v8, 0.0  ;;  %v393_v12 = vsel %vm363_vm0, %v391_v6, %v392_v8  ;;  %v2404_v17 = vld [vmem:[%s2373_s23 + $0x58] sm:$0xff]  ;;  %v404_v19 = vrot.slane %v2400_v15, 1  ;;  %v379_v24 = vrot.slane %v2412_v20, 1  ;;  %v2421_v26 = vld [vmem:[%s2373_s23 + $0xe0] sm:$0xff] }
  0x13   : > { %v369_v14 = vsel %vm363_vm0, %v367_v9, %v368_v10  ;;  %v437_v23 = vsel %vm363_vm0, %v368_v10, 0.0  ;;  %v380_v25 = vrot.slane %v2404_v17, 1  ;;  %v406_v28 = vrot.slane %v2421_v26, 1  ;;  %v2439_v32 = vld [vmem:[%s2373_s23 + $0x20] sm:$0xff]  ;;  %v187_v35 = vld [vmem:[%s2373_s23 + $0x28] sm:$0xff]  ;;  %v205_v45 = vld [vmem:[%s2373_s23 + $0xb8] sm:$0xff] }
  0x14   : > { %v2426_v27 = vsel %vm363_vm0, %v404_v19, 0.0  ;;  %v407_v30 = vrot.slane %v2415_v21, 1  ;;  %v396_v33 = vsel %vm363_vm0, %v394_v18, %v395_v22  ;;  %v283_v36 = vrot.slane %v201_v5, 7  ;;  %v189_v48 = vld [vmem:[%s2373_s23 + $0x38] sm:$0xff]  ;;  %v2472_v52 = vld [vmem:[%s2373_s23 + $0xb0] sm:$0xff]  ;;  %v207_v60 = vld [vmem:[%s2373_s23 + $0xc8] sm:$0xff] }
  0x15   : > { %v2430_v29 = vsel %vm363_vm0, %v379_v24, %v380_v25  ;;  %v2434_v31 = vsel %vm363_vm0, %v380_v25, 0.0  ;;  %v259_v37 = vrot.slane %v185_v7, 7  ;;  %v282_v38 = vrot.slane %v2376_v3, 7  ;;  %v2477_v56 = vld [vmem:[%s2373_s23 + $0x30] sm:$0xff]  ;;  %v191_v9 = vld [vmem:[%s2373_s23 + $0x48] sm:$0xff] }
  0x16   : > { %492 = vrot.lane.b32.xlu0 %v201_v5, %s2325_s24  ;;  %460 = vrot.lane.b32.xlu1 %v185_v7, %s2325_s24  ;;  %v2445_v34 = vsel %vm363_vm0, %v406_v28, %v407_v30  ;;  %v258_v39 = vrot.slane %v2379_v4, 7  ;;  %v286_v40 = vrot.slane %v203_v16, 7  ;;  %v370_v41 = vrot.slane %v2439_v32, 1  ;;  %v2507_v5 = vld [vmem:[%s2373_s23 + $0xc0] sm:$0xff]  ;;  %v2700_v3 = vld [vmem:[%s2373_s23 + $0x8] sm:$0xff] }
  0x17   : > { %v371_v42 = vrot.slane %v187_v35, 1  ;;  %v446_v43 = vsel %vm363_vm0, %v395_v22, 0.0  ;;  %v262_v44 = vrot.slane %v187_v35, 7  ;;  %v285_v46 = vrot.slane %v2396_v13, 7 }
  0x18   : > { %v289_v47 = vrot.slane %v205_v45, 7  ;;  %v2461_v49 = vsel %vm254_vm1, %v282_v38, %v283_v36  ;;  %v2466_v50 = vsel %vm254_vm1, %v258_v39, %v259_v37  ;;  %v261_v51 = vrot.slane %v2439_v32, 7 }
  0x19   : > { %v265_v53 = vrot.slane %v189_v48, 7  ;;  %v288_v54 = vrot.slane %v2472_v52, 7  ;;  %v372_v55 = vsel %vm363_vm0, %v370_v41, %v371_v42  ;;  %v2482_v57 = vsel %vm254_vm1, %v285_v46, %v286_v40 }
  0x1a   : > { %618 = vrot.lane.b32.xlu0 %v445_v11, %s2326_s25  ;;  %616 = vrot.lane.b32.xlu1 %v393_v12, %s2326_s25  ;;  %v264_v58 = vrot.slane %v2477_v56, 7  ;;  %v2488_v59 = vsel %vm254_vm1, %v261_v51, %v262_v44  ;;  %v292_v62 = vrot.slane %v207_v60, 7  ;;  %v397_v0 = vrot.slane %v2472_v52, 1 }
  0x1b   : > { %v2494_v61 = vsel %vm254_vm1, %v288_v54, %v289_v47  ;;  %v398_v1 = vrot.slane %v205_v45, 1  ;;  %v438_v2 = vsel %vm363_vm0, %v371_v42, 0.0  ;;  %v291_v6 = vrot.slane %v2507_v5, 7 }
  0x1c   : > { %v2502_v63 = vsel %vm254_vm1, %v264_v58, %v265_v53  ;;  %v268_v10 = vrot.slane %v191_v9, 7  ;;  %v373_v11 = vrot.slane %v2477_v56, 1  ;;  %v374_v12 = vrot.slane %v189_v48, 1 }
  0x1d   : > { %v2515_v7 = vsel %vm254_vm1, %v291_v6, %v292_v62  ;;  %v399_v8 = vsel %vm363_vm0, %v397_v0, %v398_v1  ;;  %v295_v24 = vrot.slane %v2400_v15, 7  ;;  %v400_v25 = vrot.slane %v2507_v5, 1  ;;  %v2624_v62 = vld [vmem:[%s2373_s23 + $0xf0] sm:$0xff]  ;;  %v2630_v0 = vld [vmem:[%s2373_s23 + $0xf8] sm:$0xff] }
  0x1e   : > { %494 = vrot.lane.b32.xlu1 %v2396_v13, %s2325_s24  ;;  %584 = vrot.lane.b32.xlu0 %v369_v14, %s2326_s25  ;;  %v447_v14 = vsel %vm363_vm0, %v398_v1, 0.0  ;;  %v401_v28 = vrot.slane %v207_v60, 1  ;;  %v271_v41 = vrot.slane %v2404_v17, 7  ;;  %v409_v1 = vrot.slane %v2624_v62, 1 }
  0x20   : > { %v402_v40 = vsel %vm363_vm0, %v400_v25, %v401_v28  ;;  %v448_v44 = vsel %vm363_vm0, %v401_v28, 0.0  ;;  %v2662_v28 = vld [vmem:[%s2373_s23 + $0x108] sm:$0xff] }
  0x22   : > { %496 = vrot.lane.b32.xlu1 %v203_v16, %s2325_s24  ;;  %586 = vrot.lane.b32.xlu0 %v437_v23, %s2326_s25  ;;  %v2525_v16 = vld [vmem:[%s2373_s23 + $0x40] sm:$0xff]  ;;  %v375_v23 = vsel %vm363_vm0, %v373_v11, %v374_v12  ;;  %v2646_v11 = vld [vmem:[%s2373_s23 + $0x78] sm:$0xff] }
  0x23   : > { %v267_v18 = vrot.slane %v2525_v16, 7  ;;  %v376_v42 = vrot.slane %v2525_v16, 1 }
  0x25   : > { %v2533_v22 = vsel %vm254_vm1, %v267_v18, %v268_v10 }
  0x26   : > { %462 = vrot.lane.b32.xlu1 %v2439_v32, %s2325_s24  ;;  %620 = vrot.lane.b32.xlu0 %v396_v33, %s2326_s25  ;;  %v439_v33 = vsel %vm363_vm0, %v374_v12, 0.0 }
  0x2a   : > { %464 = vrot.lane.b32.xlu1 %v187_v35, %s2325_s24  ;;  %622 = vrot.lane.b32.xlu0 %v446_v43, %s2326_s25  ;;  %v2543_v35 = vld [vmem:[%s2373_s23 + $0xd0] sm:$0xff]  ;;  %v377_v43 = vrot.slane %v191_v9, 1 }
  0x2b   : > { %v294_v36 = vrot.slane %v2543_v35, 7  ;;  %v403_v53 = vrot.slane %v2543_v35, 1 }
  0x2d   : > { %v2551_v37 = vsel %vm254_vm1, %v294_v36, %v295_v24  ;;  %v2658_v24 = vld [vmem:[%s2373_s23 + $0x100] sm:$0xff] }
  0x2e   : > { %498 = vrot.lane.b32.xlu1 %v2472_v52, %s2325_s24  ;;  %588 = vrot.lane.b32.xlu0 %v372_v55, %s2326_s25  ;;  %v440_v55 = vsel %vm363_vm0, %v377_v43, 0.0 }
  0x32   : > { %500 = vrot.lane.b32.xlu1 %v205_v45, %s2325_s24  ;;  %590 = vrot.lane.b32.xlu0 %v438_v2, %s2326_s25  ;;  %v270_v45 = vrot.slane %v2412_v20, 7  ;;  %v410_v2 = vrot.slane %v2630_v0, 1 }
  0x34   : > { %v2566_v47 = vsel %vm254_vm1, %v270_v45, %v271_v41  ;;  %v411_v10 = vsel %vm363_vm0, %v409_v1, %v410_v2 }
  0x36   : > { %466 = vrot.lane.b32.xlu1 %v2477_v56, %s2325_s24  ;;  %624 = vrot.lane.b32.xlu0 %v399_v8, %s2326_s25 }
  0x3a   : > { %468 = vrot.lane.b32.xlu1 %v189_v48, %s2325_s24  ;;  %626 = vrot.lane.b32.xlu0 %v447_v14, %s2326_s25  ;;  %v378_v48 = vsel %vm363_vm0, %v376_v42, %v377_v43  ;;  %v386_v14 = vrot.slane %v2646_v11, 1  ;;  %v2674_v42 = vld [vmem:[%s2373_s23 + $0x80] sm:$0xff] }
  0x3c   : > { %v443_v41 = vsel %vm363_vm0, %v386_v14, 0.0 }
  0x3e   : > { %502 = vrot.lane.b32.xlu1 %v2507_v5, %s2325_s24  ;;  %592 = vrot.lane.b32.xlu0 %v375_v23, %s2326_s25  ;;  %v451_v23 = vsel %vm363_vm0, %v410_v2, 0.0 }
  0x42   : > { %504 = vrot.lane.b32.xlu1 %v207_v60, %s2325_s24  ;;  %594 = vrot.lane.b32.xlu0 %v439_v33, %s2326_s25  ;;  %v405_v60 = vsel %vm363_vm0, %v403_v53, %v404_v19  ;;  %v412_v33 = vrot.slane %v2658_v24, 1  ;;  %v2678_v53 = vld [vmem:[%s2373_s23 + $0x88] sm:$0xff] }
  0x46   : > { %470 = vrot.lane.b32.xlu1 %v2525_v16, %s2325_s24  ;;  %628 = vrot.lane.b32.xlu0 %v402_v40, %s2326_s25  ;;  %v413_v40 = vrot.slane %v2662_v28, 1 }
  0x48   : > { %v414_v43 = vsel %vm363_vm0, %v412_v33, %v413_v40  ;;  %v365_v33 = vrot.slane %v2700_v3, 1 }
  0x4a   : > { %472 = vrot.lane.b32.xlu1 %v191_v9, %s2325_s24  ;;  %630 = vrot.lane.b32.xlu0 %v448_v44, %s2326_s25  ;;  %v2642_v9 = vld [vmem:[%s2373_s23 + $0x70] sm:$0xff] }
  0x4b   : > { %v385_v12 = vrot.slane %v2642_v9, 1 }
  0x4d   : > { %v387_v25 = vsel %vm363_vm0, %v385_v12, %v386_v14  ;;  %v2697_v14 = vld [vmem:[%s2373_s23] sm:$0xff] }
  0x4e   : > { %506 = vrot.lane.b32.xlu1 %v2543_v35, %s2325_s24  ;;  %596 = vrot.lane.b32.xlu0 %v378_v48, %s2326_s25  ;;  %v364_v4 = vrot.slane %v2697_v14, 1 }
  0x52   : > { %508 = vrot.lane.b32.xlu1 %v2400_v15, %s2325_s24  ;;  %598 = vrot.lane.b32.xlu0 %v440_v55, %s2326_s25  ;;  %v2596_v15 = vld [vmem:[%s2373_s23 + $0x60] sm:$0xff]  ;;  %v388_v55 = vrot.slane %v2674_v42, 1 }
  0x53   : > { %v382_v19 = vrot.slane %v2596_v15, 1 }
  0x56   : > { %474 = vrot.lane.b32.xlu1 %v2412_v20, %s2325_s24  ;;  %632 = vrot.lane.b32.xlu0 %v405_v60, %s2326_s25  ;;  %v389_v60 = vrot.slane %v2678_v53, 1 }
  0x58   : > { %v390_v1 = vsel %vm363_vm0, %v388_v55, %v389_v60  ;;  %v762_v55 = vld [vmem:[%s3354_s1] sm:$0xff] }
  0x5a   : > { %476 = vrot.lane.b32.xlu1 %v2404_v17, %s2325_s24  ;;  %634 = vrot.lane.b32.xlu0 %v2426_v27, %s2326_s25  ;;  %v2599_v17 = vld [vmem:[%s2373_s23 + $0x68] sm:$0xff] }
  0x5b   : > { %v383_v27 = vrot.slane %v2599_v17, 1 }
  0x5d   : > { %v442_v8 = vsel %vm363_vm0, %v383_v27, 0.0 }
  0x5e   : > { %510 = vrot.lane.b32.xlu1 %v2421_v26, %s2325_s24  ;;  %600 = vrot.lane.b32.xlu0 %v2430_v29, %s2326_s25  ;;  %v450_v29 = vsel %vm363_vm0, %v407_v30, 0.0  ;;  %v384_v30 = vsel %vm363_vm0, %v382_v19, %v383_v27  ;;  %v452_v19 = vsel %vm363_vm0, %v413_v40, 0.0 }
  0x62   : > { %512 = vrot.lane.b32.xlu1 %v2415_v21, %s2325_s24  ;;  %602 = vrot.lane.b32.xlu0 %v2434_v31, %s2326_s25  ;;  %v2616_v31 = vld [vmem:[%s3354_s1 + $0x10] sm:$0xff] }
  0x63   : > { %2191 = vmatprep.subr.mxu1 %v2616_v31 }
  0x66   : > { %478 = vrot.lane.b32.xlu1 %v2596_v15, %s2325_s24  ;;  %636 = vrot.lane.b32.xlu0 %v2445_v34, %s2326_s25  ;;  %v2621_v34 = vld [vmem:[%s3354_s1 + $0x40] sm:$0xff] }
  0x67   : > { %2245 = vmatprep.subr.mxu0 %v2621_v34 }
  0x6a   : > { %480 = vrot.lane.b32.xlu1 %v2599_v17, %s2325_s24  ;;  %638 = vrot.lane.b32.xlu0 %v450_v29, %s2326_s25 }
  0x6e   : > { %514 = vrot.lane.b32.xlu1 %v2624_v62, %s2325_s24  ;;  %604 = vrot.lane.b32.xlu0 %v384_v30, %s2326_s25  ;;  %v354_v30 = vsel %vm254_vm1, 0.0, %v282_v38  ;;  %v346_v38 = vsel %vm254_vm1, 0.0, %v258_v39  ;;  %v444_v39 = vsel %vm363_vm0, %v389_v60, 0.0 }
  0x72   : > { %516 = vrot.lane.b32.xlu1 %v2630_v0, %s2325_s24  ;;  %606 = vrot.lane.b32.xlu0 %v442_v8, %s2326_s25 }
  0x76   : > { %482 = vrot.lane.b32.xlu1 %v2642_v9, %s2325_s24  ;;  %640 = vrot.lane.b32.xlu0 %v411_v10, %s2326_s25 }
  0x7a   : > { %484 = vrot.lane.b32.xlu1 %v2646_v11, %s2325_s24  ;;  %642 = vrot.lane.b32.xlu0 %v451_v23, %s2326_s25 }
  0x7e   : > { %518 = vrot.lane.b32.xlu1 %v2658_v24, %s2325_s24  ;;  %608 = vrot.lane.b32.xlu0 %v387_v25, %s2326_s25 }
  0x82   : > { %520 = vrot.lane.b32.xlu1 %v2662_v28, %s2325_s24  ;;  %610 = vrot.lane.b32.xlu0 %v443_v41, %s2326_s25 }
  0x84   : > { %v491_v44 = vpop.permute.xlu0 %490  ;;  %v459_v48 = vpop.permute.xlu1 %458 }
  0x85   : > { %v707_v2 = vsel %vm688_vm2, %v354_v30, %v491_v44  ;;  %v691_v40 = vsel %vm688_vm2, %v346_v38, %v459_v48  ;;  %v366_v48 = vsel %vm363_vm0, %v364_v4, %v365_v33  ;;  %v2742_v30 = vld [vmem:[%s2373_s23 + $0x110] sm:$0xff] }
  0x86   : > { %486 = vrot.lane.b32.xlu1 %v2674_v42, %s2325_s24  ;;  %644 = vrot.lane.b32.xlu0 %v414_v43, %s2326_s25  ;;  %v1961_v38 = vld [vmem:[%s3354_s1 + $0x30] sm:$0xff] }
  0x88   : > { %v493_v27 = vpop.permute.xlu0 %492  ;;  %v461_v29 = vpop.permute.xlu1 %460 }
  0x89   : > { %v708_v8 = vsel %vm688_vm2, %v2461_v49, %v493_v27  ;;  %v763_v49 = vld [vmem:[%s3354_s1 + $0x8] sm:$0xff]  ;;  %v436_v27 = vsel %vm363_vm0, %v365_v33, 0.0 }
  0x8a   : > { %488 = vrot.lane.b32.xlu1 %v2678_v53, %s2325_s24  ;;  %646 = vrot.lane.b32.xlu0 %v452_v19, %s2326_s25 }
  0x8c   : > { %v619_v10 = vpop.permute.xlu0 %618  ;;  %v617_v12 = vpop.permute.xlu1 %616 }
  0x8d   : > { %v2706_v23 = vsel %vm725_vm3, %v708_v8, %v619_v10  ;;  %v2709_v25 = vsel %vm725_vm3, %v707_v2, %v617_v12  ;;  %v355_v2 = vsel %vm254_vm1, 0.0, %v285_v46 }
  0x8e   : > { %2167 = vmatprep.mubr.msk.f32.mxu1 %vm769_vm4, %v2709_v25  ;;  %612 = vrot.lane.b32.xlu0 %v390_v1, %s2326_s25  ;;  %v2745_v1 = vld [vmem:[%s2373_s23 + $0x118] sm:$0xff] }
  0x8f   : > { %454 = vrot.lane.b32.xlu1 %v2697_v14, %s2325_s24  ;;  %2168 = vmatmul.mubr.msk.f32.vlgmr.msra.gmra.mxu1 %vm769_vm4, %v2706_v23  ;;  %v416_v13 = vrot.slane %v2745_v1, 1 }
  0x90   : > { %v495_v41 = vpop.permute.xlu1 %494  ;;  %v585_v43 = vpop.permute.xlu0 %584  ;;  %2192 = vmatpush3.msra.mxu1 %v2616_v31  ;;  %v692_v31 = vsel %vm688_vm2, %v2466_v50, %v461_v29  ;;  %v1962_v50 = vld [vmem:[%s3354_s1 + $0x38] sm:$0xff]  ;;  %v415_v29 = vrot.slane %v2742_v30, 1 }
  0x91   : > { %v2727_v44 = vsel %vm725_vm3, %v691_v40, %v585_v43  ;;  %2193 = vmatprep.subr.mxu1 %v763_v49  ;;  %v709_v46 = vsel %vm688_vm2, %v355_v2, %v495_v41  ;;  %v453_v40 = vsel %vm363_vm0, %v416_v13, 0.0  ;;  %v347_v41 = vsel %vm254_vm1, 0.0, %v261_v51 }
  0x92   : > { %614 = vrot.lane.b32.xlu0 %v444_v39, %s2326_s25  ;;  %2143 = vmatprep.mubr.msk.f32.mxu0 %vm769_vm4, %v2727_v44 }
  0x93   : > { %456 = vrot.lane.b32.xlu1 %v2700_v3, %s2325_s24  ;;  %2194 = vmatpush3.msra.mxu1 %v763_v49 }
  0x94   : > { %v497_v60 = vpop.permute.xlu1 %496  ;;  %v587_v19 = vpop.permute.xlu0 %586  ;;  %2195 = vmatprep.subr.mxu1 %v762_v55 }
  0x95   : > { %v2751_v8 = vsel %vm725_vm3, %v692_v31, %v587_v19  ;;  %2196 = vmatpush3.msra.mxu1 %v762_v55  ;;  %v710_v4 = vsel %vm688_vm2, %v2482_v57, %v497_v60  ;;  %v356_v19 = vsel %vm254_vm1, 0.0, %v288_v54 }
  0x96   : > { %2144 = vmatmul.mubr.msk.f32.vlgmr.msra.gmra.mxu0 %vm769_vm4, %v2751_v8  ;;  %580 = vrot.lane.b32.xlu0 %v366_v48, %s2326_s25 }
  0x97   : > { %582 = vrot.lane.b32.xlu1 %v436_v27, %s2326_s25  ;;  %2246 = vmatpush3.msra.mxu0 %v2621_v34  ;;  %v417_v34 = vsel %vm363_vm0, %v415_v29, %v416_v13 }
  0x98   : > { %v463_v10 = vpop.permute.xlu1 %462  ;;  %v621_v12 = vpop.permute.xlu0 %620  ;;  %2247 = vmatprep.subr.mxu0 %v1962_v50 }
  0x99   : > { %v2768_v49 = vsel %vm725_vm3, %v709_v46, %v621_v12  ;;  %2248 = vmatpush3.msra.mxu0 %v1962_v50  ;;  %v693_v57 = vsel %vm688_vm2, %v347_v41, %v463_v10  ;;  %v348_v46 = vsel %vm254_vm1, 0.0, %v264_v58 }
  0x9a   : > { %2170 = vmatprep.mubr.msk.f32.mxu1 %vm769_vm4, %v2768_v49  ;;  %522 = vrot.lane.b32.xlu0 %v2742_v30, %s2325_s24 }
  0x9b   : > { %524 = vrot.lane.b32.xlu1 %v2745_v1, %s2325_s24  ;;  %2249 = vmatprep.subr.mxu0 %v1961_v38 }
  0x9c   : > { %v465_v39 = vpop.permute.xlu1 %464  ;;  %v623_v33 = vpop.permute.xlu0 %622  ;;  %2250 = vmatpush3.msra.mxu0 %v1961_v38 }
  0x9d   : > { %v2784_v43 = vsel %vm725_vm3, %v710_v4, %v623_v33  ;;  %v694_v32 = vsel %vm688_vm2, %v2488_v59, %v465_v39  ;;  %v357_v39 = vsel %vm254_vm1, 0.0, %v291_v6 }
  0x9e   : > { %2171 = vmatmul.mubr.msk.f32.gmra.mxu1 %vm769_vm4, %v2784_v43  ;;  %648 = vrot.lane.b32.xlu0 %v417_v34, %s2326_s25 }
  0x9f   : > { %650 = vrot.lane.b32.xlu1 %v453_v40, %s2326_s25 }
  0xa0   : > { %v499_v55 = vpop.permute.xlu1 %498  ;;  %v589_v48 = vpop.permute.xlu0 %588 }
  0xa1   : > { %v2792_v31 = vsel %vm725_vm3, %v693_v57, %v589_v48  ;;  %v711_v2 = vsel %vm688_vm2, %v356_v19, %v499_v55  ;;  %v349_v48 = vsel %vm254_vm1, 0.0, %v267_v18 }
  0xa2   : > { %2146 = vmatprep.mubr.msk.f32.mxu0 %vm769_vm4, %v2792_v31 }
  0xa4   : > { %v501_v51 = vpop.permute.xlu1 %500  ;;  %v591_v60 = vpop.permute.xlu0 %590 }
  0xa5   : > { %v2802_v27 = vsel %vm725_vm3, %v694_v32, %v591_v60  ;;  %v712_v52 = vsel %vm688_vm2, %v2494_v61, %v501_v51 }
  0xa6   : > { %2147 = vmatmul.mubr.msk.f32.gmra.mxu0 %vm769_vm4, %v2802_v27 }
  0xa8   : > { %v467_v50 = vpop.permute.xlu1 %466  ;;  %v625_v29 = vpop.permute.xlu0 %624 }
  0xa9   : > { %v2808_v13 = vsel %vm725_vm3, %v711_v2, %v625_v29  ;;  %v695_v12 = vsel %vm688_vm2, %v348_v46, %v467_v50  ;;  %v358_v50 = vsel %vm254_vm1, 0.0, %v294_v36 }
  0xaa   : > { %2173 = vmatprep.mubr.msk.f32.mxu1 %vm769_vm4, %v2808_v13 }
  0xac   : > { %v469_v54 = vpop.permute.xlu1 %468  ;;  %v627_v59 = vpop.permute.xlu0 %626 }
  0xad   : > { %v2818_v10 = vsel %vm725_vm3, %v712_v52, %v627_v59  ;;  %v696_v56 = vsel %vm688_vm2, %v2502_v63, %v469_v54 }
  0xae   : > { %2174 = vmatmul.mubr.msk.f32.gmra.mxu1 %vm769_vm4, %v2818_v10 }
  0xb0   : > { %v503_v38 = vpop.permute.xlu1 %502  ;;  %v593_v34 = vpop.permute.xlu0 %592 }
  0xb1   : > { %v2824_v4 = vsel %vm725_vm3, %v695_v12, %v593_v34  ;;  %v713_v40 = vsel %vm688_vm2, %v357_v39, %v503_v38  ;;  %v350_v12 = vsel %vm254_vm1, 0.0, %v270_v45 }
  0xb2   : > { %2149 = vmatprep.mubr.msk.f32.mxu0 %vm769_vm4, %v2824_v4 }
  0xb4   : > { %v505_v58 = vpop.permute.xlu1 %504  ;;  %v595_v61 = vpop.permute.xlu0 %594 }
  0xb5   : > { %v2834_v33 = vsel %vm725_vm3, %v696_v56, %v595_v61  ;;  %v714_v63 = vsel %vm688_vm2, %v2515_v7, %v505_v58  ;;  %v297_v61 = vrot.slane %v2421_v26, 7 }
  0xb6   : > { %2150 = vmatmul.mubr.msk.f32.gmra.mxu0 %vm769_vm4, %v2834_v33 }
  0xb8   : > { %v471_v41 = vpop.permute.xlu1 %470  ;;  %v629_v57 = vpop.permute.xlu0 %628 }
  0xb9   : > { %v2840_v55 = vsel %vm725_vm3, %v713_v40, %v629_v57  ;;  %v697_v51 = vsel %vm688_vm2, %v349_v48, %v471_v41  ;;  %v298_v40 = vrot.slane %v2415_v21, 7  ;;  %v359_v41 = vsel %vm254_vm1, 0.0, %v297_v61 }
  0xba   : > { %2176 = vmatprep.mubr.msk.f32.mxu1 %vm769_vm4, %v2840_v55 }
  0xbc   : > { %v473_v5 = vpop.permute.xlu1 %472  ;;  %v631_v6 = vpop.permute.xlu0 %630 }
  0xbd   : > { %v2850_v32 = vsel %vm725_vm3, %v714_v63, %v631_v6  ;;  %v698_v7 = vsel %vm688_vm2, %v2533_v22, %v473_v5  ;;  %v273_v6 = vrot.slane %v2596_v15, 7 }
  0xbe   : > { %2177 = vmatmul.mubr.msk.f32.gmra.mxu1 %vm769_vm4, %v2850_v32 }
  0xc0   : > { %v507_v60 = vpop.permute.xlu1 %506  ;;  %v597_v19 = vpop.permute.xlu0 %596 }
  0xc1   : > { %v2856_v2 = vsel %vm725_vm3, %v697_v51, %v597_v19  ;;  %v715_v52 = vsel %vm688_vm2, %v358_v50, %v507_v60  ;;  %v274_v19 = vrot.slane %v2599_v17, 7 }
  0xc2   : > { %2152 = vmatprep.mubr.msk.f32.mxu0 %vm769_vm4, %v2856_v2 }
  0xc4   : > { %v509_v16 = vpop.permute.xlu1 %508  ;;  %v599_v18 = vpop.permute.xlu0 %598 }
  0xc5   : > { %v2866_v29 = vsel %vm725_vm3, %v698_v7, %v599_v18  ;;  %v716_v22 = vsel %vm688_vm2, %v2551_v37, %v509_v16  ;;  %v351_v7 = vsel %vm254_vm1, 0.0, %v273_v6 }
  0xc6   : > { %2153 = vmatmul.mubr.msk.f32.gmra.mxu0 %vm769_vm4, %v2866_v29 }
  0xc8   : > { %v475_v54 = vpop.permute.xlu1 %474  ;;  %v633_v59 = vpop.permute.xlu0 %632 }
  0xc9   : > { %v2872_v46 = vsel %vm725_vm3, %v715_v52, %v633_v59  ;;  %v699_v34 = vsel %vm688_vm2, %v350_v12, %v475_v54  ;;  %v300_v52 = vrot.slane %v2624_v62, 7  ;;  %v275_v54 = vsel %vm254_vm1, %v273_v6, %v274_v19 }
  0xca   : > { %2179 = vmatprep.mubr.msk.f32.mxu1 %vm769_vm4, %v2872_v46 }
  0xcb   : > { %v360_v12 = vsel %vm254_vm1, 0.0, %v300_v52 }
  0xcc   : > { %v477_v35 = vpop.permute.xlu1 %476  ;;  %v635_v36 = vpop.permute.xlu0 %634 }
  0xcd   : > { %v2882_v38 = vsel %vm725_vm3, %v716_v22, %v635_v36  ;;  %v700_v20 = vsel %vm688_vm2, %v2566_v47, %v477_v35  ;;  %v299_v47 = vsel %vm254_vm1, %v297_v61, %v298_v40  ;;  %v301_v36 = vrot.slane %v2630_v0, 7 }
  0xce   : > { %2180 = vmatmul.mubr.msk.f32.gmra.mxu1 %vm769_vm4, %v2882_v38  ;;  %v276_v61 = vrot.slane %v2642_v9, 7 }
  0xd0   : > { %v511_v56 = vpop.permute.xlu1 %510  ;;  %v601_v58 = vpop.permute.xlu0 %600 }
  0xd1   : > { %v2889_v37 = vsel %vm725_vm3, %v699_v34, %v601_v58  ;;  %v717_v26 = vsel %vm688_vm2, %v359_v41, %v511_v56  ;;  %v277_v41 = vrot.slane %v2646_v11, 7 }
  0xd2   : > { %2155 = vmatprep.mubr.msk.f32.mxu0 %vm769_vm4, %v2889_v37 }
  0xd4   : > { %v513_v45 = vpop.permute.xlu1 %512  ;;  %v603_v39 = vpop.permute.xlu0 %602 }
  0xd5   : > { %v2898_v57 = vsel %vm725_vm3, %v700_v20, %v603_v39  ;;  %v718_v21 = vsel %vm688_vm2, %v299_v47, %v513_v45  ;;  %v302_v20 = vsel %vm254_vm1, %v300_v52, %v301_v36  ;;  %v303_v47 = vrot.slane %v2658_v24, 7 }
  0xd6   : > { %2156 = vmatmul.mubr.msk.f32.gmra.mxu0 %vm769_vm4, %v2898_v57 }
  0xd8   : > { %v479_v63 = vpop.permute.xlu1 %478  ;;  %v637_v5 = vpop.permute.xlu0 %636 }
  0xd9   : > { %v2906_v48 = vsel %vm725_vm3, %v717_v26, %v637_v5  ;;  %v701_v15 = vsel %vm688_vm2, %v351_v7, %v479_v63  ;;  %v352_v26 = vsel %vm254_vm1, 0.0, %v276_v61  ;;  %v304_v7 = vrot.slane %v2662_v28, 7 }
  0xda   : > { %2182 = vmatprep.mubr.msk.f32.mxu1 %vm769_vm4, %v2906_v48 }
  0xdc   : > { %v481_v51 = vpop.permute.xlu1 %480  ;;  %v639_v60 = vpop.permute.xlu0 %638 }
  0xdd   : > { %v2914_v16 = vsel %vm725_vm3, %v718_v21, %v639_v60  ;;  %v702_v17 = vsel %vm688_vm2, %v275_v54, %v481_v51  ;;  %v278_v21 = vsel %vm254_vm1, %v276_v61, %v277_v41  ;;  %v279_v54 = vrot.slane %v2674_v42, 7 }
  0xde   : > { %2183 = vmatmul.mubr.msk.f32.gmra.mxu1 %vm769_vm4, %v2914_v16  ;;  %v255_v61 = vrot.slane %v2697_v14, 7 }
  0xe0   : > { %v515_v18 = vpop.permute.xlu1 %514  ;;  %v605_v50 = vpop.permute.xlu0 %604 }
  0xe1   : > { %v2922_v59 = vsel %vm725_vm3, %v701_v15, %v605_v50  ;;  %v719_v62 = vsel %vm688_vm2, %v360_v12, %v515_v18  ;;  %v361_v15 = vsel %vm254_vm1, 0.0, %v303_v47  ;;  %v280_v12 = vrot.slane %v2678_v53, 7 }
  0xe2   : > { %2158 = vmatprep.mubr.msk.f32.mxu0 %vm769_vm4, %v2922_v59  ;;  %v256_v53 = vrot.slane %v2700_v3, 7 }
  0xe4   : > { %v517_v22 = vpop.permute.xlu1 %516  ;;  %v607_v35 = vpop.permute.xlu0 %606 }
  0xe5   : > { %v2930_v34 = vsel %vm725_vm3, %v702_v17, %v607_v35  ;;  %v720_v0 = vsel %vm688_vm2, %v302_v20, %v517_v22  ;;  %v305_v17 = vsel %vm254_vm1, %v303_v47, %v304_v7  ;;  %v281_v20 = vsel %vm254_vm1, %v279_v54, %v280_v12 }
  0xe6   : > { %2159 = vmatmul.mubr.msk.f32.gmra.mxu0 %vm769_vm4, %v2930_v34 }
  0xe8   : > { %v483_v56 = vpop.permute.xlu1 %482  ;;  %v641_v58 = vpop.permute.xlu0 %640 }
  0xe9   : > { %v2938_v45 = vsel %vm725_vm3, %v719_v62, %v641_v58  ;;  %v703_v9 = vsel %vm688_vm2, %v352_v26, %v483_v56  ;;  %v353_v62 = vsel %vm254_vm1, 0.0, %v279_v54  ;;  %v345_v26 = vsel %vm254_vm1, 0.0, %v255_v61 }
  0xea   : > { %2185 = vmatprep.mubr.msk.f32.mxu1 %vm769_vm4, %v2938_v45 }
  0xec   : > { %v485_v39 = vpop.permute.xlu1 %484  ;;  %v643_v40 = vpop.permute.xlu0 %642 }
  0xed   : > { %v2946_v63 = vsel %vm725_vm3, %v720_v0, %v643_v40  ;;  %v704_v11 = vsel %vm688_vm2, %v278_v21, %v485_v39 }
  0xee   : > { %2186 = vmatmul.mubr.msk.f32.gmra.mxu1 %vm769_vm4, %v2946_v63 }
  0xf0   : > { %v519_v5 = vpop.permute.xlu1 %518  ;;  %v609_v6 = vpop.permute.xlu0 %608 }
  0xf1   : > { %v2954_v51 = vsel %vm725_vm3, %v703_v9, %v609_v6  ;;  %v721_v24 = vsel %vm688_vm2, %v361_v15, %v519_v5  ;;  %v257_v6 = vsel %vm254_vm1, %v255_v61, %v256_v53 }
  0xf2   : > { %2161 = vmatprep.mubr.msk.f32.mxu0 %vm769_vm4, %v2954_v51 }
  0xf4   : > { %v521_v60 = vpop.permute.xlu1 %520  ;;  %v611_v19 = vpop.permute.xlu0 %610 }
  0xf5   : > { %v2962_v18 = vsel %vm725_vm3, %v704_v11, %v611_v19  ;;  %v722_v28 = vsel %vm688_vm2, %v305_v17, %v521_v60 }
  0xf6   : > { %2162 = vmatmul.mubr.msk.f32.gmra.mxu0 %vm769_vm4, %v2962_v18 }
  0xf8   : > { %v487_v50 = vpop.permute.xlu1 %486  ;;  %v645_v52 = vpop.permute.xlu0 %644 }
  0xf9   : > { %v2970_v22 = vsel %vm725_vm3, %v721_v24, %v645_v52  ;;  %v705_v42 = vsel %vm688_vm2, %v353_v62, %v487_v50 }
  0xfa   : > { %2188 = vmatprep.mubr.msk.f32.mxu1 %vm769_vm4, %v2970_v22 }
  0xfc   : > { %v489_v35 = vpop.permute.xlu1 %488  ;;  %v647_v36 = vpop.permute.xlu0 %646 }
  0xfd   : > { %v2978_v56 = vsel %vm725_vm3, %v722_v28, %v647_v36  ;;  %v706_v40 = vsel %vm688_vm2, %v281_v20, %v489_v35 }
  0xfe   : > { %2189 = vmatmul.mubr.msk.f32.gmra.mxu1 %vm769_vm4, %v2978_v56 }
 0x100   : > { %v613_v58 = vpop.permute.xlu0 %612 }
 0x101   : > { %v742_v0 = vsel %vm725_vm3, %v705_v42, %v613_v58  ;;  %v455_v39 = vpop.permute.xlu1 %454 }
 0x102   : > { %2164 = vmatprep.mubr.msk.f32.mxu0 %vm769_vm4, %v742_v0  ;;  %v689_v14 = vsel %vm688_vm2, %v345_v26, %v455_v39 }
 0x104   : > { %v615_v41 = vpop.permute.xlu0 %614 }
 0x105   : > { %v743_v9 = vsel %vm725_vm3, %v706_v40, %v615_v41  ;;  %v457_v5 = vpop.permute.xlu1 %456 }
 0x106   : > { %2165 = vmatmul.mubr.msk.f32.gmra.mxu0 %vm769_vm4, %v743_v9  ;;  %v690_v47 = vsel %vm688_vm2, %v257_v6, %v457_v5 }
 0x107   : > { %2251 = vmatprep.mubr.msk.f32.mxu0 %vm769_vm4, %v2792_v31 }
 0x108   : > { %v581_v3 = vpop.permute.xlu0 %580 }
 0x109   : > { %v583_v21 = vpop.permute.xlu1 %582  ;;  %v726_v11 = vsel %vm725_vm3, %v689_v14, %v581_v3 }
 0x10a   : > { %v727_v60 = vsel %vm725_vm3, %v690_v47, %v583_v21  ;;  %2197 = vmatprep.mubr.msk.f32.mxu1 %vm769_vm4, %v726_v11  ;;  %2252 = vmatmul.mubr.msk.f32.vlgmr.msra.gmra.mxu0 %vm769_vm4, %v2802_v27 }
 0x10b   : > { %2198 = vmatmul.mubr.msk.f32.vlgmr.msra.gmra.mxu1 %vm769_vm4, %v727_v60  ;;  %2254 = vmatprep.mubr.msk.f32.mxu0 %vm769_vm4, %v2824_v4 }
 0x10c   : > { %2200 = vmatprep.mubr.msk.f32.mxu1 %vm769_vm4, %v2727_v44  ;;  %v307_v44 = vrot.slane %v2745_v1, 7 }
 0x10e   : > { %2255 = vmatmul.mubr.msk.f32.gmra.mxu0 %vm769_vm4, %v2834_v33 }
 0x10f   : > { %2201 = vmatmul.mubr.msk.f32.gmra.mxu1 %vm769_vm4, %v2751_v8  ;;  %2257 = vmatprep.mubr.msk.f32.mxu0 %vm769_vm4, %v2856_v2  ;;  %v525_v8 = vpop.permute.xlu1 %524 }
 0x110   : > { %2203 = vmatprep.mubr.msk.f32.mxu1 %vm769_vm4, %v2792_v31 }
 0x112   : > { %2258 = vmatmul.mubr.msk.f32.gmra.mxu0 %vm769_vm4, %v2866_v29 }
 0x113   : > { %2204 = vmatmul.mubr.msk.f32.gmra.mxu1 %vm769_vm4, %v2802_v27  ;;  %2260 = vmatprep.mubr.msk.f32.mxu0 %vm769_vm4, %v2889_v37 }
 0x114   : > { %2206 = vmatprep.mubr.msk.f32.mxu1 %vm769_vm4, %v2824_v4 }
 0x116   : > { %2261 = vmatmul.mubr.msk.f32.gmra.mxu0 %vm769_vm4, %v2898_v57 }
 0x117   : > { %2207 = vmatmul.mubr.msk.f32.gmra.mxu1 %vm769_vm4, %v2834_v33  ;;  %2263 = vmatprep.mubr.msk.f32.mxu0 %vm769_vm4, %v2922_v59 }
 0x118   : > { %2209 = vmatprep.mubr.msk.f32.mxu1 %vm769_vm4, %v2856_v2 }
 0x11a   : > { %2264 = vmatmul.mubr.msk.f32.gmra.mxu0 %vm769_vm4, %v2930_v34 }
 0x11b   : > { %2210 = vmatmul.mubr.msk.f32.gmra.mxu1 %vm769_vm4, %v2866_v29  ;;  %2266 = vmatprep.mubr.msk.f32.mxu0 %vm769_vm4, %v2954_v51 }
 0x11c   : > { %2212 = vmatprep.mubr.msk.f32.mxu1 %vm769_vm4, %v2889_v37 }
 0x11e   : > { %2267 = vmatmul.mubr.msk.f32.gmra.mxu0 %vm769_vm4, %v2962_v18 }
 0x11f   : > { %2213 = vmatmul.mubr.msk.f32.gmra.mxu1 %vm769_vm4, %v2898_v57  ;;  %2269 = vmatprep.mubr.msk.f32.mxu0 %vm769_vm4, %v742_v0 }
 0x120   : > { %2215 = vmatprep.mubr.msk.f32.mxu1 %vm769_vm4, %v2922_v59 }
 0x122   : > { %2270 = vmatmul.mubr.msk.f32.gmra.mxu0 %vm769_vm4, %v743_v9 }
 0x123   : > { %2216 = vmatmul.mubr.msk.f32.gmra.mxu1 %vm769_vm4, %v2930_v34  ;;  %2272 = vmatprep.mubr.msk.f32.mxu0 %vm769_vm4, %v2709_v25 }
 0x124   : > { %2218 = vmatprep.mubr.msk.f32.mxu1 %vm769_vm4, %v2954_v51 }
 0x126   : > { %2273 = vmatmul.mubr.msk.f32.gmra.mxu0 %vm769_vm4, %v2706_v23 }
 0x127   : > { %2219 = vmatmul.mubr.msk.f32.gmra.mxu1 %vm769_vm4, %v2962_v18  ;;  %2275 = vmatprep.mubr.msk.f32.mxu0 %vm769_vm4, %v2768_v49 }
 0x128   : > { %2221 = vmatprep.mubr.msk.f32.mxu1 %vm769_vm4, %v742_v0 }
 0x12a   : > { %2276 = vmatmul.mubr.msk.f32.gmra.mxu0 %vm769_vm4, %v2784_v43 }
 0x12b   : > { %2222 = vmatmul.mubr.msk.f32.gmra.mxu1 %vm769_vm4, %v743_v9  ;;  %2278 = vmatprep.mubr.msk.f32.mxu0 %vm769_vm4, %v2808_v13 }
 0x12c   : > { %2224 = vmatprep.mubr.msk.f32.mxu1 %vm769_vm4, %v2709_v25  ;;  %v523_v25 = vpop.permute.xlu0 %522 }
 0x12e   : > { %2279 = vmatmul.mubr.msk.f32.gmra.mxu0 %vm769_vm4, %v2818_v10 }
 0x12f   : > { %2225 = vmatmul.mubr.msk.f32.gmra.mxu1 %vm769_vm4, %v2706_v23  ;;  %2281 = vmatprep.mubr.msk.f32.mxu0 %vm769_vm4, %v2840_v55  ;;  %v306_v23 = vrot.slane %v2742_v30, 7 }
 0x130   : > { %2227 = vmatprep.mubr.msk.f32.mxu1 %vm769_vm4, %v2768_v49  ;;  %v649_v1 = vpop.permute.xlu0 %648 }
 0x131   : > { %v362_v30 = vsel %vm254_vm1, 0.0, %v306_v23 }
 0x132   : > { %2282 = vmatmul.mubr.msk.f32.gmra.mxu0 %vm769_vm4, %v2850_v32  ;;  %v723_v49 = vsel %vm688_vm2, %v362_v30, %v523_v25 }
 0x133   : > { %2228 = vmatmul.mubr.msk.f32.gmra.mxu1 %vm769_vm4, %v2784_v43  ;;  %2284 = vmatprep.mubr.msk.f32.mxu0 %vm769_vm4, %v2872_v46  ;;  %v308_v43 = vsel %vm254_vm1, %v306_v23, %v307_v44  ;;  %v760_v27 = vsel %vm725_vm3, %v723_v49, %v649_v1 }
 0x134   : > { %2230 = vmatprep.mubr.msk.f32.mxu1 %vm769_vm4, %v2808_v13  ;;  %v724_v31 = vsel %vm688_vm2, %v308_v43, %v525_v8  ;;  %v651_v13 = vpop.permute.xlu1 %650 }
 0x136   : > { %2285 = vmatmul.mubr.msk.f32.gmra.mxu0 %vm769_vm4, %v2882_v38 }
 0x137   : > { %2231 = vmatmul.mubr.msk.f32.gmra.mxu1 %vm769_vm4, %v2818_v10  ;;  %2287 = vmatprep.mubr.msk.f32.mxu0 %vm769_vm4, %v2906_v48  ;;  %v761_v10 = vsel %vm725_vm3, %v724_v31, %v651_v13 }
 0x138   : > { %2233 = vmatprep.mubr.msk.f32.mxu1 %vm769_vm4, %v2840_v55 }
 0x13a   : > { %2288 = vmatmul.mubr.msk.f32.gmra.mxu0 %vm769_vm4, %v2914_v16 }
 0x13b   : > { %2234 = vmatmul.mubr.msk.f32.gmra.mxu1 %vm769_vm4, %v2850_v32  ;;  %2290 = vmatprep.mubr.msk.f32.mxu0 %vm769_vm4, %v2938_v45 }
 0x13c   : > { %2236 = vmatprep.mubr.msk.f32.mxu1 %vm769_vm4, %v2872_v46  ;;  %v2327_v46 = vmov 0.0  }
 0x13d   : > { %1762 = vst.msk [vmem:[%s3134_s15] sm:$0xff] %vm688_vm2, %v2327_v46  ;;  %1763 = vst.msk [vmem:[%s3134_s15 + $0x8] sm:$0xff] %vm688_vm2, %v2327_v46 }
 0x13e   : > { %2291 = vmatmul.mubr.msk.f32.gmra.mxu0 %vm769_vm4, %v2946_v63  ;;  %1996 = vst.msk [vmem:[%s3134_s15 + $0x110] sm:$0xff] %vm688_vm2, %v2327_v46  ;;  %1997 = vst.msk [vmem:[%s3134_s15 + $0x118] sm:$0xff] %vm688_vm2, %v2327_v46 }
 0x13f   : > { %2293 = vmatprep.mubr.msk.f32.mxu0 %vm769_vm4, %v2970_v22  ;;  %2237 = vmatmul.mubr.msk.f32.gmra.mxu1 %vm769_vm4, %v2882_v38 }
 0x140   : > { %2239 = vmatprep.mubr.msk.f32.mxu1 %vm769_vm4, %v2906_v48 }
 0x142   : > { %2294 = vmatmul.mubr.msk.f32.gmra.mxu0 %vm769_vm4, %v2978_v56 }
 0x143   : > { %2240 = vmatmul.mubr.msk.f32.gmra.mxu1 %vm769_vm4, %v2914_v16  ;;  %2296 = vmatprep.mubr.msk.f32.mxu0 %vm769_vm4, %v760_v27 }
 0x144   : > { %2242 = vmatprep.mubr.msk.f32.mxu1 %vm769_vm4, %v2938_v45 }
 0x146   : > { %2297 = vmatmul.mubr.msk.f32.gmra.mxu0 %vm769_vm4, %v761_v10 }
 0x147   : > { %2243 = vmatmul.mubr.msk.f32.gmra.mxu1 %vm769_vm4, %v2946_v63 }
 0x14f   : > { %v3125_v4 = vpop.f32.mrf.mxu1 }
 0x151   : > { %v3127_v55 = vpop.f32.mrf.mxu1 }
 0x156   : > { %v2145_v33 = vpop.f32.mrf.mxu0 }
 0x158   : > { %v932_v32 = vpop.f32.mrf.mxu0 }
 0x15e   : > { %v3136_v2 = vpop.f32.mrf.mxu1 }
 0x160   : > { %v3146_v38 = vpop.f32.mrf.mxu1 }
 0x166   : > { %v2148_v29 = vpop.f32.mrf.mxu0 }
 0x168   : > { %v942_v37 = vpop.f32.mrf.mxu0 }
 0x16e   : > { %v3148_v57 = vpop.f32.mrf.mxu1 }
 0x170   : > { %v3150_v16 = vpop.f32.mrf.mxu1 }
 0x176   : > { %v2151_v48 = vpop.f32.mrf.mxu0 }
 0x178   : > { %v952_v59 = vpop.f32.mrf.mxu0 }
 0x17e   : > { %v3152_v34 = vpop.f32.mrf.mxu1 }
 0x180   : > { %v3156_v63 = vpop.f32.mrf.mxu1 }
 0x186   : > { %v3154_v45 = vpop.f32.mrf.mxu0 }
 0x188   : > { %v3158_v51 = vpop.f32.mrf.mxu0 }
 0x18e   : > { %v3160_v19 = vpop.f32.mrf.mxu1 }
 0x190   : > { %v3164_v15 = vpop.f32.mrf.mxu1 }
 0x196   : > { %v3162_v7 = vpop.f32.mrf.mxu0 }
 0x198   : > { %v3166_v18 = vpop.f32.mrf.mxu0 }
 0x19e   : > { %v3168_v24 = vpop.f32.mrf.mxu1 }
 0x1a0   : > { %v3172_v52 = vpop.f32.mrf.mxu1 }
 0x1a6   : > { %v3170_v50 = vpop.f32.mrf.mxu0 }
 0x1a8   : > { %v3174_v54 = vpop.f32.mrf.mxu0 }
 0x1ae   : > { %v3176_v17 = vpop.f32.mrf.mxu1 }
 0x1b0   : > { %v3180_v28 = vpop.f32.mrf.mxu1 }
 0x1b6   : > { %v3178_v22 = vpop.f32.mrf.mxu0 }
 0x1b8   : > { %v3182_v35 = vpop.f32.mrf.mxu0 }
 0x1be   : > { %v3184_v36 = vpop.f32.mrf.mxu1 }
 0x1c0   : > { %v3190_v56 = vpop.f32.mrf.mxu1 }
 0x1c6   : > { %v3186_v12 = vpop.f32.mrf.mxu0 }
 0x1c8   : > { %v3188_v62 = vpop.f32.mrf.mxu0 }
 0x1ca   : > { %v2253_v42 = vpop.f32.mrf.mxu0 }
 0x1cb   : > { %v2199_v58 = vpop.f32.mrf.mxu1 }
 0x1cc   : > { %v1169_v61 = vadd.f32 %v2199_v58, %v2145_v33  ;;  %v1398_v20 = vpop.f32.mrf.mxu0 }
 0x1cd   : > { %v1163_v0 = vpop.f32.mrf.mxu1 }
 0x1ce   : > { %v1558_v39 = vadd.f32 %v2253_v42, %v1169_v61  ;;  %v1164_v53 = vadd.f32 %v1163_v0, %v932_v32  ;;  %v2256_v40 = vpop.f32.mrf.mxu0 }
 0x1cf   : > { %v2202_v41 = vpop.f32.mrf.mxu1 }
 0x1d0   : > { %1999 = vst.msk [vmem:[%s3134_s15 + $0x18] sm:$0xff] %vm688_vm2, %v1558_v39  ;;  %v1557_v26 = vadd.f32 %v1398_v20, %v1164_v53  ;;  %v1179_v9 = vadd.f32 %v2202_v41, %v2148_v29  ;;  %v1408_v5 = vpop.f32.mrf.mxu0  ;;  %v1661_v21 = vmul.f32 %v1558_v39, %v1558_v39  ;;  %v1590_v30 = vsel %vm688_vm2, %v1558_v39, 0.0 }
 0x1d1   : > { %v1173_v6 = vpop.f32.mrf.mxu1 }
 0x1d2   : > { %v1660_v14 = vmul.f32 %v1557_v26, %v1557_v26  ;;  %1998 = vst.msk [vmem:[%s3134_s15 + $0x10] sm:$0xff] %vm688_vm2, %v1557_v26  ;;  %v1560_v3 = vadd.f32 %v2256_v40, %v1179_v9  ;;  %v2259_v47 = vpop.f32.mrf.mxu0  ;;  %v1589_v11 = vsel %vm688_vm2, %v1557_v26, 0.0  ;;  %v1174_v60 = vadd.f32 %v1173_v6, %v942_v37 }
 0x1d3   : > { %v2205_v23 = vpop.f32.mrf.mxu1  ;;  %v1591_v1 = vadd.f32 %v1590_v30, %v1589_v11  ;;  %v1693_v33 = vsel %vm688_vm2, %v1661_v21, 0.0 }
 0x1d4   : > { %2001 = vst.msk [vmem:[%s3134_s15 + $0x28] sm:$0xff] %vm688_vm2, %v1560_v3  ;;  %v1189_v25 = vadd.f32 %v2205_v23, %v2151_v48  ;;  %v1418_v44 = vpop.f32.mrf.mxu0  ;;  %v1692_v8 = vsel %vm688_vm2, %v1660_v14, 0.0  ;;  %v1559_v49 = vadd.f32 %v1408_v5, %v1174_v60  ;;  %v1663_v31 = vmul.f32 %v1560_v3, %v1560_v3 }
 0x1d5   : > { %v1183_v43 = vpop.f32.mrf.mxu1  ;;  %v1694_v37 = vadd.f32 %v1693_v33, %v1692_v8  ;;  %v1594_v61 = vsel %vm688_vm2, %v1560_v3, 0.0 }
 0x1d6   : > { %v1562_v27 = vadd.f32 %v2259_v47, %v1189_v25  ;;  %v1184_v13 = vadd.f32 %v1183_v43, %v952_v59  ;;  %v2262_v10 = vpop.f32.mrf.mxu0  ;;  %v1592_v32 = vsel %vm688_vm2, %v1559_v49, 0.0  ;;  %v1662_v29 = vmul.f32 %v1559_v49, %v1559_v49  ;;  %2000 = vst.msk [vmem:[%s3134_s15 + $0x20] sm:$0xff] %vm688_vm2, %v1559_v49 }
 0x1d7   : > { %v2208_v46 = vpop.f32.mrf.mxu1  ;;  %v1593_v48 = vadd.f32 %v1592_v32, %v1591_v1  ;;  %v1697_v39 = vsel %vm688_vm2, %v1663_v31, 0.0 }
 0x1d8   : > { %2003 = vst.msk [vmem:[%s3134_s15 + $0x38] sm:$0xff] %vm688_vm2, %v1562_v27  ;;  %v1561_v42 = vadd.f32 %v1418_v44, %v1184_v13  ;;  %v1428_v58 = vpop.f32.mrf.mxu0  ;;  %v1695_v59 = vsel %vm688_vm2, %v1662_v29, 0.0  ;;  %v1199_v20 = vadd.f32 %v2208_v46, %v3154_v45  ;;  %v1665_v9 = vmul.f32 %v1562_v27, %v1562_v27 }
 0x1d9   : > { %v1193_v0 = vpop.f32.mrf.mxu1  ;;  %v1696_v53 = vadd.f32 %v1695_v59, %v1694_v37  ;;  %v1595_v40 = vadd.f32 %v1594_v61, %v1593_v48  ;;  %v1598_v60 = vsel %vm688_vm2, %v1562_v27, 0.0 }
 0x1da   : > { %v1596_v41 = vsel %vm688_vm2, %v1561_v42, 0.0  ;;  %2002 = vst.msk [vmem:[%s3134_s15 + $0x30] sm:$0xff] %vm688_vm2, %v1561_v42  ;;  %v2265_v26 = vpop.f32.mrf.mxu0  ;;  %v1664_v5 = vmul.f32 %v1561_v42, %v1561_v42  ;;  %v1564_v6 = vadd.f32 %v2262_v10, %v1199_v20  ;;  %v1194_v14 = vadd.f32 %v1193_v0, %v3158_v51 }
 0x1db   : > { %v2211_v3 = vpop.f32.mrf.mxu1  ;;  %v1597_v47 = vadd.f32 %v1596_v41, %v1595_v40  ;;  %v1698_v21 = vadd.f32 %v1697_v39, %v1696_v53 }
 0x1dc   : > { %v1209_v45 = vadd.f32 %v2211_v3, %v3162_v7  ;;  %v1438_v11 = vpop.f32.mrf.mxu0  ;;  %v1699_v23 = vsel %vm688_vm2, %v1664_v5, 0.0  ;;  %v1667_v25 = vmul.f32 %v1564_v6, %v1564_v6  ;;  %2005 = vst.msk [vmem:[%s3134_s15 + $0x48] sm:$0xff] %vm688_vm2, %v1564_v6  ;;  %v1563_v44 = vadd.f32 %v1428_v58, %v1194_v14 }
 0x1dd   : > { %v1203_v30 = vpop.f32.mrf.mxu1  ;;  %v1700_v8 = vadd.f32 %v1699_v23, %v1698_v21  ;;  %v1599_v49 = vadd.f32 %v1598_v60, %v1597_v47  ;;  %v1701_v7 = vsel %vm688_vm2, %v1665_v9, 0.0  ;;  %v1602_v29 = vsel %vm688_vm2, %v1564_v6, 0.0 }
 0x1de   : > { %v1566_v51 = vadd.f32 %v2265_v26, %v1209_v45  ;;  %v1204_v43 = vadd.f32 %v1203_v30, %v3166_v18  ;;  %v2268_v1 = vpop.f32.mrf.mxu0  ;;  %v1600_v31 = vsel %vm688_vm2, %v1563_v44, 0.0  ;;  %v1666_v13 = vmul.f32 %v1563_v44, %v1563_v44  ;;  %2004 = vst.msk [vmem:[%s3134_s15 + $0x40] sm:$0xff] %vm688_vm2, %v1563_v44 }
 0x1df   : > { %v2214_v27 = vpop.f32.mrf.mxu1  ;;  %v1601_v10 = vadd.f32 %v1600_v31, %v1599_v49  ;;  %v1702_v33 = vadd.f32 %v1701_v7, %v1700_v8  ;;  %v1705_v42 = vsel %vm688_vm2, %v1667_v25, 0.0 }
 0x1e0   : > { %2007 = vst.msk [vmem:[%s3134_s15 + $0x58] sm:$0xff] %vm688_vm2, %v1566_v51  ;;  %v1448_v32 = vpop.f32.mrf.mxu0  ;;  %v1703_v46 = vsel %vm688_vm2, %v1666_v13, 0.0  ;;  %v1565_v18 = vadd.f32 %v1438_v11, %v1204_v43  ;;  %v1219_v37 = vadd.f32 %v2214_v27, %v3170_v50  ;;  %v1669_v0 = vmul.f32 %v1566_v51, %v1566_v51 }
 0x1e1   : > { %v1213_v48 = vpop.f32.mrf.mxu1  ;;  %v1704_v58 = vadd.f32 %v1703_v46, %v1702_v33  ;;  %v1603_v61 = vadd.f32 %v1602_v29, %v1601_v10  ;;  %v1606_v14 = vsel %vm688_vm2, %v1566_v51, 0.0 }
 0x1e2   : > { %v1214_v59 = vadd.f32 %v1213_v48, %v3174_v54  ;;  %v2271_v20 = vpop.f32.mrf.mxu0  ;;  %v1604_v39 = vsel %vm688_vm2, %v1565_v18, 0.0  ;;  %v1668_v53 = vmul.f32 %v1565_v18, %v1565_v18  ;;  %2006 = vst.msk [vmem:[%s3134_s15 + $0x50] sm:$0xff] %vm688_vm2, %v1565_v18  ;;  %v1568_v40 = vadd.f32 %v2268_v1, %v1219_v37 }
 0x1e3   : > { %v2217_v41 = vpop.f32.mrf.mxu1  ;;  %v1605_v26 = vadd.f32 %v1604_v39, %v1603_v61  ;;  %v1706_v50 = vadd.f32 %v1705_v42, %v1704_v58  ;;  %v1709_v23 = vsel %vm688_vm2, %v1669_v0, 0.0 }
 0x1e4   : > { %v1567_v9 = vadd.f32 %v1448_v32, %v1214_v59  ;;  %v1229_v5 = vadd.f32 %v2217_v41, %v3178_v22  ;;  %v1458_v6 = vpop.f32.mrf.mxu0  ;;  %v1707_v54 = vsel %vm688_vm2, %v1668_v53, 0.0  ;;  %2009 = vst.msk [vmem:[%s3134_s15 + $0x68] sm:$0xff] %vm688_vm2, %v1568_v40  ;;  %v1671_v22 = vmul.f32 %v1568_v40, %v1568_v40 }
 0x1e5   : > { %v1223_v3 = vpop.f32.mrf.mxu1  ;;  %v1708_v47 = vadd.f32 %v1707_v54, %v1706_v50  ;;  %v1607_v21 = vadd.f32 %v1606_v14, %v1605_v26  ;;  %v1610_v7 = vsel %vm688_vm2, %v1568_v40, 0.0 }
 0x1e6   : > { %v1608_v45 = vsel %vm688_vm2, %v1567_v9, 0.0  ;;  %v1670_v11 = vmul.f32 %v1567_v9, %v1567_v9  ;;  %2008 = vst.msk [vmem:[%s3134_s15 + $0x60] sm:$0xff] %vm688_vm2, %v1567_v9  ;;  %v2274_v60 = vpop.f32.mrf.mxu0  ;;  %v1570_v25 = vadd.f32 %v2271_v20, %v1229_v5  ;;  %v1224_v44 = vadd.f32 %v1223_v3, %v3182_v35 }
 0x1e7   : > { %v2220_v30 = vpop.f32.mrf.mxu1  ;;  %v1609_v8 = vadd.f32 %v1608_v45, %v1607_v21  ;;  %v1710_v49 = vadd.f32 %v1709_v23, %v1708_v47  ;;  %v1713_v46 = vsel %vm688_vm2, %v1671_v22, 0.0 }
 0x1e8   : > { %v1711_v51 = vsel %vm688_vm2, %v1670_v11, 0.0  ;;  %v1239_v43 = vadd.f32 %v2220_v30, %v3186_v12  ;;  %v1468_v1 = vpop.f32.mrf.mxu0  ;;  %v1673_v31 = vmul.f32 %v1570_v25, %v1570_v25  ;;  %2011 = vst.msk [vmem:[%s3134_s15 + $0x78] sm:$0xff] %vm688_vm2, %v1570_v25  ;;  %v1569_v13 = vadd.f32 %v1458_v6, %v1224_v44 }
 0x1e9   : > { %v1233_v27 = vpop.f32.mrf.mxu1  ;;  %v1712_v10 = vadd.f32 %v1711_v51, %v1710_v49  ;;  %v1611_v33 = vadd.f32 %v1610_v7, %v1609_v8  ;;  %v1614_v61 = vsel %vm688_vm2, %v1570_v25, 0.0 }
 0x1ea   : > { %v1572_v35 = vadd.f32 %v2274_v60, %v1239_v43  ;;  %v1234_v32 = vadd.f32 %v1233_v27, %v3188_v62  ;;  %v2277_v29 = vpop.f32.mrf.mxu0  ;;  %v1612_v18 = vsel %vm688_vm2, %v1569_v13, 0.0  ;;  %v1672_v12 = vmul.f32 %v1569_v13, %v1569_v13  ;;  %2010 = vst.msk [vmem:[%s3134_s15 + $0x70] sm:$0xff] %vm688_vm2, %v1569_v13 }
 0x1eb   : > { %v2223_v37 = vpop.f32.mrf.mxu1  ;;  %v1613_v48 = vadd.f32 %v1612_v18, %v1611_v33  ;;  %v1714_v42 = vadd.f32 %v1713_v46, %v1712_v10  ;;  %v1717_v39 = vsel %vm688_vm2, %v1673_v31, 0.0 }
 0x1ec   : > { %2013 = vst.msk [vmem:[%s3134_s15 + $0x88] sm:$0xff] %vm688_vm2, %v1572_v35  ;;  %v1478_v58 = vpop.f32.mrf.mxu0  ;;  %v1715_v59 = vsel %vm688_vm2, %v1672_v12, 0.0  ;;  %v1571_v62 = vadd.f32 %v1468_v1, %v1234_v32  ;;  %v1249_v20 = vadd.f32 %v2223_v37, %v3125_v4  ;;  %v1675_v50 = vmul.f32 %v1572_v35, %v1572_v35 }
 0x1ed   : > { %v1243_v0 = vpop.f32.mrf.mxu1  ;;  %v1716_v53 = vadd.f32 %v1715_v59, %v1714_v42  ;;  %v1615_v40 = vadd.f32 %v1614_v61, %v1613_v48  ;;  %v1618_v45 = vsel %vm688_vm2, %v1572_v35, 0.0 }
 0x1ee   : > { %v1244_v41 = vadd.f32 %v1243_v0, %v3127_v55  ;;  %v2280_v26 = vpop.f32.mrf.mxu0  ;;  %v1616_v9 = vsel %vm688_vm2, %v1571_v62, 0.0  ;;  %v1674_v5 = vmul.f32 %v1571_v62, %v1571_v62  ;;  %2012 = vst.msk [vmem:[%s3134_s15 + $0x80] sm:$0xff] %vm688_vm2, %v1571_v62  ;;  %v1574_v6 = vadd.f32 %v2277_v29, %v1249_v20 }
 0x1ef   : > { %v2226_v14 = vpop.f32.mrf.mxu1  ;;  %v1617_v54 = vadd.f32 %v1616_v9, %v1615_v40  ;;  %v1718_v4 = vadd.f32 %v1717_v39, %v1716_v53  ;;  %v1721_v30 = vsel %vm688_vm2, %v1675_v50, 0.0 }
 0x1f0   : > { %v1573_v3 = vadd.f32 %v1478_v58, %v1244_v41  ;;  %v1259_v47 = vadd.f32 %v2226_v14, %v3136_v2  ;;  %v1488_v21 = vpop.f32.mrf.mxu0  ;;  %v1719_v55 = vsel %vm688_vm2, %v1674_v5, 0.0  ;;  %2015 = vst.msk [vmem:[%s3134_s15 + $0x98] sm:$0xff] %vm688_vm2, %v1574_v6  ;;  %v1677_v2 = vmul.f32 %v1574_v6, %v1574_v6 }
 0x1f1   : > { %v1253_v11 = vpop.f32.mrf.mxu1  ;;  %v1720_v60 = vadd.f32 %v1719_v55, %v1718_v4  ;;  %v1619_v23 = vadd.f32 %v1618_v45, %v1617_v54  ;;  %v1622_v27 = vsel %vm688_vm2, %v1574_v6, 0.0 }
 0x1f2   : > { %v1620_v22 = vsel %vm688_vm2, %v1573_v3, 0.0  ;;  %v1676_v25 = vmul.f32 %v1573_v3, %v1573_v3  ;;  %2014 = vst.msk [vmem:[%s3134_s15 + $0x90] sm:$0xff] %vm688_vm2, %v1573_v3  ;;  %v2283_v44 = vpop.f32.mrf.mxu0  ;;  %v1576_v8 = vadd.f32 %v2280_v26, %v1259_v47  ;;  %v1254_v49 = vadd.f32 %v1253_v11, %v3146_v38 }
 0x1f3   : > { %v2229_v51 = vpop.f32.mrf.mxu1  ;;  %v1621_v43 = vadd.f32 %v1620_v22, %v1619_v23  ;;  %v1722_v1 = vadd.f32 %v1721_v30, %v1720_v60  ;;  %v1725_v12 = vsel %vm688_vm2, %v1677_v2, 0.0 }
 0x1f4   : > { %v1723_v7 = vsel %vm688_vm2, %v1676_v25, 0.0  ;;  %v1269_v31 = vadd.f32 %v2229_v51, %v3148_v57  ;;  %v1498_v13 = vpop.f32.mrf.mxu0  ;;  %v1679_v10 = vmul.f32 %v1576_v8, %v1576_v8  ;;  %2017 = vst.msk [vmem:[%s3134_s15 + $0xa8] sm:$0xff] %vm688_vm2, %v1576_v8  ;;  %v1575_v33 = vadd.f32 %v1488_v21, %v1254_v49 }
 0x1f5   : > { %v1263_v35 = vpop.f32.mrf.mxu1  ;;  %v1724_v32 = vadd.f32 %v1723_v7, %v1722_v1  ;;  %v1623_v29 = vadd.f32 %v1622_v27, %v1621_v43  ;;  %v1626_v59 = vsel %vm688_vm2, %v1576_v8, 0.0 }
 0x1f6   : > { %v1578_v38 = vadd.f32 %v2283_v44, %v1269_v31  ;;  %v1264_v46 = vadd.f32 %v1263_v35, %v3150_v16  ;;  %v2286_v18 = vpop.f32.mrf.mxu0  ;;  %v1624_v37 = vsel %vm688_vm2, %v1575_v33, 0.0  ;;  %v1678_v57 = vmul.f32 %v1575_v33, %v1575_v33  ;;  %2016 = vst.msk [vmem:[%s3134_s15 + $0xa0] sm:$0xff] %vm688_vm2, %v1575_v33 }
 0x1f7   : > { %v2232_v48 = vpop.f32.mrf.mxu1  ;;  %v1625_v42 = vadd.f32 %v1624_v37, %v1623_v29  ;;  %v1726_v58 = vadd.f32 %v1725_v12, %v1724_v32  ;;  %v1729_v39 = vsel %vm688_vm2, %v1679_v10, 0.0 }
 0x1f8   : > { %2019 = vst.msk [vmem:[%s3134_s15 + $0xb8] sm:$0xff] %vm688_vm2, %v1578_v38  ;;  %v1508_v61 = vpop.f32.mrf.mxu0  ;;  %v1727_v62 = vsel %vm688_vm2, %v1678_v57, 0.0  ;;  %v1577_v16 = vadd.f32 %v1498_v13, %v1264_v46  ;;  %v1279_v20 = vadd.f32 %v2232_v48, %v3152_v34  ;;  %v1681_v50 = vmul.f32 %v1578_v38, %v1578_v38 }
 0x1f9   : > { %v1273_v0 = vpop.f32.mrf.mxu1  ;;  %v1728_v53 = vadd.f32 %v1727_v62, %v1726_v58  ;;  %v1627_v40 = vadd.f32 %v1626_v59, %v1625_v42  ;;  %v1630_v21 = vsel %vm688_vm2, %v1578_v38, 0.0 }
 0x1fa   : > { %v1274_v41 = vadd.f32 %v1273_v0, %v3156_v63  ;;  %v2289_v26 = vpop.f32.mrf.mxu0  ;;  %v1628_v9 = vsel %vm688_vm2, %v1577_v16, 0.0  ;;  %v1680_v5 = vmul.f32 %v1577_v16, %v1577_v16  ;;  %2018 = vst.msk [vmem:[%s3134_s15 + $0xb0] sm:$0xff] %vm688_vm2, %v1577_v16  ;;  %v1580_v6 = vadd.f32 %v2286_v18, %v1279_v20 }
 0x1fb   : > { %v2235_v14 = vpop.f32.mrf.mxu1  ;;  %v1629_v54 = vadd.f32 %v1628_v9, %v1627_v40  ;;  %v1730_v34 = vadd.f32 %v1729_v39, %v1728_v53  ;;  %v1733_v25 = vsel %vm688_vm2, %v1681_v50, 0.0 }
 0x1fc   : > { %v1579_v4 = vadd.f32 %v1508_v61, %v1274_v41  ;;  %v1289_v3 = vadd.f32 %v2235_v14, %v3160_v19  ;;  %v1518_v47 = vpop.f32.mrf.mxu0  ;;  %v1731_v63 = vsel %vm688_vm2, %v1680_v5, 0.0  ;;  %2021 = vst.msk [vmem:[%s3134_s15 + $0xc8] sm:$0xff] %vm688_vm2, %v1580_v6  ;;  %v1683_v19 = vmul.f32 %v1580_v6, %v1580_v6 }
 0x1fd   : > { %v1283_v45 = vpop.f32.mrf.mxu1  ;;  %v1732_v55 = vadd.f32 %v1731_v63, %v1730_v34  ;;  %v1631_v11 = vadd.f32 %v1630_v21, %v1629_v54  ;;  %v1634_v7 = vsel %vm688_vm2, %v1580_v6, 0.0 }
 0x1fe   : > { %v1632_v60 = vsel %vm688_vm2, %v1579_v4, 0.0  ;;  %v1682_v23 = vmul.f32 %v1579_v4, %v1579_v4  ;;  %2020 = vst.msk [vmem:[%s3134_s15 + $0xc0] sm:$0xff] %vm688_vm2, %v1579_v4  ;;  %v2292_v22 = vpop.f32.mrf.mxu0  ;;  %v1582_v44 = vadd.f32 %v2289_v26, %v1289_v3  ;;  %v1284_v30 = vadd.f32 %v1283_v45, %v3164_v15 }
 0x1ff   : > { %v2238_v2 = vpop.f32.mrf.mxu1  ;;  %v1633_v8 = vadd.f32 %v1632_v60, %v1631_v11  ;;  %v1734_v49 = vadd.f32 %v1733_v25, %v1732_v55  ;;  %v1737_v29 = vsel %vm688_vm2, %v1683_v19, 0.0 }
 0x200   : > { %v1735_v51 = vsel %vm688_vm2, %v1682_v23, 0.0  ;;  %v1299_v43 = vadd.f32 %v2238_v2, %v3168_v24  ;;  %v1528_v1 = vpop.f32.mrf.mxu0  ;;  %v1685_v31 = vmul.f32 %v1582_v44, %v1582_v44  ;;  %2023 = vst.msk [vmem:[%s3134_s15 + $0xd8] sm:$0xff] %vm688_vm2, %v1582_v44  ;;  %v1581_v13 = vadd.f32 %v1518_v47, %v1284_v30 }
 0x201   : > { %v1293_v27 = vpop.f32.mrf.mxu1  ;;  %v1736_v10 = vadd.f32 %v1735_v51, %v1734_v49  ;;  %v1635_v33 = vadd.f32 %v1634_v7, %v1633_v8  ;;  %v1638_v57 = vsel %vm688_vm2, %v1582_v44, 0.0 }
 0x202   : > { %v1584_v15 = vadd.f32 %v2292_v22, %v1299_v43  ;;  %v1294_v35 = vadd.f32 %v1293_v27, %v3172_v52  ;;  %v2295_v32 = vpop.f32.mrf.mxu0  ;;  %v1636_v38 = vsel %vm688_vm2, %v1581_v13, 0.0  ;;  %v1684_v24 = vmul.f32 %v1581_v13, %v1581_v13  ;;  %2022 = vst.msk [vmem:[%s3134_s15 + $0xd0] sm:$0xff] %vm688_vm2, %v1581_v13 }
 0x203   : > { %v2241_v46 = vpop.f32.mrf.mxu1  ;;  %v1637_v18 = vadd.f32 %v1636_v38, %v1635_v33  ;;  %v1738_v12 = vadd.f32 %v1737_v29, %v1736_v10  ;;  %v1741_v61 = vsel %vm688_vm2, %v1685_v31, 0.0 }
 0x204   : > { %2025 = vst.msk [vmem:[%s3134_s15 + $0xe8] sm:$0xff] %vm688_vm2, %v1584_v15  ;;  %v1538_v37 = vpop.f32.mrf.mxu0  ;;  %v1739_v48 = vsel %vm688_vm2, %v1684_v24, 0.0  ;;  %v1583_v52 = vadd.f32 %v1528_v1, %v1294_v35  ;;  %v1309_v42 = vadd.f32 %v2241_v46, %v3176_v17  ;;  %v1687_v20 = vmul.f32 %v1584_v15, %v1584_v15 }
 0x205   : > { %v1303_v58 = vpop.f32.mrf.mxu1  ;;  %v1740_v59 = vadd.f32 %v1739_v48, %v1738_v12  ;;  %v1639_v62 = vadd.f32 %v1638_v57, %v1637_v18  ;;  %v1642_v5 = vsel %vm688_vm2, %v1584_v15, 0.0 }
 0x206   : > { %v1304_v16 = vadd.f32 %v1303_v58, %v3180_v28  ;;  %v1640_v0 = vsel %vm688_vm2, %v1583_v52, 0.0  ;;  %v1686_v39 = vmul.f32 %v1583_v52, %v1583_v52  ;;  %2024 = vst.msk [vmem:[%s3134_s15 + $0xe0] sm:$0xff] %vm688_vm2, %v1583_v52  ;;  %v1586_v53 = vadd.f32 %v2295_v32, %v1309_v42  ;;  %v2298_v50 = vpop.f32.mrf.mxu0 }
 0x207   : > { %v2244_v40 = vpop.f32.mrf.mxu1  ;;  %v1641_v41 = vadd.f32 %v1640_v0, %v1639_v62  ;;  %v1742_v26 = vadd.f32 %v1741_v61, %v1740_v59  ;;  %v1745_v3 = vsel %vm688_vm2, %v1687_v20, 0.0 }
 0x208   : > { %v1585_v17 = vadd.f32 %v1538_v37, %v1304_v16  ;;  %v1319_v9 = vadd.f32 %v2244_v40, %v3184_v36  ;;  %v1743_v6 = vsel %vm688_vm2, %v1686_v39, 0.0  ;;  %2027 = vst.msk [vmem:[%s3134_s15 + $0xf8] sm:$0xff] %vm688_vm2, %v1586_v53  ;;  %v1689_v47 = vmul.f32 %v1586_v53, %v1586_v53  ;;  %v1548_v11 = vpop.f32.mrf.mxu0 }
 0x209   : > { %v1313_v28 = vpop.f32.mrf.mxu1  ;;  %v1744_v14 = vadd.f32 %v1743_v6, %v1742_v26  ;;  %v1643_v54 = vadd.f32 %v1642_v5, %v1641_v41  ;;  %v1646_v60 = vsel %vm688_vm2, %v1586_v53, 0.0 }
 0x20a   : > { %v1644_v34 = vsel %vm688_vm2, %v1585_v17, 0.0  ;;  %v1688_v4 = vmul.f32 %v1585_v17, %v1585_v17  ;;  %2026 = vst.msk [vmem:[%s3134_s15 + $0xf0] sm:$0xff] %vm688_vm2, %v1585_v17  ;;  %v1588_v36 = vadd.f32 %v2298_v50, %v1319_v9  ;;  %v1314_v21 = vadd.f32 %v1313_v28, %v3190_v56 }
 0x20b   : > { %v1645_v63 = vadd.f32 %v1644_v34, %v1643_v54  ;;  %v1746_v45 = vadd.f32 %v1745_v3, %v1744_v14  ;;  %v1749_v19 = vsel %vm688_vm2, %v1689_v47, 0.0 }
 0x20c   : > { %v1747_v55 = vsel %vm688_vm2, %v1688_v4, 0.0  ;;  %2029 = vst.msk [vmem:[%s3134_s15 + $0x108] sm:$0xff] %vm688_vm2, %v1588_v36  ;;  %v1587_v23 = vadd.f32 %v1548_v11, %v1314_v21  ;;  %v1691_v44 = vmul.f32 %v1588_v36, %v1588_v36  ;;  %v1650_v49 = vsel %vm688_vm2, %v1588_v36, 0.0 }
 0x20d   : > { %v1748_v22 = vadd.f32 %v1747_v55, %v1746_v45  ;;  %v1647_v25 = vadd.f32 %v1646_v60, %v1645_v63 }
 0x20e   : > { %v1648_v30 = vsel %vm688_vm2, %v1587_v23, 0.0  ;;  %v1690_v2 = vmul.f32 %v1587_v23, %v1587_v23  ;;  %2028 = vst.msk [vmem:[%s3134_s15 + $0x100] sm:$0xff] %vm688_vm2, %v1587_v23  ;;  %v1753_v7 = vsel %vm688_vm2, %v1691_v44, 0.0 }
 0x20f   : > { %v1649_v56 = vadd.f32 %v1648_v30, %v1647_v25  ;;  %v1750_v8 = vadd.f32 %v1749_v19, %v1748_v22 }
 0x210   : > { %v1751_v51 = vsel %vm688_vm2, %v1690_v2, 0.0 }
 0x211   : > { %v1651_v43 = vadd.f32 %v1650_v49, %v1649_v56  ;;  %v1752_v1 = vadd.f32 %v1751_v51, %v1750_v8 }
 0x213   : > { %v1652_v31 = vrot.slane %v1651_v43, 4  ;;  %v1754_v13 = vadd.f32 %v1753_v7, %v1752_v1 }
 0x215   : > { %v1653_v27 = vadd.f32 %v1652_v31, %v1651_v43  ;;  %v1755_v10 = vrot.slane %v1754_v13, 4 }
 0x217   : > { %v1654_v33 = vrot.slane %v1653_v27, 2  ;;  %v1756_v15 = vadd.f32 %v1755_v10, %v1754_v13 }
 0x219   : > { %v1655_v35 = vadd.f32 %v1654_v33, %v1653_v27  ;;  %v1757_v32 = vrot.slane %v1756_v15, 2 }
 0x21b   : > { %v1656_v29 = vrot.slane %v1655_v35, 1  ;;  %v1758_v38 = vadd.f32 %v1757_v32, %v1756_v15 }
 0x21d   : > { %v1657_v24 = vadd.f32 %v1656_v29, %v1655_v35  ;;  %v1759_v46 = vrot.slane %v1758_v38, 1 }
 0x21f   : > { %1659 = vst.msk [vmem:[%s181_s19] sm:$0x1] %vm1658_vm5, %v1657_v24  ;;  %v1760_v18 = vadd.f32 %v1759_v46, %v1758_v38 }
 0x221   : > { %1761 = vst.msk [vmem:[%s181_s19 + $0x1] sm:$0x1] %vm1658_vm5, %v1760_v18 }
 0x222 PF: > { %s14_s12 = sadd.s32 1, %s2323_s12  }
 0x223   : > { %p11_p4 = scmp.ge.s32.totalorder %s14_s12, 4  }
 0x225   :  { %13 = sbr.rel (!%p11_p4) target bundleno = 1 (0x1), region = 74 }

// kernel: basic_block_pallas.4
= control target key start
LH: loop header
LB: loop body
LE: loop exit
PB: predicated region body
PF: predicated region fallthrough
CT: control target
= control target key end

     0   :  { %s2554_s18 = smov 0   ;;  %s3676_s0 = inlined_call_operand.vmem [shape: f32[2,18,16,8], index: 0, kind: input, shape index: {}]   ;;  %s3677_s1 = inlined_call_operand.vmem [shape: f32[1,8], index: 1, kind: input, shape index: {}]   ;;  %s3678_s2 = inlined_call_operand.vmem [shape: f32[1,8], index: 2, kind: input, shape index: {}]   ;;  %s3679_s3 = inlined_call_operand.vmem [shape: f32[3,24,8], index: 3, kind: input, shape index: {}]   ;;  %s3680_s4 = inlined_call_operand.vmem [shape: f32[2,16,16,8], index: 4, kind: output, shape index: {0}]   ;;  %s3681_s5 = inlined_call_operand.vmem [shape: f32[2,2,8], index: 5, kind: output, shape index: {1}]  }
   0x1 LB: > { %s2092_s19 = sadd.s32 4294967295, %s2519_s18   ;;  %p2096_p0 = scmp.ge.s32.totalorder %s2519_s18, 1  ;;  %s2519_s18 = sphi %s2554_s18, %s16_s18  }
   0x2   : > { %p190_p1 = scmp.lt.s32.totalorder %s2519_s18, 3 }
   0x4   : > { %p191_p2 = pnand %p2096_p0, %p190_p1 }
   0x5   : > { %p222_p3 = scmp.lt.s32.totalorder (!%p191_p2), %s2092_s19, 1  ;;  %s2521_s28 = smov (!%p191_p2), 8  }
   0x6   : > { %194 = sbr.rel (%p191_p2) target bundleno = 549 (0x225), region = 36  ;;  %s2522_s8 = smov (!%p191_p2), 16  }
   0xb   : > { %s3683_s19 = smov (!%p222_p3, %s2092_s19), 1  ;;  %v2568_v0 = vld [vmem:[%s3677_s1] ss:$0 sm:$0xff]  ;;  %vm575_vm0 = vcmask 1046528   ;;  %v2105_v30 = vld [vmem:[%s3679_s3 + $0x28] sm:$0xff]  ;;  %v2103_v40 = vld [vmem:[%s3679_s3 + $0x18] sm:$0xff] }
   0xc   : > { %s2481_s20 = smul.u32 288, %s3683_s19  ;;  %v2578_v1 = vld [vmem:[%s3678_s2] ss:$0 sm:$0xff]  ;;  %2313 = vmatprep.subr.mxu0 %v2105_v30  ;;  %2475 = vmatprep.subr.mxu1 %v2105_v30  ;;  %vm466_vm1 = vcmask 1040384   ;;  %vm900_vm2 = vcmask 64512   ;;  %vm937_vm3 = vcmask 130048  }
   0xd   : > { %2314 = vmatpush3.msra.mxu0 %v2105_v30  ;;  %v2104_v36 = vld [vmem:[%s3679_s3 + $0x20] sm:$0xff]  ;;  %2478 = vmatpush3.msra.mxu1 %v2105_v30  ;;  %vm981_vm4 = vcmask 195584   ;;  %s2100_s29 = sshll.u32 %s3683_s19, 1  ;;  %vm1870_vm5 = vcmask 57344  }
   0xe   : > { %s2573_s25 = scalar_lea.vmem %s3676_s0, %s2481_s20  ;;  %2315 = vmatprep.subr.mxu0 %v2104_v36  ;;  %2476 = vmatprep.subr.mxu1 %v2104_v36  ;;  %s235_s7 = scalar_lea.vmem %s3681_s5, %s2100_s29 }
   0xf   : > { %v254_v2 = vld [vmem:[%s2573_s25 + $0x90] sm:$0xff]  ;;  %v255_v4 = vld [vmem:[%s2573_s25 + $0x98] sm:$0xff]  ;;  %v256_v9 = vld [vmem:[%s2573_s25 + $0xa0] sm:$0xff]  ;;  %2316 = vmatpush3.msra.mxu0 %v2104_v36  ;;  %2479 = vmatpush3.msra.mxu1 %v2104_v36 }
  0x10   : > { %v238_v3 = vld [vmem:[%s2573_s25 + $0x10] sm:$0xff]  ;;  %v297_v5 = vmul.f32 %v2568_v0, %v254_v2  ;;  %v298_v7 = vmul.f32 %v2568_v0, %v255_v4  ;;  %v239_v8 = vld [vmem:[%s2573_s25 + $0x18] sm:$0xff]  ;;  %v299_v14 = vmul.f32 %v2568_v0, %v256_v9  ;;  %v257_v15 = vld [vmem:[%s2573_s25 + $0xa8] sm:$0xff]  ;;  %2317 = vmatprep.subr.mxu0 %v2103_v40  ;;  %2477 = vmatprep.subr.mxu1 %v2103_v40 }
  0x11   : > { %v281_v6 = vmul.f32 %v2568_v0, %v238_v3  ;;  %v282_v10 = vmul.f32 %v2568_v0, %v239_v8  ;;  %v300_v20 = vmul.f32 %v2568_v0, %v257_v15  ;;  %v241_v21 = vld [vmem:[%s2573_s25 + $0x28] sm:$0xff]  ;;  %v240_v24 = vld [vmem:[%s2573_s25 + $0x20] sm:$0xff]  ;;  %v258_v34 = vld [vmem:[%s2573_s25 + $0xb0] sm:$0xff]  ;;  %2318 = vmatpush3.msra.mxu0 %v2103_v40  ;;  %2480 = vmatpush3.msra.mxu1 %v2103_v40 }
  0x12   : > { %v340_v11 = vadd.f32 %v2578_v1, %v297_v5  ;;  %v341_v13 = vadd.f32 %v2578_v1, %v298_v7  ;;  %v342_v23 = vadd.f32 %v2578_v1, %v299_v14  ;;  %v284_v26 = vmul.f32 %v2568_v0, %v241_v21  ;;  %v259_v45 = vld [vmem:[%s2573_s25 + $0xb8] sm:$0xff]  ;;  %v242_v47 = vld [vmem:[%s2573_s25 + $0x30] sm:$0xff]  ;;  %v264_v54 = vld [vmem:[%s2573_s25 + $0xe0] sm:$0xff] }
  0x13   : > { %v324_v12 = vadd.f32 %v2578_v1, %v281_v6  ;;  %v325_v16 = vadd.f32 %v2578_v1, %v282_v10  ;;  %v343_v27 = vadd.f32 %v2578_v1, %v300_v20  ;;  %v283_v28 = vmul.f32 %v2568_v0, %v240_v24  ;;  %v263_v49 = vld [vmem:[%s2573_s25 + $0xd8] sm:$0xff]  ;;  %v246_v50 = vld [vmem:[%s2573_s25 + $0x50] sm:$0xff]  ;;  %v265_v55 = vld [vmem:[%s2573_s25 + $0xe8] sm:$0xff] }
  0x14   : > { %v2595_v17 = vmax.f32 %v340_v11, 0.0  ;;  %v2599_v19 = vmax.f32 %v341_v13, 0.0  ;;  %v2619_v29 = vmax.f32 %v342_v23, 0.0  ;;  %v327_v35 = vadd.f32 %v2578_v1, %v284_v26  ;;  %v247_v51 = vld [vmem:[%s2573_s25 + $0x58] sm:$0xff]  ;;  %v248_v7 = vld [vmem:[%s2573_s25 + $0x60] sm:$0xff]  ;;  %v249_v8 = vld [vmem:[%s2573_s25 + $0x68] sm:$0xff] }
  0x15   : > { %v2597_v18 = vmax.f32 %v324_v12, 0.0  ;;  %v2607_v22 = vmax.f32 %v325_v16, 0.0  ;;  %v2632_v37 = vmax.f32 %v343_v27, 0.0  ;;  %v326_v38 = vadd.f32 %v2578_v1, %v283_v28  ;;  %v243_v60 = vld [vmem:[%s2573_s25 + $0x38] sm:$0xff]  ;;  %v266_v9 = vld [vmem:[%s2573_s25 + $0xf0] sm:$0xff] }
  0x16   : > { %702 = vrot.lane.b32.xlu0 %v2595_v17, %s2521_s28  ;;  %v604_v25 = vrot.slane %v2599_v19, 1  ;;  %v301_v39 = vmul.f32 %v2568_v0, %v258_v34  ;;  %v603_v42 = vrot.slane %v2595_v17, 1  ;;  %v606_v43 = vrot.slane %v2619_v29, 1  ;;  %v267_v40 = vld [vmem:[%s2573_s25 + $0xf8] sm:$0xff] }
  0x17   : > { %670 = vrot.lane.b32.xlu1 %v2597_v18, %s2521_s28  ;;  %v579_v32 = vrot.slane %v2597_v18, 1  ;;  %v580_v33 = vrot.slane %v2607_v22, 1  ;;  %v607_v44 = vrot.slane %v2632_v37, 1  ;;  %v2647_v46 = vmax.f32 %v327_v35, 0.0 }
  0x18   : > { %v657_v31 = vsel %vm575_vm0, %v604_v25, 0.0  ;;  %v2650_v48 = vmax.f32 %v326_v38, 0.0  ;;  %v344_v52 = vadd.f32 %v2578_v1, %v301_v39  ;;  %v302_v53 = vmul.f32 %v2568_v0, %v259_v45 }
  0x19   : > { %v581_v41 = vsel %vm575_vm0, %v579_v32, %v580_v33  ;;  %v605_v56 = vsel %vm575_vm0, %v603_v42, %v604_v25  ;;  %v649_v57 = vsel %vm575_vm0, %v580_v33, 0.0  ;;  %v608_v58 = vsel %vm575_vm0, %v606_v43, %v607_v44 }
  0x1a   : > { %704 = vrot.lane.b32.xlu0 %v2599_v19, %s2521_s28  ;;  %v582_v59 = vrot.slane %v2650_v48, 1  ;;  %v658_v61 = vsel %vm575_vm0, %v607_v44, 0.0  ;;  %v583_v62 = vrot.slane %v2647_v46, 1  ;;  %v2670_v63 = vmul.f32 %v2568_v0, %v242_v47  ;;  %v251_v47 = vld [vmem:[%s2573_s25 + $0x78] sm:$0xff] }
  0x1b   : > { %672 = vrot.lane.b32.xlu1 %v2607_v22, %s2521_s28  ;;  %v306_v2 = vmul.f32 %v2568_v0, %v263_v49  ;;  %v289_v3 = vmul.f32 %v2568_v0, %v246_v50  ;;  %v290_v4 = vmul.f32 %v2568_v0, %v247_v51  ;;  %v307_v5 = vmul.f32 %v2568_v0, %v264_v54  ;;  %v268_v49 = vld [vmem:[%s2573_s25 + $0x100] sm:$0xff]  ;;  %v269_v50 = vld [vmem:[%s2573_s25 + $0x108] sm:$0xff] }
  0x1c   : > { %v308_v6 = vmul.f32 %v2568_v0, %v265_v55  ;;  %v2682_v10 = vmax.f32 %v344_v52, 0.0  ;;  %v345_v11 = vadd.f32 %v2578_v1, %v302_v53  ;;  %v286_v12 = vmul.f32 %v2568_v0, %v243_v60  ;;  %v260_v51 = vld [vmem:[%s2573_s25 + $0xc0] sm:$0xff] }
  0x1d   : > { %v349_v13 = vadd.f32 %v2578_v1, %v306_v2  ;;  %v332_v14 = vadd.f32 %v2578_v1, %v289_v3  ;;  %v333_v15 = vadd.f32 %v2578_v1, %v290_v4  ;;  %v350_v16 = vadd.f32 %v2578_v1, %v307_v5  ;;  %v252_v5 = vld [vmem:[%s2573_s25 + $0x80] sm:$0xff] }
  0x1e   : > { %830 = vrot.lane.b32.xlu0 %v657_v31, %s2522_s8  ;;  %v351_v20 = vadd.f32 %v2578_v1, %v308_v6  ;;  %v291_v23 = vmul.f32 %v2568_v0, %v248_v7  ;;  %v292_v24 = vmul.f32 %v2568_v0, %v249_v8  ;;  %v309_v25 = vmul.f32 %v2568_v0, %v266_v9  ;;  %v261_v6 = vld [vmem:[%s2573_s25 + $0xc8] sm:$0xff] }
  0x1f   : > { %706 = vrot.lane.b32.xlu1 %v2619_v29, %s2521_s28  ;;  %v2691_v21 = vmax.f32 %v349_v13, 0.0  ;;  %v2696_v26 = vmax.f32 %v332_v14, 0.0  ;;  %v2698_v27 = vmax.f32 %v333_v15, 0.0  ;;  %v2700_v28 = vmax.f32 %v350_v16, 0.0 }
  0x20   : > { %v2702_v30 = vmax.f32 %v351_v20, 0.0  ;;  %v334_v32 = vadd.f32 %v2578_v1, %v291_v23  ;;  %v335_v33 = vadd.f32 %v2578_v1, %v292_v24  ;;  %v2711_v34 = vadd.f32 %v2578_v1, %v309_v25  ;;  %v245_v24 = vld [vmem:[%s2573_s25 + $0x48] sm:$0xff] }
  0x21   : > { %v616_v31 = vrot.slane %v2691_v21, 1  ;;  %v591_v35 = vrot.slane %v2696_v26, 1  ;;  %v592_v36 = vrot.slane %v2698_v27, 1  ;;  %v618_v38 = vrot.slane %v2700_v28, 1 }
  0x22   : > { %796 = vrot.lane.b32.xlu0 %v581_v41, %s2522_s8  ;;  %v619_v39 = vrot.slane %v2702_v30, 1  ;;  %v250_v41 = vld [vmem:[%s2573_s25 + $0x70] sm:$0xff]  ;;  %v584_v42 = vsel %vm575_vm0, %v582_v59, %v583_v62  ;;  %v2727_v44 = vmax.f32 %v334_v32, 0.0  ;;  %v2729_v45 = vmax.f32 %v335_v33, 0.0 }
  0x23   : > { %708 = vrot.lane.b32.xlu1 %v2632_v37, %s2521_s28  ;;  %v2725_v43 = vsel %vm575_vm0, %v616_v31, 0.0  ;;  %v2736_v52 = vsel %vm575_vm0, %v591_v35, %v592_v36  ;;  %v2739_v53 = vsel %vm575_vm0, %v592_v36, 0.0  ;;  %v310_v59 = vmul.f32 %v2568_v0, %v267_v40  ;;  %v253_v40 = vld [vmem:[%s2573_s25 + $0x88] sm:$0xff] }
  0x24   : > { %v2742_v54 = vsel %vm575_vm0, %v618_v38, %v619_v39  ;;  %v2745_v55 = vsel %vm575_vm0, %v619_v39, 0.0  ;;  %v293_v60 = vmul.f32 %v2568_v0, %v250_v41  ;;  %v294_v2 = vmul.f32 %v2568_v0, %v251_v47 }
  0x25   : > { %v311_v3 = vmul.f32 %v2568_v0, %v268_v49  ;;  %v312_v4 = vmul.f32 %v2568_v0, %v269_v50  ;;  %v2766_v8 = vadd.f32 %v2578_v1, %v310_v59  ;;  %v328_v20 = vadd.f32 %v2578_v1, %v2670_v63 }
  0x26   : > { %798 = vrot.lane.b32.xlu0 %v649_v57, %s2522_s8  ;;  %v594_v57 = vrot.slane %v2727_v44, 1  ;;  %v2773_v13 = vadd.f32 %v2578_v1, %v293_v60  ;;  %v2776_v14 = vadd.f32 %v2578_v1, %v294_v2  ;;  %v329_v23 = vadd.f32 %v2578_v1, %v286_v12 }
  0x27   : > { %828 = vrot.lane.b32.xlu1 %v605_v56, %s2522_s8  ;;  %v2750_v56 = vmax.f32 %v345_v11, 0.0  ;;  %v244_v11 = vld [vmem:[%s2573_s25 + $0x40] sm:$0xff]  ;;  %v2779_v15 = vadd.f32 %v2578_v1, %v311_v3  ;;  %v2782_v16 = vadd.f32 %v2578_v1, %v312_v4  ;;  %v295_v25 = vmul.f32 %v2568_v0, %v252_v5 }
  0x28   : > { %v650_v32 = vsel %vm575_vm0, %v583_v62, 0.0  ;;  %v609_v33 = vrot.slane %v2682_v10, 1  ;;  %v304_v36 = vmul.f32 %v2568_v0, %v261_v6  ;;  %v287_v63 = vmul.f32 %v2568_v0, %v244_v11 }
  0x29   : > { %v610_v35 = vrot.slane %v2750_v56, 1  ;;  %v2801_v12 = vadd.f32 %v2578_v1, %v295_v25  ;;  %v288_v39 = vmul.f32 %v2568_v0, %v245_v24  ;;  %v2808_v62 = vmax.f32 %v328_v20, 0.0 }
  0x2a   : > { %832 = vrot.lane.b32.xlu0 %v608_v58, %s2522_s8  ;;  %v595_v58 = vrot.slane %v2729_v45, 1  ;;  %v365_v41 = vmax.f32 %v329_v23, 0.0  ;;  %v495_v47 = vrot.slane %v2599_v19, 7  ;;  %v347_v50 = vadd.f32 %v2578_v1, %v304_v36 }
  0x2b   : > { %674 = vrot.lane.b32.xlu1 %v2650_v48, %s2521_s28  ;;  %v611_v49 = vsel %vm575_vm0, %v609_v33, %v610_v35  ;;  %v330_v60 = vadd.f32 %v2578_v1, %v287_v63  ;;  %v296_v19 = vmul.f32 %v2568_v0, %v253_v40  ;;  %v331_v3 = vadd.f32 %v2578_v1, %v288_v39 }
  0x2c   : > { %v2763_v7 = vsel %vm575_vm0, %v594_v57, %v595_v58  ;;  %v2769_v9 = vsel %vm575_vm0, %v595_v58, 0.0  ;;  %v470_v57 = vrot.slane %v2597_v18, 7  ;;  %v471_v58 = vrot.slane %v2607_v22, 7 }
  0x2d   : > { %v497_v22 = vrot.slane %v2619_v29, 7  ;;  %v498_v5 = vrot.slane %v2632_v37, 7  ;;  %v586_v6 = vrot.slane %v365_v41, 1  ;;  %v2840_v20 = vadd.f32 %v2578_v1, %v296_v19  ;;  %v975_v29 = vld [vmem:[%s3679_s3 + $0x8] sm:$0xff] }
  0x2e   : > { %834 = vrot.lane.b32.xlu0 %v658_v61, %s2522_s8  ;;  %v303_v61 = vmul.f32 %v2568_v0, %v260_v51  ;;  %v262_v51 = vld [vmem:[%s2573_s25 + $0xd0] sm:$0xff]  ;;  %v2830_v4 = vsel %vm466_vm1, %v470_v57, %v471_v58  ;;  %v659_v23 = vsel %vm575_vm0, %v610_v35, 0.0  ;;  %v473_v37 = vrot.slane %v2650_v48, 7  ;;  %s2207_s25 = sshll.u32 %s3683_s19, 8 }
  0x2f   : > { %676 = vrot.lane.b32.xlu1 %v2647_v46, %s2521_s28  ;;  %v305_v11 = vmul.f32 %v2568_v0, %v262_v51  ;;  %v2846_v24 = vsel %vm466_vm1, %v497_v22, %v498_v5  ;;  %v474_v25 = vrot.slane %v2647_v46, 7  ;;  %v501_v33 = vrot.slane %v2750_v56, 7 }
  0x30   : > { %v346_v38 = vadd.f32 %v2578_v1, %v303_v61  ;;  %v585_v61 = vrot.slane %v2808_v62, 1  ;;  %v476_v0 = vrot.slane %v2808_v62, 7  ;;  %v477_v36 = vrot.slane %v365_v41, 7 }
  0x31   : > { %v2853_v63 = vmax.f32 %v330_v60, 0.0  ;;  %v367_v35 = vmax.f32 %v331_v3, 0.0  ;;  %v2858_v39 = vsel %vm466_vm1, %v473_v37, %v474_v25  ;;  %v348_v51 = vadd.f32 %v2578_v1, %v305_v11 }
  0x32   : > { %800 = vrot.lane.b32.xlu0 %v584_v42, %s2522_s8  ;;  %v494_v42 = vrot.slane %v2595_v17, 7  ;;  %v2817_v59 = vmax.f32 %v346_v38, 0.0  ;;  %v383_v38 = vmax.f32 %v347_v50, 0.0  ;;  %v587_v46 = vsel %vm575_vm0, %v585_v61, %v586_v6 }
  0x33   : > { %710 = vrot.lane.b32.xlu1 %v2682_v10, %s2521_s28  ;;  %v2871_v40 = vsel %vm466_vm1, %v476_v0, %v477_v36  ;;  %v479_v50 = vrot.slane %v2853_v63, 7  ;;  %v651_v19 = vsel %vm575_vm0, %v586_v6, 0.0  ;;  %v2891_v5 = vmax.f32 %v348_v51, 0.0 }
  0x34   : > { %v2823_v2 = vsel %vm466_vm1, %v494_v42, %v495_v47  ;;  %v503_v47 = vrot.slane %v2817_v59, 7  ;;  %v612_v3 = vrot.slane %v2817_v59, 1  ;;  %v613_v1 = vrot.slane %v383_v38, 1 }
  0x35   : > { %v506_v61 = vrot.slane %v2891_v5, 7  ;;  %v507_v11 = vrot.slane %v2691_v21, 7  ;;  %v589_v36 = vrot.slane %v367_v35, 1  ;;  %v615_v51 = vrot.slane %v2891_v5, 1 }
  0x36   : > { %802 = vrot.lane.b32.xlu0 %v650_v32, %s2522_s8  ;;  %v500_v32 = vrot.slane %v2682_v10, 7  ;;  %v660_v6 = vsel %vm575_vm0, %v613_v1, 0.0  ;;  %v566_v18 = vsel %vm466_vm1, 0.0, %v494_v42  ;;  %v567_v42 = vsel %vm466_vm1, 0.0, %v497_v22 }
  0x37   : > { %712 = vrot.lane.b32.xlu1 %v2750_v56, %s2521_s28  ;;  %v2901_v25 = vsel %vm466_vm1, %v506_v61, %v507_v11 }
  0x38   : > { %v2866_v56 = vsel %vm466_vm1, %v500_v32, %v501_v33  ;;  %v588_v33 = vrot.slane %v2853_v63, 1 }
  0x3a   : > { %836 = vrot.lane.b32.xlu0 %v611_v49, %s2522_s8  ;;  %v504_v49 = vrot.slane %v383_v38, 7 }
  0x3b   : > { %678 = vrot.lane.b32.xlu1 %v2808_v62, %s2521_s28 }
  0x3c   : > { %v2879_v58 = vsel %vm466_vm1, %v503_v47, %v504_v49  ;;  %v590_v49 = vsel %vm575_vm0, %v588_v33, %v589_v36 }
  0x3e   : > { %838 = vrot.lane.b32.xlu0 %v659_v23, %s2522_s8  ;;  %v614_v23 = vsel %vm575_vm0, %v612_v3, %v613_v1  ;;  %v510_v3 = vrot.slane %v2702_v30, 7  ;;  %v617_v1 = vsel %vm575_vm0, %v615_v51, %v616_v31  ;;  %v486_v31 = vrot.slane %v2729_v45, 7 }
  0x3f   : > { %680 = vrot.lane.b32.xlu1 %v365_v41, %s2521_s28  ;;  %v480_v41 = vrot.slane %v367_v35, 7 }
  0x41   : > { %v2884_v60 = vsel %vm466_vm1, %v479_v50, %v480_v41 }
  0x42   : > { %804 = vrot.lane.b32.xlu0 %v587_v46, %s2522_s8  ;;  %v483_v46 = vrot.slane %v2698_v27, 7 }
  0x43   : > { %714 = vrot.lane.b32.xlu1 %v2817_v59, %s2521_s28 }
  0x46   : > { %806 = vrot.lane.b32.xlu0 %v651_v19, %s2522_s8  ;;  %v509_v19 = vrot.slane %v2700_v28, 7 }
  0x47   : > { %716 = vrot.lane.b32.xlu1 %v383_v38, %s2521_s28  ;;  %v482_v38 = vrot.slane %v2696_v26, 7 }
  0x48   : > { %v2934_v11 = vsel %vm466_vm1, %v509_v19, %v510_v3 }
  0x49   : > { %v2916_v41 = vsel %vm466_vm1, %v482_v38, %v483_v46 }
  0x4a   : > { %840 = vrot.lane.b32.xlu0 %v614_v23, %s2522_s8 }
  0x4b   : > { %682 = vrot.lane.b32.xlu1 %v2853_v63, %s2521_s28 }
  0x4e   : > { %842 = vrot.lane.b32.xlu0 %v660_v6, %s2522_s8 }
  0x4f   : > { %684 = vrot.lane.b32.xlu1 %v367_v35, %s2521_s28  ;;  %v652_v35 = vsel %vm575_vm0, %v589_v36, 0.0 }
  0x52   : > { %808 = vrot.lane.b32.xlu0 %v590_v49, %s2522_s8  ;;  %v3031_v49 = vmax.f32 %v2840_v20, 0.0 }
  0x53   : > { %718 = vrot.lane.b32.xlu1 %v2891_v5, %s2521_s28 }
  0x56   : > { %810 = vrot.lane.b32.xlu0 %v652_v35, %s2522_s8 }
  0x57   : > { %720 = vrot.lane.b32.xlu1 %v2691_v21, %s2521_s28  ;;  %v485_v21 = vrot.slane %v2727_v44, 7 }
  0x59   : > { %v2948_v23 = vsel %vm466_vm1, %v485_v21, %v486_v31  ;;  %v601_v31 = vrot.slane %v3031_v49, 1 }
  0x5a   : > { %844 = vrot.lane.b32.xlu0 %v617_v1, %s2522_s8 }
  0x5b   : > { %686 = vrot.lane.b32.xlu1 %v2696_v26, %s2521_s28 }
  0x5e   : > { %846 = vrot.lane.b32.xlu0 %v2725_v43, %s2522_s8  ;;  %v2978_v43 = vld [vmem:[%s3679_s3 + $0x40] sm:$0xff] }
  0x5f   : > { %688 = vrot.lane.b32.xlu1 %v2698_v27, %s2521_s28  ;;  %v2965_v27 = vld [vmem:[%s3679_s3 + $0x10] sm:$0xff]  ;;  %2421 = vmatprep.subr.mxu0 %v2978_v43 }
  0x60   : > { %2367 = vmatprep.subr.mxu1 %v2965_v27 }
  0x62   : > { %812 = vrot.lane.b32.xlu0 %v2736_v52, %s2522_s8  ;;  %v2981_v52 = vmax.f32 %v2766_v8, 0.0 }
  0x63   : > { %722 = vrot.lane.b32.xlu1 %v2700_v28, %s2521_s28 }
  0x66   : > { %814 = vrot.lane.b32.xlu0 %v2739_v53, %s2522_s8  ;;  %v2995_v53 = vmax.f32 %v2773_v13, 0.0 }
  0x67   : > { %724 = vrot.lane.b32.xlu1 %v2702_v30, %s2521_s28  ;;  %v2973_v30 = vmax.f32 %v2711_v34, 0.0  ;;  %v622_v34 = vrot.slane %v2981_v52, 1 }
  0x68   : > { %v597_v8 = vrot.slane %v2995_v53, 1 }
  0x6a   : > { %848 = vrot.lane.b32.xlu0 %v2742_v54, %s2522_s8 }
  0x6b   : > { %690 = vrot.lane.b32.xlu1 %v2727_v44, %s2521_s28 }
  0x6e   : > { %850 = vrot.lane.b32.xlu0 %v2745_v55, %s2522_s8  ;;  %v2999_v55 = vmax.f32 %v2776_v14, 0.0  ;;  %v3015_v14 = vmax.f32 %v2782_v16, 0.0 }
  0x6f   : > { %692 = vrot.lane.b32.xlu1 %v2729_v45, %s2521_s28  ;;  %v621_v45 = vrot.slane %v2973_v30, 1 }
  0x70   : > { %v598_v6 = vrot.slane %v2999_v55, 1  ;;  %v625_v46 = vrot.slane %v3015_v14, 1 }
  0x71   : > { %v623_v54 = vsel %vm575_vm0, %v621_v45, %v622_v34 }
  0x72   : > { %816 = vrot.lane.b32.xlu0 %v2763_v7, %s2522_s8  ;;  %v663_v7 = vsel %vm575_vm0, %v622_v34, 0.0  ;;  %v599_v13 = vsel %vm575_vm0, %v597_v8, %v598_v6  ;;  %v655_v33 = vsel %vm575_vm0, %v598_v6, 0.0  ;;  %v664_v3 = vsel %vm575_vm0, %v625_v46, 0.0 }
  0x73   : > { %726 = vrot.lane.b32.xlu1 %v2973_v30, %s2521_s28 }
  0x76   : > { %818 = vrot.lane.b32.xlu0 %v2769_v9, %s2522_s8  ;;  %v3011_v9 = vmax.f32 %v2779_v15, 0.0  ;;  %v3027_v15 = vmax.f32 %v2801_v12, 0.0  ;;  %v2523_v12 = vmov 0.0  }
  0x77   : > { %728 = vrot.lane.b32.xlu1 %v2981_v52, %s2521_s28  ;;  %v576_v45 = vrot.slane %v2523_v12, 1 }
  0x78   : > { %v624_v36 = vrot.slane %v3011_v9, 1  ;;  %v600_v1 = vrot.slane %v3027_v15, 1 }
  0x7a   : > { %852 = vrot.lane.b32.xlu0 %v623_v54, %s2522_s8  ;;  %v626_v16 = vsel %vm575_vm0, %v624_v36, %v625_v46  ;;  %v602_v20 = vsel %vm575_vm0, %v600_v1, %v601_v31  ;;  %v656_v36 = vsel %vm575_vm0, %v601_v31, 0.0 }
  0x7b   : > { %694 = vrot.lane.b32.xlu1 %v2995_v53, %s2521_s28 }
  0x7e   : > { %854 = vrot.lane.b32.xlu0 %v663_v7, %s2522_s8  ;;  %v648_v7 = vsel %vm575_vm0, %v576_v45, 0.0 }
  0x7f   : > { %696 = vrot.lane.b32.xlu1 %v2999_v55, %s2521_s28 }
  0x82   : > { %820 = vrot.lane.b32.xlu0 %v599_v13, %s2522_s8  ;;  %v558_v13 = vsel %vm466_vm1, 0.0, %v470_v57 }
  0x83   : > { %730 = vrot.lane.b32.xlu1 %v3011_v9, %s2521_s28 }
  0x86   : > { %822 = vrot.lane.b32.xlu0 %v655_v33, %s2522_s8  ;;  %v2498_v33 = vpack.i.bf16 %v648_v7, %v576_v45 }
  0x87   : > { %732 = vrot.lane.b32.xlu1 %v3015_v14, %s2521_s28 }
  0x88   : > { %v703_v35 = vpop.permute.xlu0 %702 }
  0x89   : > { %v671_v51 = vpop.permute.xlu1 %670 }
  0x8a   : > { %856 = vrot.lane.b32.xlu0 %v626_v16, %s2522_s8  ;;  %v903_v46 = vsel %vm900_vm2, %v558_v13, %v671_v51  ;;  %v919_v51 = vsel %vm900_vm2, %v566_v18, %v703_v35 }
  0x8b   : > { %698 = vrot.lane.b32.xlu1 %v3027_v15, %s2521_s28 }
  0x8c   : > { %v705_v34 = vpop.permute.xlu0 %704 }
  0x8d   : > { %v673_v54 = vpop.permute.xlu1 %672  ;;  %v920_v17 = vsel %vm900_vm2, %v2823_v2, %v705_v34  ;;  %v2171_v34 = vld [vmem:[%s3679_s3 + $0x38] sm:$0xff] }
  0x8e   : > { %858 = vrot.lane.b32.xlu0 %v664_v3, %s2522_s8  ;;  %v904_v1 = vsel %vm900_vm2, %v2830_v4, %v673_v54  ;;  %v974_v54 = vld [vmem:[%s3679_s3] sm:$0xff] }
  0x8f   : > { %700 = vrot.lane.b32.xlu1 %v3031_v49, %s2521_s28 }
  0x90   : > { %v831_v8 = vpop.permute.xlu0 %830 }
  0x91   : > { %v707_v6 = vpop.permute.xlu1 %706  ;;  %v3078_v35 = vsel %vm937_vm3, %v920_v17, %v831_v8 }
  0x92   : > { %824 = vrot.lane.b32.xlu0 %v602_v20, %s2522_s8  ;;  %v921_v2 = vsel %vm900_vm2, %v567_v42, %v707_v6 }
  0x93   : > { %2494 = vrot.lane.b32.xlu1 %v2523_v12, %s2521_s28 }
  0x94   : > { %v797_v3 = vpop.permute.xlu0 %796 }
  0x95   : > { %v709_v16 = vpop.permute.xlu1 %708  ;;  %v3057_v57 = vsel %vm937_vm3, %v903_v46, %v797_v3 }
  0x96   : > { %826 = vrot.lane.b32.xlu0 %v656_v36, %s2522_s8  ;;  %2319 = vmatprep.mubr.msk.f32.mxu0 %vm981_vm4, %v3057_v57  ;;  %v922_v6 = vsel %vm900_vm2, %v2846_v24, %v709_v16 }
  0x97   : > { %2499 = vrot.lane.b32.xlu1 %v2498_v33, %s2522_s8 }
  0x98   : > { %v799_v45 = vpop.permute.xlu0 %798 }
  0x99   : > { %v829_v31 = vpop.permute.xlu1 %828  ;;  %v3072_v20 = vsel %vm937_vm3, %v904_v1, %v799_v45 }
  0x9a   : > { %v3075_v7 = vsel %vm937_vm3, %v919_v51, %v829_v31  ;;  %2320 = vmatmul.mubr.msk.f32.vlgmr.msra.gmra.mxu0 %vm981_vm4, %v3072_v20  ;;  %2504 = vrot.lane.b32.xlu0 %v2523_v12, %s2521_s28  ;;  %v568_v51 = vsel %vm466_vm1, 0.0, %v500_v32  ;;  %s3513_s28 = scalar_lea.vmem %s3680_s4, %s2207_s25 }
  0x9b   : > { %2343 = vmatprep.mubr.msk.f32.mxu1 %vm981_vm4, %v3075_v7  ;;  %2509 = vrot.lane.b32.xlu1 %v2498_v33, %s2522_s8 }
  0x9c   : > { %2344 = vmatmul.mubr.msk.f32.vlgmr.msra.gmra.mxu1 %vm981_vm4, %v3078_v35  ;;  %v833_v22 = vpop.permute.xlu0 %832  ;;  %2422 = vmatpush3.msra.mxu0 %v2978_v43  ;;  %v559_v43 = vsel %vm466_vm1, 0.0, %v473_v37 }
  0x9d   : > { %v675_v4 = vpop.permute.xlu1 %674  ;;  %2368 = vmatpush3.msra.mxu1 %v2965_v27  ;;  %v3101_v8 = vsel %vm937_vm3, %v921_v2, %v833_v22  ;;  %v2170_v27 = vld [vmem:[%s3679_s3 + $0x30] sm:$0xff]  ;;  %2423 = vmatprep.subr.mxu0 %v2171_v34 }
  0x9e   : > { %2369 = vmatprep.subr.mxu1 %v975_v29  ;;  %2346 = vmatprep.mubr.msk.f32.mxu1 %vm981_vm4, %v3101_v8  ;;  %v905_v46 = vsel %vm900_vm2, %v559_v43, %v675_v4 }
  0x9f   : > { %2370 = vmatpush3.msra.mxu1 %v975_v29  ;;  %2424 = vmatpush3.msra.mxu0 %v2171_v34  ;;  %v560_v29 = vsel %vm466_vm1, 0.0, %v476_v0 }
  0xa0   : > { %2371 = vmatprep.subr.mxu1 %v974_v54  ;;  %v835_v33 = vpop.permute.xlu0 %834  ;;  %2425 = vmatprep.subr.mxu0 %v2170_v27 }
  0xa1   : > { %v677_v13 = vpop.permute.xlu1 %676  ;;  %2372 = vmatpush3.msra.mxu1 %v974_v54  ;;  %v3115_v36 = vsel %vm937_vm3, %v922_v6, %v835_v33  ;;  %2426 = vmatpush3.msra.mxu0 %v2170_v27  ;;  %v569_v27 = vsel %vm466_vm1, 0.0, %v503_v47 }
  0xa2   : > { %2347 = vmatmul.mubr.msk.f32.gmra.mxu1 %vm981_vm4, %v3115_v36  ;;  %v906_v48 = vsel %vm900_vm2, %v2858_v39, %v677_v13 }
  0xa4   : > { %v801_v24 = vpop.permute.xlu0 %800 }
  0xa5   : > { %v711_v3 = vpop.permute.xlu1 %710  ;;  %v3121_v16 = vsel %vm937_vm3, %v905_v46, %v801_v24 }
  0xa6   : > { %2322 = vmatprep.mubr.msk.f32.mxu0 %vm981_vm4, %v3121_v16  ;;  %v923_v31 = vsel %vm900_vm2, %v568_v51, %v711_v3  ;;  %v561_v3 = vsel %vm466_vm1, 0.0, %v479_v50 }
  0xa8   : > { %v803_v18 = vpop.permute.xlu0 %802 }
  0xa9   : > { %v713_v37 = vpop.permute.xlu1 %712  ;;  %v3131_v1 = vsel %vm937_vm3, %v906_v48, %v803_v18 }
  0xaa   : > { %2323 = vmatmul.mubr.msk.f32.gmra.mxu0 %vm981_vm4, %v3131_v1  ;;  %v924_v10 = vsel %vm900_vm2, %v2866_v56, %v713_v37 }
  0xac   : > { %v837_v17 = vpop.permute.xlu0 %836 }
  0xad   : > { %v679_v45 = vpop.permute.xlu1 %678  ;;  %v3137_v42 = vsel %vm937_vm3, %v923_v31, %v837_v17  ;;  %v570_v31 = vsel %vm466_vm1, 0.0, %v506_v61 }
  0xae   : > { %2349 = vmatprep.mubr.msk.f32.mxu1 %vm981_vm4, %v3137_v42  ;;  %v907_v4 = vsel %vm900_vm2, %v560_v29, %v679_v45  ;;  %v562_v29 = vsel %vm466_vm1, 0.0, %v482_v38 }
  0xb0   : > { %v839_v39 = vpop.permute.xlu0 %838 }
  0xb1   : > { %v681_v32 = vpop.permute.xlu1 %680  ;;  %v3147_v2 = vsel %vm937_vm3, %v924_v10, %v839_v39 }
  0xb2   : > { %2350 = vmatmul.mubr.msk.f32.gmra.mxu1 %vm981_vm4, %v3147_v2  ;;  %v908_v62 = vsel %vm900_vm2, %v2871_v40, %v681_v32 }
  0xb4   : > { %v805_v34 = vpop.permute.xlu0 %804 }
  0xb5   : > { %v715_v22 = vpop.permute.xlu1 %714  ;;  %v3153_v54 = vsel %vm937_vm3, %v907_v4, %v805_v34 }
  0xb6   : > { %2325 = vmatprep.mubr.msk.f32.mxu0 %vm981_vm4, %v3153_v54  ;;  %v925_v13 = vsel %vm900_vm2, %v569_v27, %v715_v22 }
  0xb8   : > { %v807_v56 = vpop.permute.xlu0 %806 }
  0xb9   : > { %v717_v0 = vpop.permute.xlu1 %716  ;;  %v3163_v6 = vsel %vm937_vm3, %v908_v62, %v807_v56  ;;  %v571_v56 = vsel %vm466_vm1, 0.0, %v509_v19 }
  0xba   : > { %2326 = vmatmul.mubr.msk.f32.gmra.mxu0 %vm981_vm4, %v3163_v6  ;;  %v926_v59 = vsel %vm900_vm2, %v2879_v58, %v717_v0 }
  0xbc   : > { %v841_v43 = vpop.permute.xlu0 %840 }
  0xbd   : > { %v683_v33 = vpop.permute.xlu1 %682  ;;  %v3169_v46 = vsel %vm937_vm3, %v925_v13, %v841_v43 }
  0xbe   : > { %2352 = vmatprep.mubr.msk.f32.mxu1 %vm981_vm4, %v3169_v46  ;;  %v909_v48 = vsel %vm900_vm2, %v561_v3, %v683_v33 }
  0xc0   : > { %v843_v47 = vpop.permute.xlu0 %842 }
  0xc1   : > { %v685_v40 = vpop.permute.xlu1 %684  ;;  %v3179_v24 = vsel %vm937_vm3, %v926_v59, %v843_v47 }
  0xc2   : > { %2353 = vmatmul.mubr.msk.f32.gmra.mxu1 %vm981_vm4, %v3179_v24  ;;  %v910_v63 = vsel %vm900_vm2, %v2884_v60, %v685_v40  ;;  %v563_v40 = vsel %vm466_vm1, 0.0, %v485_v21 }
  0xc4   : > { %v809_v18 = vpop.permute.xlu0 %808 }
  0xc5   : > { %v719_v37 = vpop.permute.xlu1 %718  ;;  %v3185_v51 = vsel %vm937_vm3, %v909_v48, %v809_v18  ;;  %v512_v18 = vrot.slane %v2973_v30, 7 }
  0xc6   : > { %2328 = vmatprep.mubr.msk.f32.mxu0 %vm981_vm4, %v3185_v51  ;;  %v927_v17 = vsel %vm900_vm2, %v570_v31, %v719_v37 }
  0xc8   : > { %v811_v58 = vpop.permute.xlu0 %810 }
  0xc9   : > { %v721_v50 = vpop.permute.xlu1 %720  ;;  %v3195_v45 = vsel %vm937_vm3, %v910_v63, %v811_v58  ;;  %v513_v58 = vrot.slane %v2981_v52, 7 }
  0xca   : > { %2329 = vmatmul.mubr.msk.f32.gmra.mxu0 %vm981_vm4, %v3195_v45  ;;  %v928_v60 = vsel %vm900_vm2, %v2901_v25, %v721_v50  ;;  %v572_v50 = vsel %vm466_vm1, 0.0, %v512_v18 }
  0xcc   : > { %v845_v32 = vpop.permute.xlu0 %844 }
  0xcd   : > { %v687_v10 = vpop.permute.xlu1 %686  ;;  %v3201_v39 = vsel %vm937_vm3, %v927_v17, %v845_v32  ;;  %v514_v32 = vsel %vm466_vm1, %v512_v18, %v513_v58 }
  0xce   : > { %2355 = vmatprep.mubr.msk.f32.mxu1 %vm981_vm4, %v3201_v39  ;;  %v911_v22 = vsel %vm900_vm2, %v562_v29, %v687_v10 }
  0xd0   : > { %v847_v61 = vpop.permute.xlu0 %846 }
  0xd1   : > { %v689_v5 = vpop.permute.xlu1 %688  ;;  %v3211_v4 = vsel %vm937_vm3, %v928_v60, %v847_v61 }
  0xd2   : > { %2356 = vmatmul.mubr.msk.f32.gmra.mxu1 %vm981_vm4, %v3211_v4  ;;  %v912_v26 = vsel %vm900_vm2, %v2916_v41, %v689_v5 }
  0xd4   : > { %v813_v62 = vpop.permute.xlu0 %812 }
  0xd5   : > { %v723_v34 = vpop.permute.xlu1 %722  ;;  %v3217_v0 = vsel %vm937_vm3, %v911_v22, %v813_v62  ;;  %v489_v22 = vrot.slane %v2999_v55, 7 }
  0xd6   : > { %2331 = vmatprep.mubr.msk.f32.mxu0 %vm981_vm4, %v3217_v0  ;;  %v929_v13 = vsel %vm900_vm2, %v571_v56, %v723_v34 }
  0xd8   : > { %v815_v38 = vpop.permute.xlu0 %814 }
  0xd9   : > { %v725_v25 = vpop.permute.xlu1 %724  ;;  %v3227_v27 = vsel %vm937_vm3, %v912_v26, %v815_v38  ;;  %v515_v38 = vrot.slane %v3011_v9, 7 }
  0xda   : > { %2332 = vmatmul.mubr.msk.f32.gmra.mxu0 %vm981_vm4, %v3227_v27  ;;  %v930_v28 = vsel %vm900_vm2, %v2934_v11, %v725_v25 }
  0xdc   : > { %v849_v43 = vpop.permute.xlu0 %848 }
  0xdd   : > { %v691_v33 = vpop.permute.xlu1 %690  ;;  %v3233_v59 = vsel %vm937_vm3, %v929_v13, %v849_v43  ;;  %v573_v43 = vsel %vm466_vm1, 0.0, %v515_v38 }
  0xde   : > { %2358 = vmatprep.mubr.msk.f32.mxu1 %vm981_vm4, %v3233_v59  ;;  %v913_v3 = vsel %vm900_vm2, %v563_v40, %v691_v33 }
  0xe0   : > { %v851_v19 = vpop.permute.xlu0 %850 }
  0xe1   : > { %v693_v41 = vpop.permute.xlu1 %692  ;;  %v3243_v47 = vsel %vm937_vm3, %v930_v28, %v851_v19  ;;  %v516_v28 = vrot.slane %v3015_v14, 7 }
  0xe2   : > { %2359 = vmatmul.mubr.msk.f32.gmra.mxu1 %vm981_vm4, %v3243_v47  ;;  %v914_v44 = vsel %vm900_vm2, %v2948_v23, %v693_v41  ;;  %v488_v23 = vrot.slane %v2995_v53, 7 }
  0xe4   : > { %v817_v37 = vpop.permute.xlu0 %816  ;;  %v564_v29 = vsel %vm466_vm1, 0.0, %v488_v23  ;;  %v490_v25 = vsel %vm466_vm1, %v488_v23, %v489_v22 }
  0xe5   : > { %v727_v48 = vpop.permute.xlu1 %726  ;;  %v3250_v11 = vsel %vm937_vm3, %v913_v3, %v817_v37  ;;  %v517_v3 = vsel %vm466_vm1, %v515_v38, %v516_v28 }
  0xe6   : > { %2334 = vmatprep.mubr.msk.f32.mxu0 %vm981_vm4, %v3250_v11  ;;  %v931_v30 = vsel %vm900_vm2, %v572_v50, %v727_v48  ;;  %v491_v48 = vrot.slane %v3027_v15, 7  ;;  %v3312_v15 = vrot.slane %v2523_v12, 7 }
  0xe8   : > { %v819_v63 = vpop.permute.xlu0 %818 }
  0xe9   : > { %v729_v21 = vpop.permute.xlu1 %728  ;;  %v3259_v31 = vsel %vm937_vm3, %v914_v44, %v819_v63  ;;  %v492_v63 = vrot.slane %v3031_v49, 7  ;;  %v3320_v49 = vsel %vm466_vm1, 0.0, %v3312_v15 }
  0xea   : > { %2335 = vmatmul.mubr.msk.f32.gmra.mxu0 %vm981_vm4, %v3259_v31  ;;  %v932_v52 = vsel %vm900_vm2, %v514_v32, %v729_v21  ;;  %v565_v21 = vsel %vm466_vm1, 0.0, %v491_v48 }
  0xec   : > { %v853_v10 = vpop.permute.xlu0 %852 }
  0xed   : > { %v695_v17 = vpop.permute.xlu1 %694  ;;  %v3267_v60 = vsel %vm937_vm3, %v931_v30, %v853_v10  ;;  %v493_v10 = vsel %vm466_vm1, %v491_v48, %v492_v63 }
  0xee   : > { %2361 = vmatprep.mubr.msk.f32.mxu1 %vm981_vm4, %v3267_v60  ;;  %v915_v53 = vsel %vm900_vm2, %v564_v29, %v695_v17 }
  0xf0   : > { %v855_v61 = vpop.permute.xlu0 %854 }
  0xf1   : > { %v697_v5 = vpop.permute.xlu1 %696  ;;  %v3275_v34 = vsel %vm937_vm3, %v932_v52, %v855_v61 }
  0xf2   : > { %2362 = vmatmul.mubr.msk.f32.gmra.mxu1 %vm981_vm4, %v3275_v34  ;;  %v916_v55 = vsel %vm900_vm2, %v490_v25, %v697_v5 }
  0xf4   : > { %v821_v26 = vpop.permute.xlu0 %820 }
  0xf5   : > { %v731_v62 = vpop.permute.xlu1 %730  ;;  %v3283_v56 = vsel %vm937_vm3, %v915_v53, %v821_v26 }
  0xf6   : > { %2337 = vmatprep.mubr.msk.f32.mxu0 %vm981_vm4, %v3283_v56  ;;  %v933_v9 = vsel %vm900_vm2, %v573_v43, %v731_v62 }
  0xf8   : > { %v823_v33 = vpop.permute.xlu0 %822 }
  0xf9   : > { %v733_v13 = vpop.permute.xlu1 %732  ;;  %v3291_v41 = vsel %vm937_vm3, %v916_v55, %v823_v33 }
  0xfa   : > { %2338 = vmatmul.mubr.msk.f32.gmra.mxu0 %vm981_vm4, %v3291_v41  ;;  %v934_v14 = vsel %vm900_vm2, %v517_v3, %v733_v13 }
  0xfc   : > { %v857_v40 = vpop.permute.xlu0 %856 }
  0xfd   : > { %v699_v19 = vpop.permute.xlu1 %698  ;;  %v3299_v37 = vsel %vm937_vm3, %v933_v9, %v857_v40 }
  0xfe   : > { %2364 = vmatprep.mubr.msk.f32.mxu1 %vm981_vm4, %v3299_v37  ;;  %v917_v58 = vsel %vm900_vm2, %v565_v21, %v699_v19 }
 0x100   : > { %v859_v44 = vpop.permute.xlu0 %858 }
 0x101   : > { %v701_v18 = vpop.permute.xlu1 %700  ;;  %v3307_v50 = vsel %vm937_vm3, %v934_v14, %v859_v44 }
 0x102   : > { %2365 = vmatmul.mubr.msk.f32.gmra.mxu1 %vm981_vm4, %v3307_v50  ;;  %v918_v5 = vsel %vm900_vm2, %v493_v10, %v701_v18 }
 0x104   : > { %v825_v17 = vpop.permute.xlu0 %824 }
 0x105   : > { %v2495_v30 = vpop.permute.xlu1 %2494  ;;  %v954_v32 = vsel %vm937_vm3, %v917_v58, %v825_v17 }
 0x106   : > { %v2497_v23 = vunpack.i.h.bf16 %v2495_v30  ;;  %v2496_v52 = vunpack.i.l.bf16 %v2495_v30  ;;  %2340 = vmatprep.mubr.msk.f32.mxu0 %vm981_vm4, %v954_v32 }
 0x108   : > { %v827_v61 = vpop.permute.xlu0 %826  ;;  %v902_v62 = vsel %vm900_vm2, %v3312_v15, %v2497_v23  ;;  %v901_v26 = vsel %vm900_vm2, %v3320_v49, %v2496_v52 }
 0x109   : > { %v2500_v12 = vpop.permute.xlu1 %2499  ;;  %v955_v53 = vsel %vm937_vm3, %v918_v5, %v827_v61 }
 0x10a   : > { %v2502_v29 = vunpack.i.h.bf16 %v2500_v12  ;;  %v2501_v22 = vunpack.i.l.bf16 %v2500_v12  ;;  %2341 = vmatmul.mubr.msk.f32.gmra.mxu0 %vm981_vm4, %v955_v53 }
 0x10b   : > { %2427 = vmatprep.mubr.msk.f32.mxu0 %vm981_vm4, %v3121_v16 }
 0x10c   : > { %v939_v25 = vsel %vm937_vm3, %v902_v62, %v2502_v29  ;;  %v938_v38 = vsel %vm937_vm3, %v901_v26, %v2501_v22 }
 0x10d   : > { %2373 = vmatprep.mubr.msk.f32.mxu1 %vm981_vm4, %v938_v38 }
 0x10e   : > { %2374 = vmatmul.mubr.msk.f32.vlgmr.msra.gmra.mxu1 %vm981_vm4, %v939_v25  ;;  %2428 = vmatmul.mubr.msk.f32.vlgmr.msra.gmra.mxu0 %vm981_vm4, %v3131_v1 }
 0x10f   : > { %2376 = vmatprep.mubr.msk.f32.mxu1 %vm981_vm4, %v3057_v57  ;;  %2430 = vmatprep.mubr.msk.f32.mxu0 %vm981_vm4, %v3153_v54  ;;  %v2505_v57 = vpop.permute.xlu0 %2504 }
 0x112   : > { %2377 = vmatmul.mubr.msk.f32.gmra.mxu1 %vm981_vm4, %v3072_v20  ;;  %2431 = vmatmul.mubr.msk.f32.gmra.mxu0 %vm981_vm4, %v3163_v6  ;;  %v2506_v20 = vunpack.i.l.bf16 %v2505_v57 }
 0x113   : > { %2379 = vmatprep.mubr.msk.f32.mxu1 %vm981_vm4, %v3121_v16  ;;  %2433 = vmatprep.mubr.msk.f32.mxu0 %vm981_vm4, %v3185_v51 }
 0x116   : > { %2380 = vmatmul.mubr.msk.f32.gmra.mxu1 %vm981_vm4, %v3131_v1  ;;  %2434 = vmatmul.mubr.msk.f32.gmra.mxu0 %vm981_vm4, %v3195_v45 }
 0x117   : > { %2382 = vmatprep.mubr.msk.f32.mxu1 %vm981_vm4, %v3153_v54  ;;  %2436 = vmatprep.mubr.msk.f32.mxu0 %vm981_vm4, %v3217_v0 }
 0x11a   : > { %2383 = vmatmul.mubr.msk.f32.gmra.mxu1 %vm981_vm4, %v3163_v6  ;;  %2437 = vmatmul.mubr.msk.f32.gmra.mxu0 %vm981_vm4, %v3227_v27 }
 0x11b   : > { %2385 = vmatprep.mubr.msk.f32.mxu1 %vm981_vm4, %v3185_v51  ;;  %2439 = vmatprep.mubr.msk.f32.mxu0 %vm981_vm4, %v3250_v11 }
 0x11e   : > { %2386 = vmatmul.mubr.msk.f32.gmra.mxu1 %vm981_vm4, %v3195_v45  ;;  %2440 = vmatmul.mubr.msk.f32.gmra.mxu0 %vm981_vm4, %v3259_v31 }
 0x11f   : > { %2388 = vmatprep.mubr.msk.f32.mxu1 %vm981_vm4, %v3217_v0  ;;  %2442 = vmatprep.mubr.msk.f32.mxu0 %vm981_vm4, %v3283_v56 }
 0x122   : > { %2389 = vmatmul.mubr.msk.f32.gmra.mxu1 %vm981_vm4, %v3227_v27  ;;  %2443 = vmatmul.mubr.msk.f32.gmra.mxu0 %vm981_vm4, %v3291_v41 }
 0x123   : > { %2391 = vmatprep.mubr.msk.f32.mxu1 %vm981_vm4, %v3250_v11  ;;  %2445 = vmatprep.mubr.msk.f32.mxu0 %vm981_vm4, %v954_v32 }
 0x126   : > { %2392 = vmatmul.mubr.msk.f32.gmra.mxu1 %vm981_vm4, %v3259_v31  ;;  %2446 = vmatmul.mubr.msk.f32.gmra.mxu0 %vm981_vm4, %v955_v53 }
 0x127   : > { %2394 = vmatprep.mubr.msk.f32.mxu1 %vm981_vm4, %v3283_v56  ;;  %2448 = vmatprep.mubr.msk.f32.mxu0 %vm981_vm4, %v3075_v7 }
 0x12a   : > { %2395 = vmatmul.mubr.msk.f32.gmra.mxu1 %vm981_vm4, %v3291_v41  ;;  %2449 = vmatmul.mubr.msk.f32.gmra.mxu0 %vm981_vm4, %v3078_v35 }
 0x12b   : > { %2397 = vmatprep.mubr.msk.f32.mxu1 %vm981_vm4, %v954_v32  ;;  %2451 = vmatprep.mubr.msk.f32.mxu0 %vm981_vm4, %v3101_v8 }
 0x12e   : > { %2398 = vmatmul.mubr.msk.f32.gmra.mxu1 %vm981_vm4, %v955_v53  ;;  %2452 = vmatmul.mubr.msk.f32.gmra.mxu0 %vm981_vm4, %v3115_v36 }
 0x12f   : > { %2400 = vmatprep.mubr.msk.f32.mxu1 %vm981_vm4, %v3075_v7  ;;  %2454 = vmatprep.mubr.msk.f32.mxu0 %vm981_vm4, %v3137_v42  ;;  %v2510_v7 = vpop.permute.xlu1 %2509 }
 0x130   : > { %v2512_v16 = vunpack.i.h.bf16 %v2510_v7 }
 0x132   : > { %2401 = vmatmul.mubr.msk.f32.gmra.mxu1 %vm981_vm4, %v3078_v35  ;;  %2455 = vmatmul.mubr.msk.f32.gmra.mxu0 %vm981_vm4, %v3147_v2  ;;  %v2507_v35 = vunpack.i.h.bf16 %v2505_v57 }
 0x133   : > { %2403 = vmatprep.mubr.msk.f32.mxu1 %vm981_vm4, %v3101_v8  ;;  %2457 = vmatprep.mubr.msk.f32.mxu0 %vm981_vm4, %v3169_v46  ;;  %v2511_v8 = vunpack.i.l.bf16 %v2510_v7 }
 0x134   : > { %v936_v1 = vsel %vm900_vm2, %v3312_v15, %v2507_v35 }
 0x136   : > { %2404 = vmatmul.mubr.msk.f32.gmra.mxu1 %vm981_vm4, %v3115_v36  ;;  %2458 = vmatmul.mubr.msk.f32.gmra.mxu0 %vm981_vm4, %v3179_v24  ;;  %v935_v36 = vsel %vm900_vm2, %v3320_v49, %v2506_v20 }
 0x137   : > { %2406 = vmatprep.mubr.msk.f32.mxu1 %vm981_vm4, %v3137_v42  ;;  %2460 = vmatprep.mubr.msk.f32.mxu0 %vm981_vm4, %v3201_v39  ;;  %v972_v42 = vsel %vm937_vm3, %v935_v36, %v2511_v8 }
 0x13a   : > { %2407 = vmatmul.mubr.msk.f32.gmra.mxu1 %vm981_vm4, %v3147_v2  ;;  %2461 = vmatmul.mubr.msk.f32.gmra.mxu0 %vm981_vm4, %v3211_v4  ;;  %v973_v2 = vsel %vm937_vm3, %v936_v1, %v2512_v16 }
 0x13b   : > { %2409 = vmatprep.mubr.msk.f32.mxu1 %vm981_vm4, %v3169_v46  ;;  %2463 = vmatprep.mubr.msk.f32.mxu0 %vm981_vm4, %v3233_v59 }
 0x13e   : > { %2410 = vmatmul.mubr.msk.f32.gmra.mxu1 %vm981_vm4, %v3179_v24  ;;  %2464 = vmatmul.mubr.msk.f32.gmra.mxu0 %vm981_vm4, %v3243_v47 }
 0x13f   : > { %2412 = vmatprep.mubr.msk.f32.mxu1 %vm981_vm4, %v3201_v39  ;;  %2466 = vmatprep.mubr.msk.f32.mxu0 %vm981_vm4, %v3267_v60 }
 0x142   : > { %2413 = vmatmul.mubr.msk.f32.gmra.mxu1 %vm981_vm4, %v3211_v4  ;;  %2467 = vmatmul.mubr.msk.f32.gmra.mxu0 %vm981_vm4, %v3275_v34 }
 0x143   : > { %2415 = vmatprep.mubr.msk.f32.mxu1 %vm981_vm4, %v3233_v59  ;;  %2469 = vmatprep.mubr.msk.f32.mxu0 %vm981_vm4, %v3299_v37 }
 0x146   : > { %2416 = vmatmul.mubr.msk.f32.gmra.mxu1 %vm981_vm4, %v3243_v47  ;;  %2470 = vmatmul.mubr.msk.f32.gmra.mxu0 %vm981_vm4, %v3307_v50 }
 0x147   : > { %2418 = vmatprep.mubr.msk.f32.mxu1 %vm981_vm4, %v3267_v60  ;;  %2472 = vmatprep.mubr.msk.f32.mxu0 %vm981_vm4, %v972_v42 }
 0x14a   : > { %2419 = vmatmul.mubr.msk.f32.gmra.mxu1 %vm981_vm4, %v3275_v34  ;;  %2473 = vmatmul.mubr.msk.f32.gmra.mxu0 %vm981_vm4, %v973_v2 }
 0x15a   : > { %v2321_v6 = vpop.f32.mrf.mxu0 }
 0x15c   : > { %v3457_v54 = vpop.f32.mrf.mxu1  ;;  %v1144_v51 = vpop.f32.mrf.mxu0 }
 0x15e   : > { %v3459_v46 = vpop.f32.mrf.mxu1 }
 0x162   : > { %v3461_v24 = vpop.f32.mrf.mxu1 }
 0x164   : > { %v3463_v39 = vpop.f32.mrf.mxu1 }
 0x16a   : > { %v2324_v45 = vpop.f32.mrf.mxu0 }
 0x16c   : > { %v1154_v0 = vpop.f32.mrf.mxu0 }
 0x172   : > { %v3465_v4 = vpop.f32.mrf.mxu1 }
 0x174   : > { %v3467_v59 = vpop.f32.mrf.mxu1 }
 0x17a   : > { %v2327_v27 = vpop.f32.mrf.mxu0 }
 0x17c   : > { %v1164_v11 = vpop.f32.mrf.mxu0 }
 0x182   : > { %v3469_v47 = vpop.f32.mrf.mxu1 }
 0x184   : > { %v3473_v60 = vpop.f32.mrf.mxu1 }
 0x18a   : > { %v3471_v31 = vpop.f32.mrf.mxu0 }
 0x18c   : > { %v3477_v56 = vpop.f32.mrf.mxu0 }
 0x192   : > { %v3475_v34 = vpop.f32.mrf.mxu1 }
 0x194   : > { %v3481_v13 = vpop.f32.mrf.mxu1 }
 0x19a   : > { %v3479_v55 = vpop.f32.mrf.mxu0 }
 0x19c   : > { %v3485_v43 = vpop.f32.mrf.mxu0 }
 0x1a2   : > { %v3483_v33 = vpop.f32.mrf.mxu1 }
 0x1a4   : > { %v3489_v41 = vpop.f32.mrf.mxu1 }
 0x1aa   : > { %v3487_v28 = vpop.f32.mrf.mxu0 }
 0x1ac   : > { %v3493_v19 = vpop.f32.mrf.mxu0 }
 0x1b2   : > { %v3491_v9 = vpop.f32.mrf.mxu1 }
 0x1b4   : > { %v3497_v3 = vpop.f32.mrf.mxu1 }
 0x1ba   : > { %v3495_v40 = vpop.f32.mrf.mxu0 }
 0x1bc   : > { %v3501_v37 = vpop.f32.mrf.mxu0 }
 0x1c2   : > { %v3499_v48 = vpop.f32.mrf.mxu1 }
 0x1c4   : > { %v3505_v18 = vpop.f32.mrf.mxu1 }
 0x1ca   : > { %v3503_v14 = vpop.f32.mrf.mxu0 }
 0x1cc   : > { %v3507_v44 = vpop.f32.mrf.mxu0 }
 0x1ce   : > { %v2375_v21 = vpop.f32.mrf.mxu1  ;;  %v2429_v50 = vpop.f32.mrf.mxu0 }
 0x1cf   : > { %v1381_v63 = vadd.f32 %v2375_v21, %v2321_v6 }
 0x1d0   : > { %v1375_v15 = vpop.f32.mrf.mxu1  ;;  %v1610_v17 = vpop.f32.mrf.mxu0 }
 0x1d1   : > { %v1770_v58 = vadd.f32 %v2429_v50, %v1381_v63  ;;  %v1376_v30 = vadd.f32 %v1375_v15, %v1144_v51 }
 0x1d2   : > { %v2378_v10 = vpop.f32.mrf.mxu1  ;;  %v2432_v52 = vpop.f32.mrf.mxu0 }
 0x1d3   : > { %1975 = vst.msk [vmem:[%s3513_s28 + $0x8] sm:$0xff] %vm900_vm2, %v1770_v58  ;;  %v1769_v32 = vadd.f32 %v1610_v17, %v1376_v30  ;;  %v1391_v23 = vadd.f32 %v2378_v10, %v2324_v45  ;;  %v1873_v29 = vmul.f32 %v1770_v58, %v1770_v58  ;;  %v1802_v38 = vsel %vm900_vm2, %v1770_v58, 0.0 }
 0x1d4   : > { %v1385_v49 = vpop.f32.mrf.mxu1  ;;  %v1620_v61 = vpop.f32.mrf.mxu0 }
 0x1d5   : > { %v1872_v5 = vmul.f32 %v1769_v32, %v1769_v32  ;;  %1974 = vst.msk [vmem:[%s3513_s28] sm:$0xff] %vm900_vm2, %v1769_v32  ;;  %v1772_v12 = vadd.f32 %v2432_v52, %v1391_v23  ;;  %v1801_v22 = vsel %vm900_vm2, %v1769_v32, 0.0  ;;  %v1386_v53 = vadd.f32 %v1385_v49, %v1154_v0 }
 0x1d6   : > { %v2381_v62 = vpop.f32.mrf.mxu1  ;;  %v2435_v25 = vpop.f32.mrf.mxu0  ;;  %v1803_v35 = vadd.f32 %v1802_v38, %v1801_v22  ;;  %v1905_v42 = vsel %vm900_vm2, %v1873_v29, 0.0 }
 0x1d7   : > { %1977 = vst.msk [vmem:[%s3513_s28 + $0x18] sm:$0xff] %vm900_vm2, %v1772_v12  ;;  %v1401_v26 = vadd.f32 %v2381_v62, %v2327_v27  ;;  %v1904_v57 = vsel %vm900_vm2, %v1872_v5, 0.0  ;;  %v1771_v20 = vadd.f32 %v1620_v61, %v1386_v53  ;;  %v1875_v8 = vmul.f32 %v1772_v12, %v1772_v12 }
 0x1d8   : > { %v1395_v7 = vpop.f32.mrf.mxu1  ;;  %v1630_v1 = vpop.f32.mrf.mxu0  ;;  %v1906_v45 = vadd.f32 %v1905_v42, %v1904_v57  ;;  %v1806_v63 = vsel %vm900_vm2, %v1772_v12, 0.0 }
 0x1d9   : > { %v1774_v36 = vadd.f32 %v2435_v25, %v1401_v26  ;;  %v1396_v16 = vadd.f32 %v1395_v7, %v1164_v11  ;;  %v1804_v2 = vsel %vm900_vm2, %v1771_v20, 0.0  ;;  %v1874_v6 = vmul.f32 %v1771_v20, %v1771_v20  ;;  %1976 = vst.msk [vmem:[%s3513_s28 + $0x10] sm:$0xff] %vm900_vm2, %v1771_v20 }
 0x1da   : > { %v2384_v51 = vpop.f32.mrf.mxu1  ;;  %v1805_v0 = vadd.f32 %v1804_v2, %v1803_v35  ;;  %v2438_v21 = vpop.f32.mrf.mxu0  ;;  %v1909_v58 = vsel %vm900_vm2, %v1875_v8, 0.0 }
 0x1db   : > { %1979 = vst.msk [vmem:[%s3513_s28 + $0x28] sm:$0xff] %vm900_vm2, %v1774_v36  ;;  %v1773_v27 = vadd.f32 %v1630_v1, %v1396_v16  ;;  %v1907_v11 = vsel %vm900_vm2, %v1874_v6, 0.0  ;;  %v1411_v50 = vadd.f32 %v2384_v51, %v3471_v31  ;;  %v1877_v23 = vmul.f32 %v1774_v36, %v1774_v36 }
 0x1dc   : > { %v1405_v15 = vpop.f32.mrf.mxu1  ;;  %v1908_v30 = vadd.f32 %v1907_v11, %v1906_v45  ;;  %v1807_v17 = vadd.f32 %v1806_v63, %v1805_v0  ;;  %v1640_v32 = vpop.f32.mrf.mxu0  ;;  %v1810_v53 = vsel %vm900_vm2, %v1774_v36, 0.0 }
 0x1dd   : > { %v1808_v10 = vsel %vm900_vm2, %v1773_v27, 0.0  ;;  %1978 = vst.msk [vmem:[%s3513_s28 + $0x20] sm:$0xff] %vm900_vm2, %v1773_v27  ;;  %v1876_v52 = vmul.f32 %v1773_v27, %v1773_v27  ;;  %v1776_v49 = vadd.f32 %v2438_v21, %v1411_v50  ;;  %v1406_v5 = vadd.f32 %v1405_v15, %v3477_v56 }
 0x1de   : > { %v2387_v12 = vpop.f32.mrf.mxu1  ;;  %v1809_v61 = vadd.f32 %v1808_v10, %v1807_v17  ;;  %v1910_v29 = vadd.f32 %v1909_v58, %v1908_v30  ;;  %v2441_v22 = vpop.f32.mrf.mxu0 }
 0x1df   : > { %v1421_v31 = vadd.f32 %v2387_v12, %v3479_v55  ;;  %v1911_v62 = vsel %vm900_vm2, %v1876_v52, 0.0  ;;  %v1879_v26 = vmul.f32 %v1776_v49, %v1776_v49  ;;  %1981 = vst.msk [vmem:[%s3513_s28 + $0x38] sm:$0xff] %vm900_vm2, %v1776_v49  ;;  %v1775_v25 = vadd.f32 %v1640_v32, %v1406_v5 }
 0x1e0   : > { %v1415_v38 = vpop.f32.mrf.mxu1  ;;  %v1912_v57 = vadd.f32 %v1911_v62, %v1910_v29  ;;  %v1811_v20 = vadd.f32 %v1810_v53, %v1809_v61  ;;  %v1650_v35 = vpop.f32.mrf.mxu0  ;;  %v1913_v55 = vsel %vm900_vm2, %v1877_v23, 0.0  ;;  %v1814_v6 = vsel %vm900_vm2, %v1776_v49, 0.0 }
 0x1e1   : > { %v1778_v56 = vadd.f32 %v2441_v22, %v1421_v31  ;;  %v1416_v7 = vadd.f32 %v1415_v38, %v3485_v43  ;;  %v1812_v8 = vsel %vm900_vm2, %v1775_v25, 0.0  ;;  %v1878_v16 = vmul.f32 %v1775_v25, %v1775_v25  ;;  %1980 = vst.msk [vmem:[%s3513_s28 + $0x30] sm:$0xff] %vm900_vm2, %v1775_v25 }
 0x1e2   : > { %v2390_v36 = vpop.f32.mrf.mxu1  ;;  %v1813_v1 = vadd.f32 %v1812_v8, %v1811_v20  ;;  %v1914_v42 = vadd.f32 %v1913_v55, %v1912_v57  ;;  %v2444_v2 = vpop.f32.mrf.mxu0  ;;  %v1917_v27 = vsel %vm900_vm2, %v1879_v26, 0.0 }
 0x1e3   : > { %1983 = vst.msk [vmem:[%s3513_s28 + $0x48] sm:$0xff] %vm900_vm2, %v1778_v56  ;;  %v1915_v51 = vsel %vm900_vm2, %v1878_v16, 0.0  ;;  %v1777_v43 = vadd.f32 %v1650_v35, %v1416_v7  ;;  %v1431_v45 = vadd.f32 %v2390_v36, %v3487_v28  ;;  %v1881_v15 = vmul.f32 %v1778_v56, %v1778_v56 }
 0x1e4   : > { %v1425_v0 = vpop.f32.mrf.mxu1  ;;  %v1916_v21 = vadd.f32 %v1915_v51, %v1914_v42  ;;  %v1815_v63 = vadd.f32 %v1814_v6, %v1813_v1  ;;  %v1660_v50 = vpop.f32.mrf.mxu0  ;;  %v1818_v5 = vsel %vm900_vm2, %v1778_v56, 0.0 }
 0x1e5   : > { %v1426_v11 = vadd.f32 %v1425_v0, %v3493_v19  ;;  %v1816_v58 = vsel %vm900_vm2, %v1777_v43, 0.0  ;;  %v1880_v30 = vmul.f32 %v1777_v43, %v1777_v43  ;;  %1982 = vst.msk [vmem:[%s3513_s28 + $0x40] sm:$0xff] %vm900_vm2, %v1777_v43  ;;  %v1780_v17 = vadd.f32 %v2444_v2, %v1431_v45 }
 0x1e6   : > { %v2393_v10 = vpop.f32.mrf.mxu1  ;;  %v1817_v32 = vadd.f32 %v1816_v58, %v1815_v63  ;;  %v1918_v28 = vadd.f32 %v1917_v27, %v1916_v21  ;;  %v2447_v49 = vpop.f32.mrf.mxu0  ;;  %v1921_v62 = vsel %vm900_vm2, %v1881_v15, 0.0 }
 0x1e7   : > { %v1779_v23 = vadd.f32 %v1660_v50, %v1426_v11  ;;  %v1441_v52 = vadd.f32 %v2393_v10, %v3495_v40  ;;  %v1919_v19 = vsel %vm900_vm2, %v1880_v30, 0.0  ;;  %1985 = vst.msk [vmem:[%s3513_s28 + $0x58] sm:$0xff] %vm900_vm2, %v1780_v17  ;;  %v1883_v40 = vmul.f32 %v1780_v17, %v1780_v17 }
 0x1e8   : > { %v1435_v12 = vpop.f32.mrf.mxu1  ;;  %v1920_v61 = vadd.f32 %v1919_v19, %v1918_v28  ;;  %v1819_v29 = vadd.f32 %v1818_v5, %v1817_v32  ;;  %v1670_v53 = vpop.f32.mrf.mxu0  ;;  %v1822_v55 = vsel %vm900_vm2, %v1780_v17, 0.0 }
 0x1e9   : > { %v1820_v31 = vsel %vm900_vm2, %v1779_v23, 0.0  ;;  %v1882_v22 = vmul.f32 %v1779_v23, %v1779_v23  ;;  %1984 = vst.msk [vmem:[%s3513_s28 + $0x50] sm:$0xff] %vm900_vm2, %v1779_v23  ;;  %v1782_v26 = vadd.f32 %v2447_v49, %v1441_v52  ;;  %v1436_v25 = vadd.f32 %v1435_v12, %v3501_v37 }
 0x1ea   : > { %v2396_v38 = vpop.f32.mrf.mxu1  ;;  %v1821_v57 = vadd.f32 %v1820_v31, %v1819_v29  ;;  %v1922_v20 = vadd.f32 %v1921_v62, %v1920_v61  ;;  %v2450_v35 = vpop.f32.mrf.mxu0  ;;  %v1925_v51 = vsel %vm900_vm2, %v1883_v40, 0.0 }
 0x1eb   : > { %v1923_v56 = vsel %vm900_vm2, %v1882_v22, 0.0  ;;  %v1451_v7 = vadd.f32 %v2396_v38, %v3503_v14  ;;  %v1885_v8 = vmul.f32 %v1782_v26, %v1782_v26  ;;  %1987 = vst.msk [vmem:[%s3513_s28 + $0x68] sm:$0xff] %vm900_vm2, %v1782_v26  ;;  %v1781_v16 = vadd.f32 %v1670_v53, %v1436_v25 }
 0x1ec   : > { %v1445_v36 = vpop.f32.mrf.mxu1  ;;  %v1924_v1 = vadd.f32 %v1923_v56, %v1922_v20  ;;  %v1823_v42 = vadd.f32 %v1822_v55, %v1821_v57  ;;  %v1680_v6 = vpop.f32.mrf.mxu0  ;;  %v1826_v63 = vsel %vm900_vm2, %v1782_v26, 0.0 }
 0x1ed   : > { %v1784_v37 = vadd.f32 %v2450_v35, %v1451_v7  ;;  %v1446_v2 = vadd.f32 %v1445_v36, %v3507_v44  ;;  %v1824_v43 = vsel %vm900_vm2, %v1781_v16, 0.0  ;;  %v1884_v14 = vmul.f32 %v1781_v16, %v1781_v16  ;;  %1986 = vst.msk [vmem:[%s3513_s28 + $0x60] sm:$0xff] %vm900_vm2, %v1781_v16 }
 0x1ee   : > { %v2399_v45 = vpop.f32.mrf.mxu1  ;;  %v1825_v0 = vadd.f32 %v1824_v43, %v1823_v42  ;;  %v1926_v27 = vadd.f32 %v1925_v51, %v1924_v1  ;;  %v2453_v21 = vpop.f32.mrf.mxu0  ;;  %v1929_v58 = vsel %vm900_vm2, %v1885_v8, 0.0 }
 0x1ef   : > { %1989 = vst.msk [vmem:[%s3513_s28 + $0x78] sm:$0xff] %vm900_vm2, %v1784_v37  ;;  %v1927_v11 = vsel %vm900_vm2, %v1884_v14, 0.0  ;;  %v1783_v44 = vadd.f32 %v1680_v6, %v1446_v2  ;;  %v1461_v50 = vadd.f32 %v2399_v45, %v3457_v54  ;;  %v1887_v28 = vmul.f32 %v1784_v37, %v1784_v37 }
 0x1f0   : > { %v1455_v15 = vpop.f32.mrf.mxu1  ;;  %v1928_v30 = vadd.f32 %v1927_v11, %v1926_v27  ;;  %v1827_v17 = vadd.f32 %v1826_v63, %v1825_v0  ;;  %v1690_v32 = vpop.f32.mrf.mxu0  ;;  %v1830_v31 = vsel %vm900_vm2, %v1784_v37, 0.0 }
 0x1f1   : > { %v1456_v10 = vadd.f32 %v1455_v15, %v3459_v46  ;;  %v1828_v23 = vsel %vm900_vm2, %v1783_v44, 0.0  ;;  %v1886_v52 = vmul.f32 %v1783_v44, %v1783_v44  ;;  %1988 = vst.msk [vmem:[%s3513_s28 + $0x70] sm:$0xff] %vm900_vm2, %v1783_v44  ;;  %v1786_v49 = vadd.f32 %v2453_v21, %v1461_v50 }
 0x1f2   : > { %v2402_v5 = vpop.f32.mrf.mxu1  ;;  %v1829_v19 = vadd.f32 %v1828_v23, %v1827_v17  ;;  %v1930_v54 = vadd.f32 %v1929_v58, %v1928_v30  ;;  %v2456_v29 = vpop.f32.mrf.mxu0  ;;  %v1933_v38 = vsel %vm900_vm2, %v1887_v28, 0.0 }
 0x1f3   : > { %v1785_v12 = vadd.f32 %v1690_v32, %v1456_v10  ;;  %v1471_v61 = vadd.f32 %v2402_v5, %v3461_v24  ;;  %v1931_v46 = vsel %vm900_vm2, %v1886_v52, 0.0  ;;  %1991 = vst.msk [vmem:[%s3513_s28 + $0x88] sm:$0xff] %vm900_vm2, %v1786_v49  ;;  %v1889_v24 = vmul.f32 %v1786_v49, %v1786_v49 }
 0x1f4   : > { %v1465_v22 = vpop.f32.mrf.mxu1  ;;  %v1932_v53 = vadd.f32 %v1931_v46, %v1930_v54  ;;  %v1831_v62 = vadd.f32 %v1830_v31, %v1829_v19  ;;  %v1700_v25 = vpop.f32.mrf.mxu0  ;;  %v1834_v36 = vsel %vm900_vm2, %v1786_v49, 0.0 }
 0x1f5   : > { %v1832_v40 = vsel %vm900_vm2, %v1785_v12, 0.0  ;;  %v1888_v26 = vmul.f32 %v1785_v12, %v1785_v12  ;;  %1990 = vst.msk [vmem:[%s3513_s28 + $0x80] sm:$0xff] %vm900_vm2, %v1785_v12  ;;  %v1788_v57 = vadd.f32 %v2456_v29, %v1471_v61  ;;  %v1466_v20 = vadd.f32 %v1465_v22, %v3463_v39 }
 0x1f6   : > { %v2405_v56 = vpop.f32.mrf.mxu1  ;;  %v1833_v7 = vadd.f32 %v1832_v40, %v1831_v62  ;;  %v1934_v35 = vadd.f32 %v1933_v38, %v1932_v53  ;;  %v2459_v16 = vpop.f32.mrf.mxu0  ;;  %v1937_v14 = vsel %vm900_vm2, %v1889_v24, 0.0 }
 0x1f7   : > { %v1935_v55 = vsel %vm900_vm2, %v1888_v26, 0.0  ;;  %v1481_v8 = vadd.f32 %v2405_v56, %v3465_v4  ;;  %v1891_v1 = vmul.f32 %v1788_v57, %v1788_v57  ;;  %1993 = vst.msk [vmem:[%s3513_s28 + $0x98] sm:$0xff] %vm900_vm2, %v1788_v57  ;;  %v1787_v42 = vadd.f32 %v1700_v25, %v1466_v20 }
 0x1f8   : > { %v1475_v37 = vpop.f32.mrf.mxu1  ;;  %v1936_v2 = vadd.f32 %v1935_v55, %v1934_v35  ;;  %v1835_v6 = vadd.f32 %v1834_v36, %v1833_v7  ;;  %v1710_v43 = vpop.f32.mrf.mxu0  ;;  %v1838_v11 = vsel %vm900_vm2, %v1788_v57, 0.0 }
 0x1f9   : > { %v1790_v39 = vadd.f32 %v2459_v16, %v1481_v8  ;;  %v1476_v51 = vadd.f32 %v1475_v37, %v3467_v59  ;;  %v1836_v45 = vsel %vm900_vm2, %v1787_v42, 0.0  ;;  %v1890_v4 = vmul.f32 %v1787_v42, %v1787_v42  ;;  %1992 = vst.msk [vmem:[%s3513_s28 + $0x90] sm:$0xff] %vm900_vm2, %v1787_v42 }
 0x1fa   : > { %v2408_v0 = vpop.f32.mrf.mxu1  ;;  %v1837_v27 = vadd.f32 %v1836_v45, %v1835_v6  ;;  %v1938_v21 = vadd.f32 %v1937_v14, %v1936_v2  ;;  %v2462_v63 = vpop.f32.mrf.mxu0  ;;  %v1941_v58 = vsel %vm900_vm2, %v1891_v1, 0.0 }
 0x1fb   : > { %1995 = vst.msk [vmem:[%s3513_s28 + $0xa8] sm:$0xff] %vm900_vm2, %v1790_v39  ;;  %v1939_v44 = vsel %vm900_vm2, %v1890_v4, 0.0  ;;  %v1789_v59 = vadd.f32 %v1710_v43, %v1476_v51  ;;  %v1491_v50 = vadd.f32 %v2408_v0, %v3469_v47  ;;  %v1893_v28 = vmul.f32 %v1790_v39, %v1790_v39 }
 0x1fc   : > { %v1485_v15 = vpop.f32.mrf.mxu1  ;;  %v1940_v30 = vadd.f32 %v1939_v44, %v1938_v21  ;;  %v1839_v17 = vadd.f32 %v1838_v11, %v1837_v27  ;;  %v1720_v32 = vpop.f32.mrf.mxu0  ;;  %v1842_v29 = vsel %vm900_vm2, %v1790_v39, 0.0 }
 0x1fd   : > { %v1486_v10 = vadd.f32 %v1485_v15, %v3473_v60  ;;  %v1840_v23 = vsel %vm900_vm2, %v1789_v59, 0.0  ;;  %v1892_v52 = vmul.f32 %v1789_v59, %v1789_v59  ;;  %1994 = vst.msk [vmem:[%s3513_s28 + $0xa0] sm:$0xff] %vm900_vm2, %v1789_v59  ;;  %v1792_v49 = vadd.f32 %v2462_v63, %v1491_v50 }
 0x1fe   : > { %v2411_v5 = vpop.f32.mrf.mxu1  ;;  %v1841_v19 = vadd.f32 %v1840_v23, %v1839_v17  ;;  %v1942_v47 = vadd.f32 %v1941_v58, %v1940_v30  ;;  %v2465_v61 = vpop.f32.mrf.mxu0  ;;  %v1945_v26 = vsel %vm900_vm2, %v1893_v28, 0.0 }
 0x1ff   : > { %v1791_v54 = vadd.f32 %v1720_v32, %v1486_v10  ;;  %v1501_v12 = vadd.f32 %v2411_v5, %v3475_v34  ;;  %v1943_v60 = vsel %vm900_vm2, %v1892_v52, 0.0  ;;  %1997 = vst.msk [vmem:[%s3513_s28 + $0xb8] sm:$0xff] %vm900_vm2, %v1792_v49  ;;  %v1895_v34 = vmul.f32 %v1792_v49, %v1792_v49 }
 0x200   : > { %v1495_v31 = vpop.f32.mrf.mxu1  ;;  %v1944_v46 = vadd.f32 %v1943_v60, %v1942_v47  ;;  %v1843_v22 = vadd.f32 %v1842_v29, %v1841_v19  ;;  %v1730_v40 = vpop.f32.mrf.mxu0  ;;  %v1846_v55 = vsel %vm900_vm2, %v1792_v49, 0.0 }
 0x201   : > { %v1844_v53 = vsel %vm900_vm2, %v1791_v54, 0.0  ;;  %v1894_v62 = vmul.f32 %v1791_v54, %v1791_v54  ;;  %1996 = vst.msk [vmem:[%s3513_s28 + $0xb0] sm:$0xff] %vm900_vm2, %v1791_v54  ;;  %v1794_v25 = vadd.f32 %v2465_v61, %v1501_v12  ;;  %v1496_v38 = vadd.f32 %v1495_v31, %v3481_v13 }
 0x202   : > { %v2414_v24 = vpop.f32.mrf.mxu1  ;;  %v1845_v57 = vadd.f32 %v1844_v53, %v1843_v22  ;;  %v1946_v20 = vadd.f32 %v1945_v26, %v1944_v46  ;;  %v2468_v35 = vpop.f32.mrf.mxu0  ;;  %v1949_v6 = vsel %vm900_vm2, %v1895_v34, 0.0 }
 0x203   : > { %v1947_v56 = vsel %vm900_vm2, %v1894_v62, 0.0  ;;  %v1511_v7 = vadd.f32 %v2414_v24, %v3483_v33  ;;  %v1897_v8 = vmul.f32 %v1794_v25, %v1794_v25  ;;  %1999 = vst.msk [vmem:[%s3513_s28 + $0xc8] sm:$0xff] %vm900_vm2, %v1794_v25  ;;  %v1793_v16 = vadd.f32 %v1730_v40, %v1496_v38 }
 0x204   : > { %v1505_v36 = vpop.f32.mrf.mxu1  ;;  %v1948_v1 = vadd.f32 %v1947_v56, %v1946_v20  ;;  %v1847_v42 = vadd.f32 %v1846_v55, %v1845_v57  ;;  %v1740_v2 = vpop.f32.mrf.mxu0  ;;  %v1850_v4 = vsel %vm900_vm2, %v1794_v25, 0.0 }
 0x205   : > { %v1796_v13 = vadd.f32 %v2468_v35, %v1511_v7  ;;  %v1506_v37 = vadd.f32 %v1505_v36, %v3489_v41  ;;  %v1848_v39 = vsel %vm900_vm2, %v1793_v16, 0.0  ;;  %v1896_v33 = vmul.f32 %v1793_v16, %v1793_v16  ;;  %1998 = vst.msk [vmem:[%s3513_s28 + $0xc0] sm:$0xff] %vm900_vm2, %v1793_v16 }
 0x206   : > { %v2417_v51 = vpop.f32.mrf.mxu1  ;;  %v1849_v43 = vadd.f32 %v1848_v39, %v1847_v42  ;;  %v1950_v14 = vadd.f32 %v1949_v6, %v1948_v1  ;;  %v2471_v45 = vpop.f32.mrf.mxu0  ;;  %v1953_v63 = vsel %vm900_vm2, %v1897_v8, 0.0 }
 0x207   : > { %2001 = vst.msk [vmem:[%s3513_s28 + $0xd8] sm:$0xff] %vm900_vm2, %v1796_v13  ;;  %v1951_v0 = vsel %vm900_vm2, %v1896_v33, 0.0  ;;  %v1795_v41 = vadd.f32 %v1740_v2, %v1506_v37  ;;  %v1521_v27 = vadd.f32 %v2417_v51, %v3491_v9  ;;  %v1899_v15 = vmul.f32 %v1796_v13, %v1796_v13 }
 0x208   : > { %v1515_v21 = vpop.f32.mrf.mxu1  ;;  %v1952_v11 = vadd.f32 %v1951_v0, %v1950_v14  ;;  %v1851_v44 = vadd.f32 %v1850_v4, %v1849_v43  ;;  %v1750_v50 = vpop.f32.mrf.mxu0  ;;  %v1854_v49 = vsel %vm900_vm2, %v1796_v13, 0.0 }
 0x209   : > { %v1516_v59 = vadd.f32 %v1515_v21, %v3497_v3  ;;  %v1852_v58 = vsel %vm900_vm2, %v1795_v41, 0.0  ;;  %v1898_v30 = vmul.f32 %v1795_v41, %v1795_v41  ;;  %2000 = vst.msk [vmem:[%s3513_s28 + $0xd0] sm:$0xff] %vm900_vm2, %v1795_v41  ;;  %v1798_v17 = vadd.f32 %v2471_v45, %v1521_v27 }
 0x20a   : > { %v2420_v10 = vpop.f32.mrf.mxu1  ;;  %v1853_v32 = vadd.f32 %v1852_v58, %v1851_v44  ;;  %v1954_v9 = vadd.f32 %v1953_v63, %v1952_v11  ;;  %v2474_v52 = vpop.f32.mrf.mxu0  ;;  %v1957_v29 = vsel %vm900_vm2, %v1899_v15, 0.0 }
 0x20b   : > { %v1797_v28 = vadd.f32 %v1750_v50, %v1516_v59  ;;  %v1531_v23 = vadd.f32 %v2420_v10, %v3499_v48  ;;  %v1955_v3 = vsel %vm900_vm2, %v1898_v30, 0.0  ;;  %2003 = vst.msk [vmem:[%s3513_s28 + $0xe8] sm:$0xff] %vm900_vm2, %v1798_v17  ;;  %v1901_v48 = vmul.f32 %v1798_v17, %v1798_v17 }
 0x20c   : > { %v1525_v5 = vpop.f32.mrf.mxu1  ;;  %v1956_v19 = vadd.f32 %v1955_v3, %v1954_v9  ;;  %v1855_v47 = vadd.f32 %v1854_v49, %v1853_v32  ;;  %v1760_v61 = vpop.f32.mrf.mxu0  ;;  %v1858_v62 = vsel %vm900_vm2, %v1798_v17, 0.0 }
 0x20d   : > { %v1856_v54 = vsel %vm900_vm2, %v1797_v28, 0.0  ;;  %v1900_v12 = vmul.f32 %v1797_v28, %v1797_v28  ;;  %2002 = vst.msk [vmem:[%s3513_s28 + $0xe0] sm:$0xff] %vm900_vm2, %v1797_v28  ;;  %v1800_v60 = vadd.f32 %v2474_v52, %v1531_v23  ;;  %v1526_v31 = vadd.f32 %v1525_v5, %v3505_v18 }
 0x20e   : > { %v1857_v46 = vadd.f32 %v1856_v54, %v1855_v47  ;;  %v1958_v22 = vadd.f32 %v1957_v29, %v1956_v19  ;;  %v1961_v25 = vsel %vm900_vm2, %v1901_v48, 0.0 }
 0x20f   : > { %v1959_v53 = vsel %vm900_vm2, %v1900_v12, 0.0  ;;  %2005 = vst.msk [vmem:[%s3513_s28 + $0xf8] sm:$0xff] %vm900_vm2, %v1800_v60  ;;  %v1799_v40 = vadd.f32 %v1760_v61, %v1526_v31  ;;  %v1903_v38 = vmul.f32 %v1800_v60, %v1800_v60  ;;  %v1862_v56 = vsel %vm900_vm2, %v1800_v60, 0.0 }
 0x210   : > { %v1960_v26 = vadd.f32 %v1959_v53, %v1958_v22  ;;  %v1859_v34 = vadd.f32 %v1858_v62, %v1857_v46 }
 0x211   : > { %v1860_v24 = vsel %vm900_vm2, %v1799_v40, 0.0  ;;  %v1902_v57 = vmul.f32 %v1799_v40, %v1799_v40  ;;  %2004 = vst.msk [vmem:[%s3513_s28 + $0xf0] sm:$0xff] %vm900_vm2, %v1799_v40  ;;  %v1965_v8 = vsel %vm900_vm2, %v1903_v38, 0.0 }
 0x212   : > { %v1861_v18 = vadd.f32 %v1860_v24, %v1859_v34  ;;  %v1962_v20 = vadd.f32 %v1961_v25, %v1960_v26 }
 0x213   : > { %v1963_v7 = vsel %vm900_vm2, %v1902_v57, 0.0 }
 0x214   : > { %v1863_v35 = vadd.f32 %v1862_v56, %v1861_v18  ;;  %v1964_v55 = vadd.f32 %v1963_v7, %v1962_v20 }
 0x216   : > { %v1864_v16 = vrot.slane %v1863_v35, 4  ;;  %v1966_v36 = vadd.f32 %v1965_v8, %v1964_v55 }
 0x218   : > { %v1865_v1 = vadd.f32 %v1864_v16, %v1863_v35  ;;  %v1967_v42 = vrot.slane %v1966_v36, 4 }
 0x21a   : > { %v1866_v13 = vrot.slane %v1865_v1, 2  ;;  %v1968_v37 = vadd.f32 %v1967_v42, %v1966_v36 }
 0x21c   : > { %v1867_v2 = vadd.f32 %v1866_v13, %v1865_v1  ;;  %v1969_v6 = vrot.slane %v1968_v37, 2 }
 0x21e   : > { %v1868_v39 = vrot.slane %v1867_v2, 1  ;;  %v1970_v33 = vadd.f32 %v1969_v6, %v1968_v37 }
 0x220   : > { %v1869_v51 = vadd.f32 %v1868_v39, %v1867_v2  ;;  %v1971_v43 = vrot.slane %v1970_v33, 1 }
 0x222   : > { %1871 = vst.msk [vmem:[%s235_s7] sm:$0x1] %vm1870_vm5, %v1869_v51  ;;  %v1972_v14 = vadd.f32 %v1971_v43, %v1970_v33 }
 0x224   : > { %1973 = vst.msk [vmem:[%s235_s7 + $0x1] sm:$0x1] %vm1870_vm5, %v1972_v14 }
 0x225 PF: > { %s16_s18 = sadd.s32 1, %s2519_s18  }
 0x226   : > { %p13_p4 = scmp.ge.s32.totalorder %s16_s18, 4  }
 0x228   :  { %15 = sbr.rel (!%p13_p4) target bundleno = 1 (0x1), region = 80 }

</bundles_post_ra>
